<compile_context>
chip_gen: v7x
topology: tpu7x:2x2x1
jax: 0.10.0
libtpu: 0.0.40
codegen_flags: <defaults>
</compile_context>

<pallas_src>
import functools

import jax
import jax.numpy as jnp
from jax import lax
from jax.experimental import pallas as pl
from jax.experimental.pallas import tpu as pltpu

_VMEM_LIMIT = 32 * 1024 * 1024   # safe on v5e/v6e (128 MiB) and v7x (64 MiB)


# ---------------------------------------------------------------------------
# setup helpers (plain JAX, one-time): orthonormal filter construction
# ---------------------------------------------------------------------------

def _gram_schmidt(vs):
    """vs: (n, d).  Classical Gram-Schmidt + L2 normalization (mirror of the
    PyTorch helper)."""
    out = []
    for i in range(vs.shape[0]):
        v = vs[i]
        for u in out:
            v = v - (jnp.sum(v * u) / jnp.sum(u * u)) * u
        v = v / jnp.linalg.norm(v)
        out.append(v)
    return jnp.stack(out)


def initialize_orthogonal_filters(key, c, h, w):
    """Mirror of the PyTorch initialize_orthogonal_filters. Returns (c,h,w)."""
    if h * w < c:
        n = c // (h * w)
        keys = jax.random.split(key, n)
        blocks = [
            _gram_schmidt(jax.random.uniform(k, (h * w, h * w))).reshape(h * w, h, w)
            for k in keys
        ]
        return jnp.concatenate(blocks, axis=0)
    vs = jax.random.uniform(key, (c, h * w))
    return _gram_schmidt(vs).reshape(c, h, w)


def _pick_tile(total, max_tile, multiple):
    """Largest tile <= max_tile dividing `total` and a multiple of `multiple`
    (or equal to `total`, which Pallas always accepts as a full-dim block)."""
    t = min(total, max_tile)
    for cand in range(t, 0, -1):
        if total % cand == 0 and (cand % multiple == 0 or cand == total):
            return cand
    return total


# ---------------------------------------------------------------------------
# Pallas kernel 1: pointwise (1x1) conv + folded-BN bias
#                  (+ fused relu(att*x) prologue, residual add, ReLU epilogue)
# ---------------------------------------------------------------------------

def _pw_kernel_factory(act, has_att, has_res):
    def kernel(*refs):
        i = 0
        x_ref = refs[i]; i += 1                         # (THW, C1)
        att_ref = None
        if has_att:
            att_ref = refs[i]; i += 1                   # (1, C1) f32
        w_ref = refs[i]; i += 1                         # (C1, C2)
        b_ref = refs[i]; i += 1                         # (1, C2) f32
        res_ref = None
        if has_res:
            res_ref = refs[i]; i += 1                   # (THW, C2) f32
        o_ref = refs[i]                                 # (THW, C2)

        xv = x_ref[...]
        if has_att:
            # relu(attention * x) fused as the matmul prologue; att is a
            # per-image (1, C1) row broadcast over the spatial tile.
            xv = jnp.maximum(att_ref[...] * xv, 0.0).astype(w_ref.dtype)
        y = jnp.dot(xv, w_ref[...], preferred_element_type=jnp.float32)
        y = y + b_ref[...]                              # folded-BN bias
        if has_res:
            y = y + res_ref[...]                        # residual add
        if act == "relu":
            y = jnp.maximum(y, 0.0)
        o_ref[...] = y.astype(o_ref.dtype)
    return kernel


def _pointwise_conv(x, w, bias, *, act="none", att=None, res=None,
                    out_dtype=jnp.float32, compute_dtype=jnp.bfloat16,
                    max_tile=512):
    """x: (N, HW, C1); w: (C1, C2); bias: (1, C2); att: (N,1,C1) or None;
    res: (N, HW, C2) or None.  Returns (N, HW, C2) in out_dtype."""
    N, HW, C1 = x.shape
    C2 = w.shape[1]
    itemsize = jnp.dtype(compute_dtype).itemsize
    mult = 8 if itemsize == 4 else 16                   # bf16 packs 16 rows
    thw = _pick_tile(HW, max_tile, mult)
    grid = (N, HW // thw)

    inputs = [x.astype(compute_dtype)]
    in_specs = [pl.BlockSpec((None, thw, C1), lambda n, t: (n, t, 0))]
    if att is not None:
        inputs.append(att.astype(jnp.float32))
        in_specs.append(pl.BlockSpec((None, 1, C1), lambda n, t: (n, 0, 0)))
    inputs += [w.astype(compute_dtype), bias.astype(jnp.float32)]
    in_specs += [pl.BlockSpec((C1, C2), lambda n, t: (0, 0)),
                 pl.BlockSpec((1, C2), lambda n, t: (0, 0))]
    if res is not None:
        inputs.append(res.astype(jnp.float32))
        in_specs.append(pl.BlockSpec((None, thw, C2), lambda n, t: (n, t, 0)))

    flops = 2 * N * HW * C1 * C2
    bytes_acc = (N * HW * C1 * itemsize + C1 * C2 * itemsize + C2 * 4
                 + N * HW * C2 * jnp.dtype(out_dtype).itemsize)
    if att is not None:
        bytes_acc += N * C1 * 4
    if res is not None:
        bytes_acc += N * HW * C2 * 4

    return pl.pallas_call(
        _pw_kernel_factory(act, att is not None, res is not None),
        out_shape=jax.ShapeDtypeStruct((N, HW, C2), out_dtype),
        grid_spec=pltpu.PrefetchScalarGridSpec(
            num_scalar_prefetch=0, grid=grid,
            in_specs=in_specs,
            out_specs=pl.BlockSpec((None, thw, C2), lambda n, t: (n, t, 0))),
        compiler_params=pltpu.CompilerParams(
            dimension_semantics=("parallel", "parallel"),
            vmem_limit_bytes=_VMEM_LIMIT),
        cost_estimate=pl.CostEstimate(flops=int(flops), transcendentals=0,
                                      bytes_accessed=int(bytes_acc)),
    )(*inputs)


# ---------------------------------------------------------------------------
# Pallas kernel 2: 3x3 conv + folded BN via in-VMEM halo taps, with the
# GramSchmidt compression (pool + orthonormal filter sum) fused in the
# epilogue as a second (N,1,C2) output.
# ---------------------------------------------------------------------------

def _conv3x3_kernel_factory(Ho, Wo):
    def kernel(x_ref, w_ref, b_ref, f_ref, o_ref, comp_ref):
        # x_ref: (Ho+2, Wo+2, C1) halo tile (spatially pre-padded input)
        # w_ref: (9, C1, C2); b_ref: (1, C2); f_ref: (Ho*Wo, C2)
        # o_ref: (Ho, Wo, C2); comp_ref: (1, C2)
        C1 = x_ref.shape[-1]
        C2 = o_ref.shape[-1]
        acc = jnp.zeros((Ho * Wo, C2), jnp.float32)
        for kh in range(3):                       # static unroll over 9 taps
            for kw in range(3):
                tap = x_ref[kh:kh + Ho, kw:kw + Wo, :].reshape(Ho * Wo, C1)
                acc = acc + jnp.dot(tap, w_ref[kh * 3 + kw],
                                    preferred_element_type=jnp.float32)
        y = acc + b_ref[...]                      # folded-BN bias
        o_ref[...] = y.reshape(Ho, Wo, C2).astype(o_ref.dtype)
        # Fused GramSchmidtTransform: adaptive_avg_pool + orthonormal filter
        # reduction collapsed into one spatial weighted sum (f_ref holds the
        # bin-expanded filter divided by the bin size).
        comp_ref[...] = jnp.sum(y * f_ref[...], axis=0, keepdims=True)
    return kernel


def _conv3x3_bn_compress(y1, w9, bias, fexp, *, out_dtype, compute_dtype):
    """y1: (N,H,W,C1) -> pre = BN(conv3x3(y1)) of (N,H,W,C2) plus the
    per-image orthogonal compression (N, C2)."""
    N, H, W, C1 = y1.shape
    C2 = w9.shape[-1]
    itemsize = jnp.dtype(compute_dtype).itemsize
    # One cheap spatial pad of the smallest (planes-channel) intermediate; the
    # nine taps are formed from this halo tile in VMEM inside the kernel.
    # TODO(synk): for very large images, switch to row-strip halo tiles with a
    # resident compression accumulator instead of whole-image blocks.
    y1p = jnp.pad(y1.astype(compute_dtype), ((0, 0), (1, 1), (1, 1), (0, 0)))
    Hp, Wp = H + 2, W + 2

    flops = 2 * N * H * W * 9 * C1 * C2
    bytes_acc = (N * Hp * Wp * C1 * itemsize + 9 * C1 * C2 * itemsize
                 + (H * W + 1) * C2 * 4
                 + N * H * W * C2 * jnp.dtype(out_dtype).itemsize + N * C2 * 4)

    pre, comp = pl.pallas_call(
        _conv3x3_kernel_factory(H, W),
        out_shape=(jax.ShapeDtypeStruct((N, H, W, C2), out_dtype),
                   jax.ShapeDtypeStruct((N, 1, C2), jnp.float32)),
        grid_spec=pltpu.PrefetchScalarGridSpec(
            num_scalar_prefetch=0, grid=(N,),
            in_specs=[
                pl.BlockSpec((None, Hp, Wp, C1), lambda n: (n, 0, 0, 0)),
                pl.BlockSpec((9, C1, C2), lambda n: (0, 0, 0)),
                pl.BlockSpec((1, C2), lambda n: (0, 0)),
                pl.BlockSpec((H * W, C2), lambda n: (0, 0)),
            ],
            out_specs=[
                pl.BlockSpec((None, H, W, C2), lambda n: (n, 0, 0, 0)),
                pl.BlockSpec((None, 1, C2), lambda n: (n, 0, 0)),
            ]),
        compiler_params=pltpu.CompilerParams(
            dimension_semantics=("parallel",),
            vmem_limit_bytes=_VMEM_LIMIT),
        cost_estimate=pl.CostEstimate(flops=int(flops), transcendentals=0,
                                      bytes_accessed=int(bytes_acc)),
    )(y1p, w9.astype(compute_dtype), bias.astype(jnp.float32),
      fexp.astype(jnp.float32))
    return pre, comp.reshape(N, C2)


# ---------------------------------------------------------------------------
# eval-mode BatchNorm folding
# ---------------------------------------------------------------------------

def _fold_bn(weight_oihw, gamma, beta, rmean, rvar, eps):
    """Fold eval-mode BN into the conv weight; returns (kk, C1, C2) weight and
    a (1, C2) bias.  TODO(synk): train-mode BN (batch stats) not implemented."""
    c2, c1, kh, kw = weight_oihw.shape
    scale = gamma / jnp.sqrt(rvar + eps)
    bias = (beta - rmean * scale).reshape(1, c2).astype(jnp.float32)
    w = jnp.transpose(weight_oihw, (2, 3, 1, 0)).reshape(kh * kw, c1, c2)
    return w * scale, bias


# ---------------------------------------------------------------------------
# full OCA2 forward
# ---------------------------------------------------------------------------

@functools.partial(jax.jit, static_argnames=("stride", "compute_dtype", "eps"))
def oca2_forward(x, params, *, stride=1, compute_dtype=jnp.bfloat16, eps=1e-5):
    """OCA2 forward (NCHW in / NCHW out), eval-mode BatchNorm.

    params: dict with w_conv1/2/3 (OIHW), bn1/2/3 = (gamma, beta, mean, var),
            w_exc1 (hidden, planes), w_exc2 (planes, hidden),
            ortho_filter (planes, hf, hf).
    """
    N, Cin, H, W = x.shape
    planes = params["w_conv1"].shape[0]
    # downsample is None -> residual = x; like the PyTorch module this needs
    # inplanes == 4*planes and stride == 1 for the add to be shape-valid.
    # TODO(synk): arbitrary `downsample` submodules / stride>1 not translated.
    assert Cin == 4 * planes and stride == 1, "residual requires matching shapes"

    # TODO(synk): the NCHW<->NHWC boundary transposes could be dropped if the
    # surrounding model stays channels-last.
    x_nhwc = jnp.transpose(x, (0, 2, 3, 1)).astype(jnp.float32)
    x_flat = x_nhwc.reshape(N, H * W, Cin)
    inter_dtype = compute_dtype            # bf16 intermediates on the MXU path

    # ---- _preprocess: Conv1x1 + BN + ReLU ---------------------------------
    w1, b1 = _fold_bn(params["w_conv1"], *params["bn1"], eps)
    y1 = _pointwise_conv(x_flat, w1[0], b1, act="relu",
                         out_dtype=inter_dtype, compute_dtype=compute_dtype)
    y1 = y1.reshape(N, H, W, planes)

    # ---- _preprocess: Conv3x3 + BN, with fused GramSchmidt compression -----
    w2, b2 = _fold_bn(params["w_conv2"], *params["bn2"], eps)
    filt = params["ortho_filter"]                       # (planes, hf, hf)
    hf = filt.shape[-1]
    H2, W2 = H, W                                       # stride == 1
    assert H2 % hf == 0 and W2 % hf == 0
    # TODO(synk): non-divisible adaptive_avg_pool2d bins not implemented.
    bh, bw = H2 // hf, W2 // hf
    fexp = jnp.repeat(jnp.repeat(filt, bh, axis=1), bw, axis=2) / (bh * bw)
    fexp = jnp.transpose(fexp, (1, 2, 0)).reshape(H2 * W2, planes)
    pre, compressed = _conv3x3_bn_compress(
        y1, w2, b2, fexp, out_dtype=inter_dtype, compute_dtype=compute_dtype)

    # ---- excitation MLP + sigmoid: tiny (B x C x Hd) -> plain JAX ----------
    h = jax.nn.relu(compressed @ params["w_exc1"].T.astype(jnp.float32))
    att = jax.nn.sigmoid(h @ params["w_exc2"].T.astype(jnp.float32))
    att = att.reshape(N, 1, planes)

    # ---- _scale fused with gate, residual add and final ReLU ----------------
    #   relu( BN3(Conv1x1( relu(att * pre) )) + x )
    w3, b3 = _fold_bn(params["w_conv3"], *params["bn3"], eps)
    pre_flat = pre.reshape(N, H2 * W2, planes)
    out_flat = _pointwise_conv(pre_flat, w3[0], b3, act="relu", att=att,
                               res=x_flat, out_dtype=jnp.float32,
                               compute_dtype=compute_dtype)
    out = out_flat.reshape(N, H2, W2, 4 * planes)
    return jnp.transpose(out, (0, 3, 1, 2))


# ---------------------------------------------------------------------------
# pure-JAX reference (mirrors the PyTorch forward)
# ---------------------------------------------------------------------------

def _oca2_reference(x, params, *, stride=1, eps=1e-5):
    def bn(y, gbmv):
        g, b, m, v = gbmv
        s = g / jnp.sqrt(v + eps)
        return y * s[None, :, None, None] + (b - m * s)[None, :, None, None]

    def conv(z, w, s_, p_):
        return lax.conv_general_dilated(
            z, w, window_strides=(s_, s_), padding=[(p_, p_), (p_, p_)],
            dimension_numbers=("NCHW", "OIHW", "NCHW"),
            precision=lax.Precision.HIGHEST)

    y = jax.nn.relu(bn(conv(x, params["w_conv1"], 1, 0), params["bn1"]))
    pre = bn(conv(y, params["w_conv2"], stride, 1), params["bn2"])

    filt = params["ortho_filter"]
    hf = filt.shape[-1]
    N, C, H2, W2 = pre.shape
    if (H2, W2) != (hf, hf):
        pooled = pre.reshape(N, C, hf, H2 // hf, hf, W2 // hf).mean(axis=(3, 5))
    else:
        pooled = pre
    comp = jnp.sum(filt[None] * pooled, axis=(-1, -2))           # (N, C)
    h = jax.nn.relu(jnp.dot(comp, params["w_exc1"].T,
                            precision=lax.Precision.HIGHEST))
    att = jax.nn.sigmoid(jnp.dot(h, params["w_exc2"].T,
                                 precision=lax.Precision.HIGHEST))

    z = jax.nn.relu(att[:, :, None, None] * pre)
    s_out = bn(conv(z, params["w_conv3"], 1, 0), params["bn3"])
    return jax.nn.relu(s_out + x)


# ---------------------------------------------------------------------------
# main
# ---------------------------------------------------------------------------

if __name__ == "__main__":
    key = jax.random.PRNGKey(0)
    ks = jax.random.split(key, 20)

    # Small shapes consistent with the module (ResNet-style bottleneck):
    # inplanes must equal 4*planes when downsample is None.
    N, inplanes, H, W = 2, 64, 16, 16
    planes, stride, height = 16, 1, 8
    hidden = round(planes / 16)                                   # = 1

    def bn_params(k0, k1, k2, k3, c):
        return (jax.random.uniform(k0, (c,), jnp.float32, 0.5, 1.5),   # gamma
                jax.random.normal(k1, (c,), jnp.float32) * 0.1,        # beta
                jax.random.normal(k2, (c,), jnp.float32) * 0.1,        # mean
                jax.random.uniform(k3, (c,), jnp.float32, 0.5, 1.5))   # var

    params = {
        "w_conv1": jax.random.normal(ks[0], (planes, inplanes, 1, 1),
                                     jnp.float32) * 0.1,
        "bn1": bn_params(ks[1], ks[2], ks[3], ks[4], planes),
        "w_conv2": jax.random.normal(ks[5], (planes, planes, 3, 3),
                                     jnp.float32) * 0.1,
        "bn2": bn_params(ks[6], ks[7], ks[8], ks[9], planes),
        "w_conv3": jax.random.normal(ks[10], (planes * 4, planes, 1, 1),
                                     jnp.float32) * 0.1,
        "bn3": bn_params(ks[11], ks[12], ks[13], ks[14], planes * 4),
        "w_exc1": jax.random.normal(ks[15], (hidden, planes), jnp.float32) * 0.3,
        "w_exc2": jax.random.normal(ks[16], (planes, hidden), jnp.float32) * 0.3,
        "ortho_filter": initialize_orthogonal_filters(ks[17], planes,
                                                      height, height),
    }
    x = jax.random.normal(ks[18], (N, inplanes, H, W), jnp.float32)

    ref = _oca2_reference(x, params, stride=stride)

    # f32 compute path (tight check).
    out_f32 = jax.block_until_ready(
        oca2_forward(x, params, stride=stride, compute_dtype=jnp.float32))
    assert out_f32.shape == (N, 4 * planes, H, W), out_f32.shape
    err32 = float(jnp.max(jnp.abs(out_f32 - ref)))
    assert err32 < 3e-2, err32

    # default bf16 MXU path (bf16 operands + intermediates, f32 accumulation).
    out_bf16 = jax.block_until_ready(
        oca2_forward(x, params, stride=stride))
    errbf = float(jnp.max(jnp.abs(out_bf16 - ref)))
    assert errbf < 0.25, errbf

    print("KERNEL_OK")
</pallas_src>

<mosaic_0001>
module attributes {stable_mosaic.version = 11 : i64} {
  func.func @kernel(%arg0: i32, %arg1: i32, %arg2: memref<1x256x64xf32, #tpu.memory_space<vmem>>, %arg3: memref<64x16xf32, #tpu.memory_space<vmem>>, %arg4: memref<1x16xf32, #tpu.memory_space<vmem>>, %arg5: memref<1x256x16xf32, #tpu.memory_space<vmem>>) attributes {dimension_semantics = [#tpu.dimension_semantics<parallel>, #tpu.dimension_semantics<parallel>], iteration_bounds = array<i64: 2, 1>, scalar_prefetch = 0 : i64, scratch_operands = 0 : i64, tpu.core_type = #tpu.core_type<tc>, window_params = [{transform_indices = @transform_0, window_bounds = array<i64: 1, 256, 64>}, {pipeline_mode = #tpu.pipeline_mode<synchronous>, transform_indices = @transform_1, window_bounds = array<i64: 64, 16>}, {pipeline_mode = #tpu.pipeline_mode<synchronous>, transform_indices = @transform_2, window_bounds = array<i64: 1, 16>}, {transform_indices = @transform_3, window_bounds = array<i64: 1, 256, 16>}]} {
    %c0 = arith.constant 0 : index
    %c0_0 = arith.constant 0 : index
    %c0_1 = arith.constant 0 : index
    %0 = vector.load %arg2[%c0, %c0_0, %c0_1] : memref<1x256x64xf32, #tpu.memory_space<vmem>>, vector<1x256x64xf32>
    %1 = vector.shape_cast %0 : vector<1x256x64xf32> to vector<256x64xf32>
    %c0_2 = arith.constant 0 : index
    %c0_3 = arith.constant 0 : index
    %2 = vector.load %arg3[%c0_2, %c0_3] : memref<64x16xf32, #tpu.memory_space<vmem>>, vector<64x16xf32>
    %cst = arith.constant dense<0.000000e+00> : vector<256x16xf32>
    %3 = tpu.matmul %1, %2, %cst {dimension_numbers = #tpu.dot_dimension_numbers<[1], [0], [0], [1], [0, 0, 1, 1], [], []>} : vector<256x64xf32>, vector<64x16xf32>, vector<256x16xf32> -> vector<256x16xf32>
    %c0_4 = arith.constant 0 : index
    %c0_5 = arith.constant 0 : index
    %4 = vector.load %arg4[%c0_4, %c0_5] : memref<1x16xf32, #tpu.memory_space<vmem>>, vector<1x16xf32>
    %5 = vector.broadcast %4 : vector<1x16xf32> to vector<256x16xf32>
    %6 = arith.addf %3, %5 : vector<256x16xf32>
    %cst_6 = arith.constant 0.000000e+00 : f32
    %7 = vector.broadcast %cst_6 : f32 to vector<256x16xf32>
    %8 = arith.maximumf %6, %7 : vector<256x16xf32>
    %c0_7 = arith.constant 0 : index
    %c0_8 = arith.constant 0 : index
    %c0_9 = arith.constant 0 : index
    %9 = vector.load %arg5[%c0_7, %c0_8, %c0_9] : memref<1x256x16xf32, #tpu.memory_space<vmem>>, vector<1x256x16xf32>
    %10 = vector.shape_cast %9 : vector<1x256x16xf32> to vector<256x16xf32>
    %11 = vector.shape_cast %8 : vector<256x16xf32> to vector<1x256x16xf32>
    tpu.vector_store %arg5[%c0_7, %c0_8, %c0_9], %11 {strides = array<i32>} : memref<1x256x16xf32, #tpu.memory_space<vmem>>, vector<1x256x16xf32>,
    return
  }
  func.func @transform_0(%arg0: i32, %arg1: i32) -> (i32, i32, i32) {
    %c0_i32 = arith.constant 0 : i32
    %c0_i32_0 = arith.constant 0 : i32
    return %arg0, %arg1, %c0_i32 : i32, i32, i32
  }
  func.func @transform_1(%arg0: i32, %arg1: i32) -> (i32, i32) {
    %c0_i32 = arith.constant 0 : i32
    %c0_i32_0 = arith.constant 0 : i32
    %c0_i32_1 = arith.constant 0 : i32
    return %c0_i32, %c0_i32_0 : i32, i32
  }
  func.func @transform_2(%arg0: i32, %arg1: i32) -> (i32, i32) {
    %c0_i32 = arith.constant 0 : i32
    %c0_i32_0 = arith.constant 0 : i32
    %c0_i32_1 = arith.constant 0 : i32
    return %c0_i32, %c0_i32_0 : i32, i32
  }
  func.func @transform_3(%arg0: i32, %arg1: i32) -> (i32, i32, i32) {
    %c0_i32 = arith.constant 0 : i32
    %c0_i32_0 = arith.constant 0 : i32
    return %arg0, %arg1, %c0_i32 : i32, i32, i32
  }
}

module attributes {stable_mosaic.version = 11 : i64} {
  func.func @kernel(%arg0: i32, %arg1: memref<1x18x18x16xf32, #tpu.memory_space<vmem>>, %arg2: memref<9x16x16xf32, #tpu.memory_space<vmem>>, %arg3: memref<1x16xf32, #tpu.memory_space<vmem>>, %arg4: memref<256x16xf32, #tpu.memory_space<vmem>>, %arg5: memref<1x16x16x16xf32, #tpu.memory_space<vmem>>, %arg6: memref<1x1x16xf32, #tpu.memory_space<vmem>>) attributes {dimension_semantics = [#tpu.dimension_semantics<parallel>], iteration_bounds = array<i64: 2>, scalar_prefetch = 0 : i64, scratch_operands = 0 : i64, tpu.core_type = #tpu.core_type<tc>, window_params = [{transform_indices = @transform_0, window_bounds = array<i64: 1, 18, 18, 16>}, {pipeline_mode = #tpu.pipeline_mode<synchronous>, transform_indices = @transform_1, window_bounds = array<i64: 9, 16, 16>}, {pipeline_mode = #tpu.pipeline_mode<synchronous>, transform_indices = @transform_2, window_bounds = array<i64: 1, 16>}, {pipeline_mode = #tpu.pipeline_mode<synchronous>, transform_indices = @transform_3, window_bounds = array<i64: 256, 16>}, {transform_indices = @transform_4, window_bounds = array<i64: 1, 16, 16, 16>}, {transform_indices = @transform_5, window_bounds = array<i64: 1, 1, 16>}]} {
    %cst = arith.constant 0.000000e+00 : f32
    %0 = vector.broadcast %cst : f32 to vector<256x16xf32>
    %c0 = arith.constant 0 : index
    %c0_0 = arith.constant 0 : index
    %c0_1 = arith.constant 0 : index
    %c0_2 = arith.constant 0 : index
    %1 = vector.load %arg1[%c0, %c0_0, %c0_1, %c0_2] : memref<1x18x18x16xf32, #tpu.memory_space<vmem>>, vector<1x16x16x16xf32>
    %2 = vector.shape_cast %1 : vector<1x16x16x16xf32> to vector<16x16x16xf32>
    %3 = vector.shape_cast %2 : vector<16x16x16xf32> to vector<256x16xf32>
    %c0_3 = arith.constant 0 : index
    %c0_4 = arith.constant 0 : index
    %c0_5 = arith.constant 0 : index
    %4 = vector.load %arg2[%c0_3, %c0_4, %c0_5] : memref<9x16x16xf32, #tpu.memory_space<vmem>>, vector<1x16x16xf32>
    %5 = vector.shape_cast %4 : vector<1x16x16xf32> to vector<16x16xf32>
    %cst_6 = arith.constant dense<0.000000e+00> : vector<256x16xf32>
    %6 = tpu.matmul %3, %5, %cst_6 {dimension_numbers = #tpu.dot_dimension_numbers<[1], [0], [0], [1], [0, 0, 1, 1], [], []>} : vector<256x16xf32>, vector<16x16xf32>, vector<256x16xf32> -> vector<256x16xf32>
    %7 = arith.addf %0, %6 : vector<256x16xf32>
    %c0_7 = arith.constant 0 : index
    %c0_8 = arith.constant 0 : index
    %c1 = arith.constant 1 : index
    %c0_9 = arith.constant 0 : index
    %8 = vector.load %arg1[%c0_7, %c0_8, %c1, %c0_9] : memref<1x18x18x16xf32, #tpu.memory_space<vmem>>, vector<1x16x16x16xf32>
    %9 = vector.shape_cast %8 : vector<1x16x16x16xf32> to vector<16x16x16xf32>
    %10 = vector.shape_cast %9 : vector<16x16x16xf32> to vector<256x16xf32>
    %c1_10 = arith.constant 1 : index
    %c0_11 = arith.constant 0 : index
    %c0_12 = arith.constant 0 : index
    %11 = vector.load %arg2[%c1_10, %c0_11, %c0_12] : memref<9x16x16xf32, #tpu.memory_space<vmem>>, vector<1x16x16xf32>
    %12 = vector.shape_cast %11 : vector<1x16x16xf32> to vector<16x16xf32>
    %cst_13 = arith.constant dense<0.000000e+00> : vector<256x16xf32>
    %13 = tpu.matmul %10, %12, %cst_13 {dimension_numbers = #tpu.dot_dimension_numbers<[1], [0], [0], [1], [0, 0, 1, 1], [], []>} : vector<256x16xf32>, vector<16x16xf32>, vector<256x16xf32> -> vector<256x16xf32>
    %14 = arith.addf %7, %13 : vector<256x16xf32>
    %c0_14 = arith.constant 0 : index
    %c0_15 = arith.constant 0 : index
    %c2 = arith.constant 2 : index
    %c0_16 = arith.constant 0 : index
    %15 = vector.load %arg1[%c0_14, %c0_15, %c2, %c0_16] : memref<1x18x18x16xf32, #tpu.memory_space<vmem>>, vector<1x16x16x16xf32>
    %16 = vector.shape_cast %15 : vector<1x16x16x16xf32> to vector<16x16x16xf32>
    %17 = vector.shape_cast %16 : vector<16x16x16xf32> to vector<256x16xf32>
    %c2_17 = arith.constant 2 : index
    %c0_18 = arith.constant 0 : index
    %c0_19 = arith.constant 0 : index
    %18 = vector.load %arg2[%c2_17, %c0_18, %c0_19] : memref<9x16x16xf32, #tpu.memory_space<vmem>>, vector<1x16x16xf32>
    %19 = vector.shape_cast %18 : vector<1x16x16xf32> to vector<16x16xf32>
    %cst_20 = arith.constant dense<0.000000e+00> : vector<256x16xf32>
    %20 = tpu.matmul %17, %19, %cst_20 {dimension_numbers = #tpu.dot_dimension_numbers<[1], [0], [0], [1], [0, 0, 1, 1], [], []>} : vector<256x16xf32>, vector<16x16xf32>, vector<256x16xf32> -> vector<256x16xf32>
    %21 = arith.addf %14, %20 : vector<256x16xf32>
    %c0_21 = arith.constant 0 : index
    %c1_22 = arith.constant 1 : index
    %c0_23 = arith.constant 0 : index
    %c0_24 = arith.constant 0 : index
    %22 = vector.load %arg1[%c0_21, %c1_22, %c0_23, %c0_24] : memref<1x18x18x16xf32, #tpu.memory_space<vmem>>, vector<1x16x16x16xf32>
    %23 = vector.shape_cast %22 : vector<1x16x16x16xf32> to vector<16x16x16xf32>
    %24 = vector.shape_cast %23 : vector<16x16x16xf32> to vector<256x16xf32>
    %c3 = arith.constant 3 : index
    %c0_25 = arith.constant 0 : index
    %c0_26 = arith.constant 0 : index
    %25 = vector.load %arg2[%c3, %c0_25, %c0_26] : memref<9x16x16xf32, #tpu.memory_space<vmem>>, vector<1x16x16xf32>
    %26 = vector.shape_cast %25 : vector<1x16x16xf32> to vector<16x16xf32>
    %cst_27 = arith.constant dense<0.000000e+00> : vector<256x16xf32>
    %27 = tpu.matmul %24, %26, %cst_27 {dimension_numbers = #tpu.dot_dimension_numbers<[1], [0], [0], [1], [0, 0, 1, 1], [], []>} : vector<256x16xf32>, vector<16x16xf32>, vector<256x16xf32> -> vector<256x16xf32>
    %28 = arith.addf %21, %27 : vector<256x16xf32>
    %c0_28 = arith.constant 0 : index
    %c1_29 = arith.constant 1 : index
    %c1_30 = arith.constant 1 : index
    %c0_31 = arith.constant 0 : index
    %29 = vector.load %arg1[%c0_28, %c1_29, %c1_30, %c0_31] : memref<1x18x18x16xf32, #tpu.memory_space<vmem>>, vector<1x16x16x16xf32>
    %30 = vector.shape_cast %29 : vector<1x16x16x16xf32> to vector<16x16x16xf32>
    %31 = vector.shape_cast %30 : vector<16x16x16xf32> to vector<256x16xf32>
    %c4 = arith.constant 4 : index
    %c0_32 = arith.constant 0 : index
    %c0_33 = arith.constant 0 : index
    %32 = vector.load %arg2[%c4, %c0_32, %c0_33] : memref<9x16x16xf32, #tpu.memory_space<vmem>>, vector<1x16x16xf32>
    %33 = vector.shape_cast %32 : vector<1x16x16xf32> to vector<16x16xf32>
    %cst_34 = arith.constant dense<0.000000e+00> : vector<256x16xf32>
    %34 = tpu.matmul %31, %33, %cst_34 {dimension_numbers = #tpu.dot_dimension_numbers<[1], [0], [0], [1], [0, 0, 1, 1], [], []>} : vector<256x16xf32>, vector<16x16xf32>, vector<256x16xf32> -> vector<256x16xf32>
    %35 = arith.addf %28, %34 : vector<256x16xf32>
    %c0_35 = arith.constant 0 : index
    %c1_36 = arith.constant 1 : index
    %c2_37 = arith.constant 2 : index
    %c0_38 = arith.constant 0 : index
    %36 = vector.load %arg1[%c0_35, %c1_36, %c2_37, %c0_38] : memref<1x18x18x16xf32, #tpu.memory_space<vmem>>, vector<1x16x16x16xf32>
    %37 = vector.shape_cast %36 : vector<1x16x16x16xf32> to vector<16x16x16xf32>
    %38 = vector.shape_cast %37 : vector<16x16x16xf32> to vector<256x16xf32>
    %c5 = arith.constant 5 : index
    %c0_39 = arith.constant 0 : index
    %c0_40 = arith.constant 0 : index
    %39 = vector.load %arg2[%c5, %c0_39, %c0_40] : memref<9x16x16xf32, #tpu.memory_space<vmem>>, vector<1x16x16xf32>
    %40 = vector.shape_cast %39 : vector<1x16x16xf32> to vector<16x16xf32>
    %cst_41 = arith.constant dense<0.000000e+00> : vector<256x16xf32>
    %41 = tpu.matmul %38, %40, %cst_41 {dimension_numbers = #tpu.dot_dimension_numbers<[1], [0], [0], [1], [0, 0, 1, 1], [], []>} : vector<256x16xf32>, vector<16x16xf32>, vector<256x16xf32> -> vector<256x16xf32>
    %42 = arith.addf %35, %41 : vector<256x16xf32>
    %c0_42 = arith.constant 0 : index
    %c2_43 = arith.constant 2 : index
    %c0_44 = arith.constant 0 : index
    %c0_45 = arith.constant 0 : index
    %43 = vector.load %arg1[%c0_42, %c2_43, %c0_44, %c0_45] : memref<1x18x18x16xf32, #tpu.memory_space<vmem>>, vector<1x16x16x16xf32>
    %44 = vector.shape_cast %43 : vector<1x16x16x16xf32> to vector<16x16x16xf32>
    %45 = vector.shape_cast %44 : vector<16x16x16xf32> to vector<256x16xf32>
    %c6 = arith.constant 6 : index
    %c0_46 = arith.constant 0 : index
    %c0_47 = arith.constant 0 : index
    %46 = vector.load %arg2[%c6, %c0_46, %c0_47] : memref<9x16x16xf32, #tpu.memory_space<vmem>>, vector<1x16x16xf32>
    %47 = vector.shape_cast %46 : vector<1x16x16xf32> to vector<16x16xf32>
    %cst_48 = arith.constant dense<0.000000e+00> : vector<256x16xf32>
    %48 = tpu.matmul %45, %47, %cst_48 {dimension_numbers = #tpu.dot_dimension_numbers<[1], [0], [0], [1], [0, 0, 1, 1], [], []>} : vector<256x16xf32>, vector<16x16xf32>, vector<256x16xf32> -> vector<256x16xf32>
    %49 = arith.addf %42, %48 : vector<256x16xf32>
    %c0_49 = arith.constant 0 : index
    %c2_50 = arith.constant 2 : index
    %c1_51 = arith.constant 1 : index
    %c0_52 = arith.constant 0 : index
    %50 = vector.load %arg1[%c0_49, %c2_50, %c1_51, %c0_52] : memref<1x18x18x16xf32, #tpu.memory_space<vmem>>, vector<1x16x16x16xf32>
    %51 = vector.shape_cast %50 : vector<1x16x16x16xf32> to vector<16x16x16xf32>
    %52 = vector.shape_cast %51 : vector<16x16x16xf32> to vector<256x16xf32>
    %c7 = arith.constant 7 : index
    %c0_53 = arith.constant 0 : index
    %c0_54 = arith.constant 0 : index
    %53 = vector.load %arg2[%c7, %c0_53, %c0_54] : memref<9x16x16xf32, #tpu.memory_space<vmem>>, vector<1x16x16xf32>
    %54 = vector.shape_cast %53 : vector<1x16x16xf32> to vector<16x16xf32>
    %cst_55 = arith.constant dense<0.000000e+00> : vector<256x16xf32>
    %55 = tpu.matmul %52, %54, %cst_55 {dimension_numbers = #tpu.dot_dimension_numbers<[1], [0], [0], [1], [0, 0, 1, 1], [], []>} : vector<256x16xf32>, vector<16x16xf32>, vector<256x16xf32> -> vector<256x16xf32>
    %56 = arith.addf %49, %55 : vector<256x16xf32>
    %c0_56 = arith.constant 0 : index
    %c2_57 = arith.constant 2 : index
    %c2_58 = arith.constant 2 : index
    %c0_59 = arith.constant 0 : index
    %57 = vector.load %arg1[%c0_56, %c2_57, %c2_58, %c0_59] : memref<1x18x18x16xf32, #tpu.memory_space<vmem>>, vector<1x16x16x16xf32>
    %58 = vector.shape_cast %57 : vector<1x16x16x16xf32> to vector<16x16x16xf32>
    %59 = vector.shape_cast %58 : vector<16x16x16xf32> to vector<256x16xf32>
    %c8 = arith.constant 8 : index
    %c0_60 = arith.constant 0 : index
    %c0_61 = arith.constant 0 : index
    %60 = vector.load %arg2[%c8, %c0_60, %c0_61] : memref<9x16x16xf32, #tpu.memory_space<vmem>>, vector<1x16x16xf32>
    %61 = vector.shape_cast %60 : vector<1x16x16xf32> to vector<16x16xf32>
    %cst_62 = arith.constant dense<0.000000e+00> : vector<256x16xf32>
    %62 = tpu.matmul %59, %61, %cst_62 {dimension_numbers = #tpu.dot_dimension_numbers<[1], [0], [0], [1], [0, 0, 1, 1], [], []>} : vector<256x16xf32>, vector<16x16xf32>, vector<256x16xf32> -> vector<256x16xf32>
    %63 = arith.addf %56, %62 : vector<256x16xf32>
    %c0_63 = arith.constant 0 : index
    %c0_64 = arith.constant 0 : index
    %64 = vector.load %arg3[%c0_63, %c0_64] : memref<1x16xf32, #tpu.memory_space<vmem>>, vector<1x16xf32>
    %65 = vector.broadcast %64 : vector<1x16xf32> to vector<256x16xf32>
    %66 = arith.addf %63, %65 : vector<256x16xf32>
    %67 = vector.shape_cast %66 : vector<256x16xf32> to vector<16x16x16xf32>
    %c0_65 = arith.constant 0 : index
    %c0_66 = arith.constant 0 : index
    %c0_67 = arith.constant 0 : index
    %c0_68 = arith.constant 0 : index
    %68 = vector.load %arg5[%c0_65, %c0_66, %c0_67, %c0_68] : memref<1x16x16x16xf32, #tpu.memory_space<vmem>>, vector<1x16x16x16xf32>
    %69 = vector.shape_cast %68 : vector<1x16x16x16xf32> to vector<16x16x16xf32>
    %70 = vector.shape_cast %67 : vector<16x16x16xf32> to vector<1x16x16x16xf32>
    tpu.vector_store %arg5[%c0_65, %c0_66, %c0_67, %c0_68], %70 {strides = array<i32>} : memref<1x16x16x16xf32, #tpu.memory_space<vmem>>, vector<1x16x16x16xf32>,
    %c0_69 = arith.constant 0 : index
    %c0_70 = arith.constant 0 : index
    %71 = vector.load %arg4[%c0_69, %c0_70] : memref<256x16xf32, #tpu.memory_space<vmem>>, vector<256x16xf32>
    %72 = arith.mulf %66, %71 : vector<256x16xf32>
    %cst_71 = arith.constant dense<0.000000e+00> : vector<16xf32>
    %73 = vector.multi_reduction <add>, %72, %cst_71 [0] : vector<256x16xf32> to vector<16xf32>
    %74 = vector.shape_cast %73 : vector<16xf32> to vector<1x16xf32>
    %c0_72 = arith.constant 0 : index
    %c0_73 = arith.constant 0 : index
    %c0_74 = arith.constant 0 : index
    %75 = vector.load %arg6[%c0_72, %c0_73, %c0_74] : memref<1x1x16xf32, #tpu.memory_space<vmem>>, vector<1x1x16xf32>
    %76 = vector.shape_cast %75 : vector<1x1x16xf32> to vector<1x16xf32>
    %77 = vector.shape_cast %74 : vector<1x16xf32> to vector<1x1x16xf32>
    tpu.vector_store %arg6[%c0_72, %c0_73, %c0_74], %77 {strides = array<i32>} : memref<1x1x16xf32, #tpu.memory_space<vmem>>, vector<1x1x16xf32>,
    return
  }
  func.func @transform_0(%arg0: i32) -> (i32, i32, i32, i32) {
    %c0_i32 = arith.constant 0 : i32
    %c0_i32_0 = arith.constant 0 : i32
    %c0_i32_1 = arith.constant 0 : i32
    %c0_i32_2 = arith.constant 0 : i32
    return %arg0, %c0_i32, %c0_i32_0, %c0_i32_1 : i32, i32, i32, i32
  }
  func.func @transform_1(%arg0: i32) -> (i32, i32, i32) {
    %c0_i32 = arith.constant 0 : i32
    %c0_i32_0 = arith.constant 0 : i32
    %c0_i32_1 = arith.constant 0 : i32
    %c0_i32_2 = arith.constant 0 : i32
    return %c0_i32, %c0_i32_0, %c0_i32_1 : i32, i32, i32
  }
  func.func @transform_2(%arg0: i32) -> (i32, i32) {
    %c0_i32 = arith.constant 0 : i32
    %c0_i32_0 = arith.constant 0 : i32
    %c0_i32_1 = arith.constant 0 : i32
    return %c0_i32, %c0_i32_0 : i32, i32
  }
  func.func @transform_3(%arg0: i32) -> (i32, i32) {
    %c0_i32 = arith.constant 0 : i32
    %c0_i32_0 = arith.constant 0 : i32
    %c0_i32_1 = arith.constant 0 : i32
    return %c0_i32, %c0_i32_0 : i32, i32
  }
  func.func @transform_4(%arg0: i32) -> (i32, i32, i32, i32) {
    %c0_i32 = arith.constant 0 : i32
    %c0_i32_0 = arith.constant 0 : i32
    %c0_i32_1 = arith.constant 0 : i32
    %c0_i32_2 = arith.constant 0 : i32
    return %arg0, %c0_i32, %c0_i32_0, %c0_i32_1 : i32, i32, i32, i32
  }
  func.func @transform_5(%arg0: i32) -> (i32, i32, i32) {
    %c0_i32 = arith.constant 0 : i32
    %c0_i32_0 = arith.constant 0 : i32
    %c0_i32_1 = arith.constant 0 : i32
    return %arg0, %c0_i32, %c0_i32_0 : i32, i32, i32
  }
}

module attributes {stable_mosaic.version = 11 : i64} {
  func.func @kernel(%arg0: i32, %arg1: i32, %arg2: memref<1x256x16xf32, #tpu.memory_space<vmem>>, %arg3: memref<1x1x16xf32, #tpu.memory_space<vmem>>, %arg4: memref<16x64xf32, #tpu.memory_space<vmem>>, %arg5: memref<1x64xf32, #tpu.memory_space<vmem>>, %arg6: memref<1x256x64xf32, #tpu.memory_space<vmem>>, %arg7: memref<1x256x64xf32, #tpu.memory_space<vmem>>) attributes {dimension_semantics = [#tpu.dimension_semantics<parallel>, #tpu.dimension_semantics<parallel>], iteration_bounds = array<i64: 2, 1>, scalar_prefetch = 0 : i64, scratch_operands = 0 : i64, tpu.core_type = #tpu.core_type<tc>, window_params = [{transform_indices = @transform_0, window_bounds = array<i64: 1, 256, 16>}, {transform_indices = @transform_1, window_bounds = array<i64: 1, 1, 16>}, {pipeline_mode = #tpu.pipeline_mode<synchronous>, transform_indices = @transform_2, window_bounds = array<i64: 16, 64>}, {pipeline_mode = #tpu.pipeline_mode<synchronous>, transform_indices = @transform_3, window_bounds = array<i64: 1, 64>}, {transform_indices = @transform_4, window_bounds = array<i64: 1, 256, 64>}, {transform_indices = @transform_5, window_bounds = array<i64: 1, 256, 64>}]} {
    %c0 = arith.constant 0 : index
    %c0_0 = arith.constant 0 : index
    %c0_1 = arith.constant 0 : index
    %0 = vector.load %arg2[%c0, %c0_0, %c0_1] : memref<1x256x16xf32, #tpu.memory_space<vmem>>, vector<1x256x16xf32>
    %1 = vector.shape_cast %0 : vector<1x256x16xf32> to vector<256x16xf32>
    %c0_2 = arith.constant 0 : index
    %c0_3 = arith.constant 0 : index
    %c0_4 = arith.constant 0 : index
    %2 = vector.load %arg3[%c0_2, %c0_3, %c0_4] : memref<1x1x16xf32, #tpu.memory_space<vmem>>, vector<1x1x16xf32>
    %3 = vector.shape_cast %2 : vector<1x1x16xf32> to vector<1x16xf32>
    %4 = vector.broadcast %3 : vector<1x16xf32> to vector<256x16xf32>
    %5 = arith.mulf %4, %1 : vector<256x16xf32>
    %cst = arith.constant 0.000000e+00 : f32
    %6 = vector.broadcast %cst : f32 to vector<256x16xf32>
    %7 = arith.maximumf %5, %6 : vector<256x16xf32>
    %c0_5 = arith.constant 0 : index
    %c0_6 = arith.constant 0 : index
    %8 = vector.load %arg4[%c0_5, %c0_6] : memref<16x64xf32, #tpu.memory_space<vmem>>, vector<16x64xf32>
    %cst_7 = arith.constant dense<0.000000e+00> : vector<256x64xf32>
    %9 = tpu.matmul %7, %8, %cst_7 {dimension_numbers = #tpu.dot_dimension_numbers<[1], [0], [0], [1], [0, 0, 1, 1], [], []>} : vector<256x16xf32>, vector<16x64xf32>, vector<256x64xf32> -> vector<256x64xf32>
    %c0_8 = arith.constant 0 : index
    %c0_9 = arith.constant 0 : index
    %10 = vector.load %arg5[%c0_8, %c0_9] : memref<1x64xf32, #tpu.memory_space<vmem>>, vector<1x64xf32>
    %11 = vector.broadcast %10 : vector<1x64xf32> to vector<256x64xf32>
    %12 = arith.addf %9, %11 : vector<256x64xf32>
    %c0_10 = arith.constant 0 : index
    %c0_11 = arith.constant 0 : index
    %c0_12 = arith.constant 0 : index
    %13 = vector.load %arg6[%c0_10, %c0_11, %c0_12] : memref<1x256x64xf32, #tpu.memory_space<vmem>>, vector<1x256x64xf32>
    %14 = vector.shape_cast %13 : vector<1x256x64xf32> to vector<256x64xf32>
    %15 = arith.addf %12, %14 : vector<256x64xf32>
    %cst_13 = arith.constant 0.000000e+00 : f32
    %16 = vector.broadcast %cst_13 : f32 to vector<256x64xf32>
    %17 = arith.maximumf %15, %16 : vector<256x64xf32>
    %c0_14 = arith.constant 0 : index
    %c0_15 = arith.constant 0 : index
    %c0_16 = arith.constant 0 : index
    %18 = vector.load %arg7[%c0_14, %c0_15, %c0_16] : memref<1x256x64xf32, #tpu.memory_space<vmem>>, vector<1x256x64xf32>
    %19 = vector.shape_cast %18 : vector<1x256x64xf32> to vector<256x64xf32>
    %20 = vector.shape_cast %17 : vector<256x64xf32> to vector<1x256x64xf32>
    tpu.vector_store %arg7[%c0_14, %c0_15, %c0_16], %20 {strides = array<i32>} : memref<1x256x64xf32, #tpu.memory_space<vmem>>, vector<1x256x64xf32>,
    return
  }
  func.func @transform_0(%arg0: i32, %arg1: i32) -> (i32, i32, i32) {
    %c0_i32 = arith.constant 0 : i32
    %c0_i32_0 = arith.constant 0 : i32
    return %arg0, %arg1, %c0_i32 : i32, i32, i32
  }
  func.func @transform_1(%arg0: i32, %arg1: i32) -> (i32, i32, i32) {
    %c0_i32 = arith.constant 0 : i32
    %c0_i32_0 = arith.constant 0 : i32
    %c0_i32_1 = arith.constant 0 : i32
    return %arg0, %c0_i32, %c0_i32_0 : i32, i32, i32
  }
  func.func @transform_2(%arg0: i32, %arg1: i32) -> (i32, i32) {
    %c0_i32 = arith.constant 0 : i32
    %c0_i32_0 = arith.constant 0 : i32
    %c0_i32_1 = arith.constant 0 : i32
    return %c0_i32, %c0_i32_0 : i32, i32
  }
  func.func @transform_3(%arg0: i32, %arg1: i32) -> (i32, i32) {
    %c0_i32 = arith.constant 0 : i32
    %c0_i32_0 = arith.constant 0 : i32
    %c0_i32_1 = arith.constant 0 : i32
    return %c0_i32, %c0_i32_0 : i32, i32
  }
  func.func @transform_4(%arg0: i32, %arg1: i32) -> (i32, i32, i32) {
    %c0_i32 = arith.constant 0 : i32
    %c0_i32_0 = arith.constant 0 : i32
    return %arg0, %arg1, %c0_i32 : i32, i32, i32
  }
  func.func @transform_5(%arg0: i32, %arg1: i32) -> (i32, i32, i32) {
    %c0_i32 = arith.constant 0 : i32
    %c0_i32_0 = arith.constant 0 : i32
    return %arg0, %arg1, %c0_i32 : i32, i32, i32
  }
}

</mosaic_0001>

<bundles_post_ra>
// kernel: oca2_forward.3
= control target key start
LH: loop header
LB: loop body
LE: loop exit
PB: predicated region body
PF: predicated region fallthrough
CT: control target
= control target key end

     0   :  { %8 = vsyncpa [#allocation3], 0  ;;  %s1403_s0 = inlined_call_operand.hbm [shape: f32[2,256,64], index: 0, kind: input, shape index: {}]   ;;  %s1404_s1 = inlined_call_operand.vmem [shape: f32[64,16], index: 1, kind: input, shape index: {}]   ;;  %s1405_s2 = inlined_call_operand.vmem [shape: f32[1,16], index: 2, kind: input, shape index: {}]   ;;  %s1406_s3 = inlined_call_operand.vmem [shape: f32[2,256,16], index: 3, kind: output, shape index: {}]  }
   0x1   :  { %10 = vsyncpa [#allocation3 + $0x1], 0  ;;  %s1086_s12 = smov 0   ;;  %s1088_s13 = smov 0  }
   0x2   :  { %s1090_s14 = smov 0   ;;  %s1092_s15 = smov 0  }
   0x3   :  { %s1094_s16 = smov 0   ;;  %s1096_s17 = smov 0  }
   0x4 LB: > { %s748_s18 = sadd.s32 4294967295, %s1061_s17   ;;  %s28_s19 = sadd.s32 1, %s1057_s16  ;;  %s1061_s17 = sphi %s1096_s17, %s16_s17   ;;  %s1057_s16 = sphi %s1094_s16, %s1414_s16   ;;  %s1053_s15 = sphi %s1092_s15, %s1413_s15   ;;  %s1049_s14 = sphi %s1090_s14, %s1412_s14   ;;  %s1045_s13 = sphi %s1088_s13, %s1411_s13   ;;  %s1041_s12 = sphi %s1086_s12, %s1410_s12  }
   0x5   : > { %p30_p0 = scmp.ge.s32.totalorder %s28_s19, 2  ;;  %s37_s20 = sadd.s32 1, %s1049_s14 }
   0x6   : > { %p44_p1 = scmp.ne.s32.totalorder %s1049_s14, %s1045_s13  ;;  %p45_p2 = scmp.eq.s32.totalorder %s1061_s17, 0 }
   0x7   : > { %s1416_s19 = smov (%p30_p0, %s28_s19), 0  ;;  %p50_p4 = scmp.ne.s32.totalorder %s1045_s13, %s1041_s12 }
   0x8   : > { %p1122_p3 = por %p45_p2, %p44_p1  ;;  %s32_s22 = ssub.s32 %s1057_s16, %s1416_s19 }
   0x9   : > { %p51_p5 = scmp.eq.s32.totalorder %s748_s18, 0  ;;  %p35_p6 = scmp.eq.s32.totalorder %s32_s22, 0 }
   0xa   : > { %p930_p8 = scmp.lt.s32.totalorder %s1061_s17, 2  ;;  %s150_s25 = sand.u32 1, %s1049_s14  }
   0xb   : > { %p1129_p7 = por %p51_p5, %p50_p4  ;;  %s794_s26 = sshll.u32 %s1057_s16, 12 }
   0xc   : > { %s1135_s24 = scalar_select %p35_p6, %s1049_s14, %s37_s20  }
   0xd   : > { %s752_s27 = sshll.u32 %s150_s25, 8  ;;  %s1142_s30 = scalar_lea.hbm %s1403_s0, %s794_s26 }
   0xe   : > { %s154_s4 = scalar_lea.vmem [#allocation2], %s752_s27  ;;  %p1146_p9 = pnand %p930_p8, %p1122_p3 }
   0xf   : > { %s163_s5 = sshll.u32 %s154_s4, 4  ;;  %s1152_s7 = scalar_lea.sflag [#allocation3], %s150_s25  ;;  %s1150_s5 = int_to_ptr.vmem [resolvable:$true] %s163_s5 }
  0x10   : > { %s981_s8 = scalar_lea.hbm %s1142_s30, 4096  ;;  %p983_p11 = pneg %p1146_p9 }
  0x11   : > { %p982_p10 = scmp.ne.s32.totalorder %s1142_s30, %s981_s8  ;;  %s986_s11 = scalar_lea.hbm %s1403_s0, 8192 }
  0x12   : > { %p987_p0 = scmp.lt.u32.totalorder %s1142_s30, %s1403_s0  ;;  %p988_p1 = scmp.lt.u32.totalorder %s986_s11, %s981_s8 }
  0x13   : > { %p984_p12 = pnand %p983_p11, %p982_p10  ;;  %p990_p3 = scmp.lt.u32.totalorder %s981_s8, %s1142_s30 }
  0x14   : > { %p989_p2 = por %p988_p1, %p987_p0 }
  0x15   : > { %p985_p13 = pneg %p984_p12 }
  0x16   : > { %p991_p4 = por %p990_p3, %p989_p2 }
  0x18   : > { %p992_p5 = pnand %p991_p4, %p985_p13 }
  0x1a   : > { %995 = shalt.err (!%p992_p5)
}
  0x1b   : > { %s996_s20 = scalar_lea.vmem %s1150_s5, 4096  ;;  %s1063_s21 = smov [#allocation2]  }
  0x1c   : > { %p997_p6 = scmp.ne.s32.totalorder %s1150_s5, %s996_s20  ;;  %s1001_s22 = sshll.u32 %s1063_s21, 4  ;;  %s1002_s22 = int_to_ptr.vmem [resolvable:$false] %s1001_s22 }
  0x1d   : > { %s1003_s25 = scalar_lea.vmem %s1002_s22, 8192  ;;  %p1004_p12 = scmp.lt.s32.totalorder %s1150_s5, %s1002_s22 }
  0x1e   : > { %p999_p8 = pnand %p997_p6, %p983_p11  ;;  %p1005_p0 = scmp.lt.s32.totalorder %s1003_s25, %s996_s20 }
  0x20   : > { %p1000_p10 = pneg %p999_p8  ;;  %p1006_p1 = por %p1005_p0, %p1004_p12 }
  0x22   : > { %p1007_p2 = pnand %p1006_p1, %p1000_p10 }
  0x24   : > { %1010 = shalt.err (!%p1007_p2)
}
  0x25   : > { %s1064_s26 = smov 128   ;;  %s1065_s27 = smov 8  }
  0x26   : > { %929 = dma.hbm_to_vmem [thread:$0]  (!%p1146_p9), %s1142_s30, 4096, %s1150_s5, %s1152_s7, %s1064_s26, %s1064_s26, %s1065_s27  }
  0x27   : > { %p755_p11 = scmp.ge.s32.totalorder %s1061_s17, 1  ;;  %p171_p13 = scmp.lt.s32.totalorder %s1061_s17, 3 }
  0x29   : > { %p172_p3 = pnand %p755_p11, %p171_p13 }
  0x2a   : > { %s177_s28 = sand.u32 (!%p172_p3), 1, %s1045_s13  }
  0x2b   : > { %175 = sbr.rel (%p172_p3) target bundleno = 316 (0x13c), region = 32  ;;  %s756_s29 = sshll.u32 (!%p172_p3), %s177_s28, 8 }
  0x2c   : > { %s178_s4 = scalar_lea.sflag (!%p172_p3), [#allocation3], %s177_s28  ;;  %s1183_s8 = scalar_lea.vmem (!%p172_p3), [#allocation2], %s756_s29 }
  0x32   : > { %1036 = dma.done.wait (%p1129_p7), %s178_s4, 4096  }
  0x33   : > { %1038 = vsyncadd (%p1129_p7), %s178_s4, 4294963200  ;;  %v251_v0 = vld [vmem:[%s1404_s1] sm:$0xff]  ;;  %v252_v1 = vld [vmem:[%s1404_s1 + $0x8] sm:$0xff]  ;;  %vm266_vm0 = vcmask 523264   ;;  %p210_p7 = scmp.lt.s32.totalorder %s1053_s15, 1  ;;  %vm620_vm1 = vcmask 130048  }
  0x34   : > { %v253_v2 = vld [vmem:[%s1404_s1 + $0x10] sm:$0xff]  ;;  %v900_v3 = vpack.c.bf16 %v252_v1, %v251_v0  ;;  %v254_v4 = vld [vmem:[%s1404_s1 + $0x18] sm:$0xff]  ;;  %v255_v6 = vld [vmem:[%s1404_s1 + $0x20] sm:$0xff] }
  0x35   : > { %v904_v5 = vpack.c.bf16 %v254_v4, %v253_v2  ;;  %v256_v7 = vld [vmem:[%s1404_s1 + $0x28] sm:$0xff]  ;;  %v219_v8 = vld [vmem:[%s1183_s8] sm:$0xff]  ;;  %v257_v11 = vld [vmem:[%s1404_s1 + $0x30] sm:$0xff]  ;;  %s1418_s15 = smov (!%p210_p7, %s1053_s15), 1 }
  0x36   : > { %901 = vmatprep.subr.bf16.mxu0 %v900_v3  ;;  %916 = vmatprep.subr.bf16.mxu1 %v900_v3  ;;  %v235_v9 = vld [vmem:[%s1183_s8 + $0x80] sm:$0xff]  ;;  %v908_v10 = vpack.c.bf16 %v256_v7, %v255_v6  ;;  %v258_v12 = vld [vmem:[%s1404_s1 + $0x38] sm:$0xff]  ;;  %v220_v14 = vld [vmem:[%s1183_s8 + $0x8] sm:$0xff]  ;;  %s795_s4 = sshll.u32 %s1418_s15, 8 }
  0x37   : > { %903 = vmatpush3.bf16.msra.mxu0 %v900_v3  ;;  %920 = vmatpush3.bf16.msra.mxu1 %v900_v3  ;;  %v912_v13 = vpack.c.bf16 %v258_v12, %v257_v11  ;;  %v236_v15 = vld [vmem:[%s1183_s8 + $0x88] sm:$0xff]  ;;  %v221_v16 = vld [vmem:[%s1183_s8 + $0x10] sm:$0xff]  ;;  %v222_v18 = vld [vmem:[%s1183_s8 + $0x18] sm:$0xff]  ;;  %s1289_s10 = scalar_lea.vmem %s1406_s3, %s795_s4 }
  0x38   : > { %905 = vmatprep.subr.bf16.mxu0 %v904_v5  ;;  %917 = vmatprep.subr.bf16.mxu1 %v904_v5  ;;  %v237_v17 = vld [vmem:[%s1183_s8 + $0x90] sm:$0xff]  ;;  %v238_v19 = vld [vmem:[%s1183_s8 + $0x98] sm:$0xff]  ;;  %v223_v20 = vld [vmem:[%s1183_s8 + $0x20] sm:$0xff] }
  0x39   : > { %852 = vmatprep.mubr.msk.f32.mxu0 %vm266_vm0, %v219_v8  ;;  %876 = vmatprep.mubr.msk.f32.mxu1 %vm266_vm0, %v235_v9  ;;  %v239_v21 = vld [vmem:[%s1183_s8 + $0xa0] sm:$0xff]  ;;  %v224_v22 = vld [vmem:[%s1183_s8 + $0x28] sm:$0xff]  ;;  %v225_v24 = vld [vmem:[%s1183_s8 + $0x30] sm:$0xff] }
  0x3a   : > { %v240_v23 = vld [vmem:[%s1183_s8 + $0xa8] sm:$0xff]  ;;  %v241_v25 = vld [vmem:[%s1183_s8 + $0xb0] sm:$0xff]  ;;  %v226_v26 = vld [vmem:[%s1183_s8 + $0x38] sm:$0xff] }
  0x3b   : > { %907 = vmatpush3.bf16.msra.mxu0 %v904_v5  ;;  %921 = vmatpush3.bf16.msra.mxu1 %v904_v5  ;;  %v242_v27 = vld [vmem:[%s1183_s8 + $0xb8] sm:$0xff]  ;;  %v227_v28 = vld [vmem:[%s1183_s8 + $0x40] sm:$0xff]  ;;  %v228_v30 = vld [vmem:[%s1183_s8 + $0x48] sm:$0xff] }
  0x3c   : > { %909 = vmatprep.subr.bf16.mxu0 %v908_v10  ;;  %918 = vmatprep.subr.bf16.mxu1 %v908_v10  ;;  %v243_v29 = vld [vmem:[%s1183_s8 + $0xc0] sm:$0xff]  ;;  %v244_v31 = vld [vmem:[%s1183_s8 + $0xc8] sm:$0xff]  ;;  %v229_v32 = vld [vmem:[%s1183_s8 + $0x50] sm:$0xff] }
  0x3d   : > { %v245_v33 = vld [vmem:[%s1183_s8 + $0xd0] sm:$0xff]  ;;  %v230_v34 = vld [vmem:[%s1183_s8 + $0x58] sm:$0xff]  ;;  %v231_v36 = vld [vmem:[%s1183_s8 + $0x60] sm:$0xff] }
  0x3e   : > { %v246_v35 = vld [vmem:[%s1183_s8 + $0xd8] sm:$0xff]  ;;  %v247_v37 = vld [vmem:[%s1183_s8 + $0xe0] sm:$0xff]  ;;  %v232_v38 = vld [vmem:[%s1183_s8 + $0x68] sm:$0xff] }
  0x3f   : > { %911 = vmatpush3.bf16.msra.mxu0 %v908_v10  ;;  %922 = vmatpush3.bf16.msra.mxu1 %v908_v10  ;;  %v248_v39 = vld [vmem:[%s1183_s8 + $0xe8] sm:$0xff]  ;;  %v233_v40 = vld [vmem:[%s1183_s8 + $0x70] sm:$0xff]  ;;  %v234_v42 = vld [vmem:[%s1183_s8 + $0x78] sm:$0xff] }
  0x40   : > { %913 = vmatprep.subr.bf16.mxu0 %v912_v13  ;;  %919 = vmatprep.subr.bf16.mxu1 %v912_v13  ;;  %v249_v41 = vld [vmem:[%s1183_s8 + $0xf0] sm:$0xff]  ;;  %v250_v43 = vld [vmem:[%s1183_s8 + $0xf8] sm:$0xff]  ;;  %v1282_v44 = vld [vmem:[%s1405_s2] ss:$0 sm:$0xff] }
  0x43   : > { %915 = vmatpush3.bf16.msra.mxu0 %v912_v13  ;;  %923 = vmatpush3.bf16.msra.mxu1 %v912_v13 }
  0x46   : > { %853 = vmatmul.mubr.msk.f32.vlgmr.msra.gmra.mrb[0].mxu0 %vm266_vm0, %v220_v14  ;;  %877 = vmatmul.mubr.msk.f32.vlgmr.msra.gmra.mrb[0].mxu1 %vm266_vm0, %v236_v15 }
  0x47   : > { %855 = vmatprep.mubr.msk.f32.mxu0 %vm266_vm0, %v221_v16  ;;  %879 = vmatprep.mubr.msk.f32.mxu1 %vm266_vm0, %v237_v17 }
  0x4a   : > { %856 = vmatmul.mubr.msk.f32.gmra.mrb[2].mxu0 %vm266_vm0, %v222_v18  ;;  %880 = vmatmul.mubr.msk.f32.gmra.mrb[2].mxu1 %vm266_vm0, %v238_v19 }
  0x4b   : > { %858 = vmatprep.mubr.msk.f32.mxu0 %vm266_vm0, %v223_v20  ;;  %882 = vmatprep.mubr.msk.f32.mxu1 %vm266_vm0, %v239_v21 }
  0x4e   : > { %859 = vmatmul.mubr.msk.f32.gmra.mrb[4].mxu0 %vm266_vm0, %v224_v22  ;;  %883 = vmatmul.mubr.msk.f32.gmra.mrb[4].mxu1 %vm266_vm0, %v240_v23 }
  0x4f   : > { %861 = vmatprep.mubr.msk.f32.mxu0 %vm266_vm0, %v225_v24  ;;  %885 = vmatprep.mubr.msk.f32.mxu1 %vm266_vm0, %v241_v25 }
  0x52   : > { %862 = vmatmul.mubr.msk.f32.gmra.mrb[6].mxu0 %vm266_vm0, %v226_v26  ;;  %886 = vmatmul.mubr.msk.f32.gmra.mrb[6].mxu1 %vm266_vm0, %v242_v27 }
  0x53   : > { %864 = vmatprep.mubr.msk.f32.mxu0 %vm266_vm0, %v227_v28  ;;  %888 = vmatprep.mubr.msk.f32.mxu1 %vm266_vm0, %v243_v29 }
  0x56   : > { %865 = vmatmul.mubr.msk.f32.gmra.mrb[8].mxu0 %vm266_vm0, %v228_v30  ;;  %889 = vmatmul.mubr.msk.f32.gmra.mrb[8].mxu1 %vm266_vm0, %v244_v31 }
  0x57   : > { %867 = vmatprep.mubr.msk.f32.mxu0 %vm266_vm0, %v229_v32  ;;  %891 = vmatprep.mubr.msk.f32.mxu1 %vm266_vm0, %v245_v33 }
  0x5a   : > { %868 = vmatmul.mubr.msk.f32.gmra.mrb[10].mxu0 %vm266_vm0, %v230_v34  ;;  %892 = vmatmul.mubr.msk.f32.gmra.mrb[10].mxu1 %vm266_vm0, %v246_v35 }
  0x5b   : > { %870 = vmatprep.mubr.msk.f32.mxu0 %vm266_vm0, %v231_v36  ;;  %894 = vmatprep.mubr.msk.f32.mxu1 %vm266_vm0, %v247_v37 }
  0x5e   : > { %871 = vmatmul.mubr.msk.f32.gmra.mrb[12].mxu0 %vm266_vm0, %v232_v38  ;;  %895 = vmatmul.mubr.msk.f32.gmra.mrb[12].mxu1 %vm266_vm0, %v248_v39 }
  0x5f   : > { %873 = vmatprep.mubr.msk.f32.mxu0 %vm266_vm0, %v233_v40  ;;  %897 = vmatprep.mubr.msk.f32.mxu1 %vm266_vm0, %v249_v41 }
  0x62   : > { %874 = vmatmul.mubr.msk.f32.gmra.mrb[14].mxu0 %vm266_vm0, %v234_v42  ;;  %898 = vmatmul.mubr.msk.f32.gmra.mrb[14].mxu1 %vm266_vm0, %v250_v43 }
 0x119   : > { %v854_v45 = vpop.f32.mrb[0].mxu0  ;;  %v878_v46 = vpop.f32.mrb[0].mxu1 }
 0x11a   : > { %v435_v47 = vadd.f32 %v854_v45, %v1282_v44  ;;  %v515_v48 = vadd.f32 %v878_v46, %v1282_v44  ;;  %v429_v49 = vpop.f32.mrb[1].mxu0  ;;  %v509_v50 = vpop.f32.mrb[1].mxu1 }
 0x11b   : > { %v430_v51 = vadd.f32 %v1282_v44, %v429_v49  ;;  %v510_v52 = vadd.f32 %v1282_v44, %v509_v50 }
 0x11c   : > { %v589_v53 = vmax.f32 %v435_v47, 0.0  ;;  %v605_v54 = vmax.f32 %v515_v48, 0.0 }
 0x11d   : > { %v588_v55 = vmax.f32 %v430_v51, 0.0  ;;  %v604_v56 = vmax.f32 %v510_v52, 0.0  ;;  %v857_v57 = vpop.f32.mrb[2].mxu0  ;;  %v881_v58 = vpop.f32.mrb[2].mxu1 }
 0x11e   : > { %622 = vst.msk [vmem:[%s1289_s10 + $0x8] sm:$0xff] %vm620_vm1, %v589_v53  ;;  %638 = vst.msk [vmem:[%s1289_s10 + $0x88] sm:$0xff] %vm620_vm1, %v605_v54  ;;  %v445_v59 = vadd.f32 %v857_v57, %v1282_v44  ;;  %v525_v60 = vadd.f32 %v881_v58, %v1282_v44  ;;  %v439_v61 = vpop.f32.mrb[3].mxu0  ;;  %v519_v62 = vpop.f32.mrb[3].mxu1 }
 0x11f   : > { %621 = vst.msk [vmem:[%s1289_s10] sm:$0xff] %vm620_vm1, %v588_v55  ;;  %637 = vst.msk [vmem:[%s1289_s10 + $0x80] sm:$0xff] %vm620_vm1, %v604_v56  ;;  %v440_v63 = vadd.f32 %v1282_v44, %v439_v61  ;;  %v520_v0 = vadd.f32 %v1282_v44, %v519_v62 }
 0x120   : > { %v591_v1 = vmax.f32 %v445_v59, 0.0  ;;  %v607_v2 = vmax.f32 %v525_v60, 0.0 }
 0x121   : > { %v590_v3 = vmax.f32 %v440_v63, 0.0  ;;  %v606_v4 = vmax.f32 %v520_v0, 0.0  ;;  %v860_v5 = vpop.f32.mrb[4].mxu0  ;;  %v884_v6 = vpop.f32.mrb[4].mxu1 }
 0x122   : > { %624 = vst.msk [vmem:[%s1289_s10 + $0x18] sm:$0xff] %vm620_vm1, %v591_v1  ;;  %640 = vst.msk [vmem:[%s1289_s10 + $0x98] sm:$0xff] %vm620_vm1, %v607_v2  ;;  %v455_v7 = vadd.f32 %v860_v5, %v1282_v44  ;;  %v535_v8 = vadd.f32 %v884_v6, %v1282_v44  ;;  %v449_v9 = vpop.f32.mrb[5].mxu0  ;;  %v529_v10 = vpop.f32.mrb[5].mxu1 }
 0x123   : > { %623 = vst.msk [vmem:[%s1289_s10 + $0x10] sm:$0xff] %vm620_vm1, %v590_v3  ;;  %639 = vst.msk [vmem:[%s1289_s10 + $0x90] sm:$0xff] %vm620_vm1, %v606_v4  ;;  %v450_v11 = vadd.f32 %v1282_v44, %v449_v9  ;;  %v530_v12 = vadd.f32 %v1282_v44, %v529_v10 }
 0x124   : > { %v593_v13 = vmax.f32 %v455_v7, 0.0  ;;  %v609_v14 = vmax.f32 %v535_v8, 0.0 }
 0x125   : > { %v592_v15 = vmax.f32 %v450_v11, 0.0  ;;  %v608_v16 = vmax.f32 %v530_v12, 0.0  ;;  %v863_v17 = vpop.f32.mrb[6].mxu0  ;;  %v887_v18 = vpop.f32.mrb[6].mxu1 }
 0x126   : > { %626 = vst.msk [vmem:[%s1289_s10 + $0x28] sm:$0xff] %vm620_vm1, %v593_v13  ;;  %642 = vst.msk [vmem:[%s1289_s10 + $0xa8] sm:$0xff] %vm620_vm1, %v609_v14  ;;  %v465_v19 = vadd.f32 %v863_v17, %v1282_v44  ;;  %v545_v20 = vadd.f32 %v887_v18, %v1282_v44  ;;  %v459_v21 = vpop.f32.mrb[7].mxu0  ;;  %v539_v22 = vpop.f32.mrb[7].mxu1 }
 0x127   : > { %625 = vst.msk [vmem:[%s1289_s10 + $0x20] sm:$0xff] %vm620_vm1, %v592_v15  ;;  %641 = vst.msk [vmem:[%s1289_s10 + $0xa0] sm:$0xff] %vm620_vm1, %v608_v16  ;;  %v460_v23 = vadd.f32 %v1282_v44, %v459_v21  ;;  %v540_v24 = vadd.f32 %v1282_v44, %v539_v22 }
 0x128   : > { %v595_v25 = vmax.f32 %v465_v19, 0.0  ;;  %v611_v26 = vmax.f32 %v545_v20, 0.0 }
 0x129   : > { %v594_v27 = vmax.f32 %v460_v23, 0.0  ;;  %v610_v28 = vmax.f32 %v540_v24, 0.0  ;;  %v866_v29 = vpop.f32.mrb[8].mxu0  ;;  %v890_v30 = vpop.f32.mrb[8].mxu1 }
 0x12a   : > { %628 = vst.msk [vmem:[%s1289_s10 + $0x38] sm:$0xff] %vm620_vm1, %v595_v25  ;;  %644 = vst.msk [vmem:[%s1289_s10 + $0xb8] sm:$0xff] %vm620_vm1, %v611_v26  ;;  %v475_v31 = vadd.f32 %v866_v29, %v1282_v44  ;;  %v555_v32 = vadd.f32 %v890_v30, %v1282_v44  ;;  %v469_v33 = vpop.f32.mrb[9].mxu0  ;;  %v549_v34 = vpop.f32.mrb[9].mxu1 }
 0x12b   : > { %627 = vst.msk [vmem:[%s1289_s10 + $0x30] sm:$0xff] %vm620_vm1, %v594_v27  ;;  %643 = vst.msk [vmem:[%s1289_s10 + $0xb0] sm:$0xff] %vm620_vm1, %v610_v28  ;;  %v470_v35 = vadd.f32 %v1282_v44, %v469_v33  ;;  %v550_v36 = vadd.f32 %v1282_v44, %v549_v34 }
 0x12c   : > { %v597_v37 = vmax.f32 %v475_v31, 0.0  ;;  %v613_v38 = vmax.f32 %v555_v32, 0.0 }
 0x12d   : > { %v596_v39 = vmax.f32 %v470_v35, 0.0  ;;  %v612_v40 = vmax.f32 %v550_v36, 0.0  ;;  %v869_v41 = vpop.f32.mrb[10].mxu0  ;;  %v893_v42 = vpop.f32.mrb[10].mxu1 }
 0x12e   : > { %630 = vst.msk [vmem:[%s1289_s10 + $0x48] sm:$0xff] %vm620_vm1, %v597_v37  ;;  %646 = vst.msk [vmem:[%s1289_s10 + $0xc8] sm:$0xff] %vm620_vm1, %v613_v38  ;;  %v485_v43 = vadd.f32 %v869_v41, %v1282_v44  ;;  %v565_v45 = vadd.f32 %v893_v42, %v1282_v44  ;;  %v479_v46 = vpop.f32.mrb[11].mxu0  ;;  %v559_v47 = vpop.f32.mrb[11].mxu1 }
 0x12f   : > { %629 = vst.msk [vmem:[%s1289_s10 + $0x40] sm:$0xff] %vm620_vm1, %v596_v39  ;;  %645 = vst.msk [vmem:[%s1289_s10 + $0xc0] sm:$0xff] %vm620_vm1, %v612_v40  ;;  %v480_v48 = vadd.f32 %v1282_v44, %v479_v46  ;;  %v560_v49 = vadd.f32 %v1282_v44, %v559_v47 }
 0x130   : > { %v599_v50 = vmax.f32 %v485_v43, 0.0  ;;  %v615_v51 = vmax.f32 %v565_v45, 0.0 }
 0x131   : > { %v598_v52 = vmax.f32 %v480_v48, 0.0  ;;  %v614_v53 = vmax.f32 %v560_v49, 0.0  ;;  %v872_v54 = vpop.f32.mrb[12].mxu0  ;;  %v896_v55 = vpop.f32.mrb[12].mxu1 }
 0x132   : > { %632 = vst.msk [vmem:[%s1289_s10 + $0x58] sm:$0xff] %vm620_vm1, %v599_v50  ;;  %648 = vst.msk [vmem:[%s1289_s10 + $0xd8] sm:$0xff] %vm620_vm1, %v615_v51  ;;  %v495_v56 = vadd.f32 %v872_v54, %v1282_v44  ;;  %v575_v57 = vadd.f32 %v896_v55, %v1282_v44  ;;  %v489_v58 = vpop.f32.mrb[13].mxu0  ;;  %v569_v59 = vpop.f32.mrb[13].mxu1 }
 0x133   : > { %631 = vst.msk [vmem:[%s1289_s10 + $0x50] sm:$0xff] %vm620_vm1, %v598_v52  ;;  %647 = vst.msk [vmem:[%s1289_s10 + $0xd0] sm:$0xff] %vm620_vm1, %v614_v53  ;;  %v490_v60 = vadd.f32 %v1282_v44, %v489_v58  ;;  %v570_v61 = vadd.f32 %v1282_v44, %v569_v59 }
 0x134   : > { %v601_v62 = vmax.f32 %v495_v56, 0.0  ;;  %v617_v63 = vmax.f32 %v575_v57, 0.0 }
 0x135   : > { %v600_v0 = vmax.f32 %v490_v60, 0.0  ;;  %v616_v1 = vmax.f32 %v570_v61, 0.0  ;;  %v875_v2 = vpop.f32.mrb[14].mxu0  ;;  %v899_v3 = vpop.f32.mrb[14].mxu1 }
 0x136   : > { %634 = vst.msk [vmem:[%s1289_s10 + $0x68] sm:$0xff] %vm620_vm1, %v601_v62  ;;  %650 = vst.msk [vmem:[%s1289_s10 + $0xe8] sm:$0xff] %vm620_vm1, %v617_v63  ;;  %v505_v4 = vadd.f32 %v875_v2, %v1282_v44  ;;  %v585_v5 = vadd.f32 %v899_v3, %v1282_v44  ;;  %v499_v6 = vpop.f32.mrb[15].mxu0  ;;  %v579_v7 = vpop.f32.mrb[15].mxu1 }
 0x137   : > { %633 = vst.msk [vmem:[%s1289_s10 + $0x60] sm:$0xff] %vm620_vm1, %v600_v0  ;;  %649 = vst.msk [vmem:[%s1289_s10 + $0xe0] sm:$0xff] %vm620_vm1, %v616_v1  ;;  %v500_v8 = vadd.f32 %v1282_v44, %v499_v6  ;;  %v580_v9 = vadd.f32 %v1282_v44, %v579_v7 }
 0x138   : > { %v603_v10 = vmax.f32 %v505_v4, 0.0  ;;  %v619_v11 = vmax.f32 %v585_v5, 0.0 }
 0x139   : > { %v602_v12 = vmax.f32 %v500_v8, 0.0  ;;  %v618_v13 = vmax.f32 %v580_v9, 0.0 }
 0x13a   : > { %636 = vst.msk [vmem:[%s1289_s10 + $0x78] sm:$0xff] %vm620_vm1, %v603_v10  ;;  %652 = vst.msk [vmem:[%s1289_s10 + $0xf8] sm:$0xff] %vm620_vm1, %v619_v11 }
 0x13b   : > { %635 = vst.msk [vmem:[%s1289_s10 + $0x70] sm:$0xff] %vm620_vm1, %v602_v12  ;;  %651 = vst.msk [vmem:[%s1289_s10 + $0xf0] sm:$0xff] %vm620_vm1, %v618_v13 }
 0x13c PF: > { %s16_s17 = sadd.s32 1, %s1061_s17   ;;  %s1410_s12 = smov %s1045_s13 }
 0x13d   : > { %p13_p9 = scmp.ge.s32.totalorder %s16_s17, 4   ;;  %s1411_s13 = smov %s1049_s14 }
 0x13e   : > { %s1412_s14 = smov %s1135_s24  ;;  %s1413_s15 = smov %s1057_s16 }
 0x13f   : > { %s1414_s16 = smov %s1416_s19  ;;  %15 = sbr.rel (!%p13_p9) target bundleno = 4 (0x4), region = 72 }
 0x146   :  { %683 = vsyncpa [#allocation3], 1 }
 0x147   :  { %685 = vsyncpa [#allocation3 + $0x1], 1 }

// kernel: oca2_forward.5
= control target key start
LH: loop header
LB: loop body
LE: loop exit
PB: predicated region body
PF: predicated region fallthrough
CT: control target
= control target key end

     0   :  { %10 = vsyncpa [#allocation3], 0  ;;  %s1680_s0 = inlined_call_operand.vmem [shape: f32[2,256,16], index: 0, kind: input, shape index: {}]   ;;  %s1681_s1 = inlined_call_operand.vmem [shape: f32[2,1,16], index: 1, kind: input, shape index: {}]   ;;  %s1682_s2 = inlined_call_operand.vmem [shape: f32[16,64], index: 2, kind: input, shape index: {}]   ;;  %s1683_s3 = inlined_call_operand.vmem [shape: f32[1,64], index: 3, kind: input, shape index: {}]   ;;  %s1684_s4 = inlined_call_operand.vmem [shape: f32[2,256,64], index: 4, kind: input, shape index: {}]   ;;  %s1685_s5 = inlined_call_operand.hbm [shape: f32[2,256,64], index: 5, kind: output, shape index: {}]  }
   0x1   :  { %12 = vsyncpa [#allocation3 + $0x1], 0  ;;  %s1303_s18 = smov 0   ;;  %s1305_s19 = smov 0  }
   0x2   :  { %s1307_s20 = smov 0   ;;  %s1309_s21 = smov 0  }
   0x3   :  { %s1311_s22 = smov 0   ;;  %s1313_s23 = smov 0  }
   0x4 LB: > { %s989_s24 = sadd.s32 4294967295, %s1268_s23   ;;  %s990_s25 = sadd.s32 4294967294, %s1268_s23   ;;  %s1268_s23 = sphi %s1313_s23, %s18_s23   ;;  %s1264_s22 = sphi %s1311_s22, %s1692_s22   ;;  %s1260_s21 = sphi %s1309_s21, %s1691_s21   ;;  %s1256_s20 = sphi %s1307_s20, %s1690_s20   ;;  %s1252_s19 = sphi %s1305_s19, %s1689_s19   ;;  %s1248_s18 = sphi %s1303_s18, %s1688_s18  }
   0x5   : > { %s30_s26 = sadd.s32 1, %s1264_s22  ;;  %s163_s27 = sadd.s32 1, %s1256_s20 }
   0x6   : > { %p32_p0 = scmp.ge.s32.totalorder %s30_s26, 2  ;;  %p173_p1 = scmp.ne.s32.totalorder %s1256_s20, %s1252_s19 }
   0x7   : > { %p174_p2 = scmp.eq.s32.totalorder %s989_s24, 1  ;;  %p179_p3 = scmp.ne.s32.totalorder %s1252_s19, %s1248_s18 }
   0x8   : > { %s1694_s26 = smov (%p32_p0, %s30_s26), 0  ;;  %p180_p5 = scmp.eq.s32.totalorder %s990_s25, 1 }
   0x9   : > { %p1343_p4 = por %p174_p2, %p173_p1  ;;  %s158_s29 = ssub.s32 %s1264_s22, %s1694_s26 }
   0xa   : > { %p993_p6 = scmp.ge.s32.totalorder %s1268_s23, 1  ;;  %p161_p7 = scmp.eq.s32.totalorder %s158_s29, 0 }
   0xb   : > { %p1350_p8 = por %p180_p5, %p179_p3  ;;  %p236_p9 = scmp.lt.s32.totalorder %s1268_s23, 3 }
   0xc   : > { %s1356_s6 = scalar_select %p161_p7, %s1256_s20, %s163_s27  }
   0xd   : > { %p237_p10 = pnand %p993_p6, %p236_p9 }
   0xe   : > { %v407_v0 = vld [vmem:[%s1682_s2] sm:$0xff] (!%p237_p10)  ;;  %v408_v1 = vld [vmem:[%s1682_s2 + $0x8] sm:$0xff] (!%p237_p10)  ;;  %p281_p11 = scmp.lt.s32.totalorder (!%p237_p10), %s1260_s21, 1  ;;  %vm416_vm0 = vcmask (!%p237_p10), 130048   ;;  %s277_s7 = sand.u32 (!%p237_p10), 1, %s1252_s19   ;;  %vm834_vm1 = vcmask (!%p237_p10), 523264  }
   0xf   : > { %240 = sbr.rel (%p237_p10) target bundleno = 295 (0x127), region = 40  ;;  %v1127_v2 = vpack.c.bf16 (!%p237_p10), %v408_v1, %v407_v0  ;;  %s994_s10 = sshll.u32 (!%p237_p10), %s277_s7, 8 }
  0x10   : > { %s1634_s16 = scalar_lea.sflag (!%p237_p10), [#allocation3], %s277_s7 }
  0x11   : > { %1128 = vmatprep.subr.bf16.mxu0 (!%p237_p10), %v1127_v2  ;;  %1131 = vmatprep.subr.bf16.mxu1 (!%p237_p10), %v1127_v2 }
  0x12   : > { %1130 = vmatpush3.bf16.msra.mxu0 (!%p237_p10), %v1127_v2  ;;  %1132 = vmatpush3.bf16.msra.mxu1 (!%p237_p10), %v1127_v2 }
  0x16   : > { %s1366_s11 = scalar_select %p281_p11, %s1260_s21, 1 }
  0x18   : > { %s1038_s12 = sshll.u32 %s1366_s11, 8  ;;  %s292_s15 = scalar_lea.vmem %s1681_s1, %s1366_s11 }
  0x19   : > { %s1378_s24 = scalar_lea.vmem %s1680_s0, %s1038_s12  ;;  %v1380_v3 = vld [vmem:[%s292_s15] ss:$0 sm:$0xff]  ;;  %s1483_s29 = scalar_lea.vmem %s1684_s4, %s1038_s12 }
  0x1a   : > { %v304_v4 = vld [vmem:[%s1378_s24] sm:$0xff]  ;;  %v305_v6 = vld [vmem:[%s1378_s24 + $0x8] sm:$0xff]  ;;  %v306_v11 = vld [vmem:[%s1378_s24 + $0x10] sm:$0xff]  ;;  %s1509_s11 = scalar_lea.vmem [#allocation2], %s994_s10  ;;  %s1040_s12 = sshll.u32 %s1260_s21, 12 }
  0x1b   : > { %v320_v5 = vld [vmem:[%s1378_s24 + $0x80] sm:$0xff]  ;;  %v343_v7 = vmul.f32 %v1380_v3, %v304_v4  ;;  %v344_v9 = vmul.f32 %v1380_v3, %v305_v6  ;;  %v321_v10 = vld [vmem:[%s1378_s24 + $0x88] sm:$0xff]  ;;  %v322_v12 = vld [vmem:[%s1378_s24 + $0x90] sm:$0xff]  ;;  %v345_v14 = vmul.f32 %v1380_v3, %v306_v11  ;;  %s883_s13 = sshll.u32 %s1509_s11, 4  ;;  %s1620_s15 = scalar_lea.hbm %s1685_s5, %s1040_s12  ;;  %s1622_s13 = int_to_ptr.vmem [resolvable:$true] %s883_s13 }
  0x1c   : > { %v359_v8 = vmul.f32 %v1380_v3, %v320_v5  ;;  %v360_v13 = vmul.f32 %v1380_v3, %v321_v10  ;;  %v361_v15 = vmul.f32 %v1380_v3, %v322_v12  ;;  %v307_v16 = vld [vmem:[%s1378_s24 + $0x18] sm:$0xff]  ;;  %v308_v18 = vld [vmem:[%s1378_s24 + $0x20] sm:$0xff]  ;;  %v309_v24 = vld [vmem:[%s1378_s24 + $0x28] sm:$0xff]  ;;  %s1190_s17 = scalar_lea.vmem %s1622_s13, 4096 }
  0x1d   : > { %v323_v17 = vld [vmem:[%s1378_s24 + $0x98] sm:$0xff]  ;;  %v375_v19 = vmax.f32 %v343_v7, 0.0  ;;  %v376_v21 = vmax.f32 %v344_v9, 0.0  ;;  %v346_v22 = vmul.f32 %v1380_v3, %v307_v16  ;;  %v324_v23 = vld [vmem:[%s1378_s24 + $0xa0] sm:$0xff]  ;;  %v325_v25 = vld [vmem:[%s1378_s24 + $0xa8] sm:$0xff]  ;;  %v377_v27 = vmax.f32 %v345_v14, 0.0  ;;  %p1191_p12 = scmp.ne.s32.totalorder %s1622_s13, %s1190_s17 }
  0x1e   : > { %v391_v20 = vmax.f32 %v359_v8, 0.0  ;;  %v392_v26 = vmax.f32 %v360_v13, 0.0  ;;  %v393_v28 = vmax.f32 %v361_v15, 0.0  ;;  %v362_v29 = vmul.f32 %v1380_v3, %v323_v17  ;;  %v310_v30 = vld [vmem:[%s1378_s24 + $0x30] sm:$0xff]  ;;  %v311_v42 = vld [vmem:[%s1378_s24 + $0x38] sm:$0xff]  ;;  %v312_v44 = vld [vmem:[%s1378_s24 + $0x40] sm:$0xff] }
  0x1f   : > { %v326_v31 = vld [vmem:[%s1378_s24 + $0xb0] sm:$0xff]  ;;  %1079 = vmatprep.mubr.msk.f32.mxu0 %vm416_vm0, %v375_v19  ;;  %v347_v32 = vmul.f32 %v1380_v3, %v308_v18  ;;  %v363_v33 = vmul.f32 %v1380_v3, %v324_v23  ;;  %v378_v34 = vmax.f32 %v346_v22, 0.0  ;;  %v348_v36 = vmul.f32 %v1380_v3, %v309_v24  ;;  %v327_v43 = vld [vmem:[%s1378_s24 + $0xb8] sm:$0xff]  ;;  %v328_v45 = vld [vmem:[%s1378_s24 + $0xc0] sm:$0xff]  ;;  %p1192_p13 = pnand %p1191_p12, %p1343_p4 }
  0x20   : > { %1103 = vmatprep.mubr.msk.f32.mxu1 %vm416_vm0, %v391_v20  ;;  %1080 = vmatmul.mubr.msk.f32.vlgmr.msra.gmra.mrb[0].mxu0 %vm416_vm0, %v376_v21  ;;  %v394_v35 = vmax.f32 %v362_v29, 0.0  ;;  %v364_v37 = vmul.f32 %v1380_v3, %v325_v25  ;;  %v349_v40 = vmul.f32 %v1380_v3, %v310_v30  ;;  %v365_v41 = vmul.f32 %v1380_v3, %v326_v31  ;;  %v313_v54 = vld [vmem:[%s1378_s24 + $0x48] sm:$0xff]  ;;  %v314_v56 = vld [vmem:[%s1378_s24 + $0x50] sm:$0xff]  ;;  %v315_v2 = vld [vmem:[%s1378_s24 + $0x58] sm:$0xff] }
  0x21   : > { %1104 = vmatmul.mubr.msk.f32.vlgmr.msra.gmra.mrb[0].mxu1 %vm416_vm0, %v392_v26  ;;  %1082 = vmatprep.mubr.msk.f32.mxu0 %vm416_vm0, %v377_v27  ;;  %v379_v38 = vmax.f32 %v347_v32, 0.0  ;;  %v395_v39 = vmax.f32 %v363_v33, 0.0  ;;  %v380_v46 = vmax.f32 %v348_v36, 0.0  ;;  %v350_v48 = vmul.f32 %v1380_v3, %v311_v42  ;;  %v329_v55 = vld [vmem:[%s1378_s24 + $0xc8] sm:$0xff]  ;;  %v330_v57 = vld [vmem:[%s1378_s24 + $0xd0] sm:$0xff]  ;;  %v331_v4 = vld [vmem:[%s1378_s24 + $0xd8] sm:$0xff]  ;;  %p1193_p0 = pneg %p1192_p13 }
  0x22   : > { %1106 = vmatprep.mubr.msk.f32.mxu1 %vm416_vm0, %v393_v28  ;;  %v396_v47 = vmax.f32 %v364_v37, 0.0  ;;  %v366_v49 = vmul.f32 %v1380_v3, %v327_v43  ;;  %v381_v50 = vmax.f32 %v349_v40, 0.0  ;;  %v397_v51 = vmax.f32 %v365_v41, 0.0  ;;  %v316_v5 = vld [vmem:[%s1378_s24 + $0x60] sm:$0xff]  ;;  %v317_v15 = vld [vmem:[%s1378_s24 + $0x68] sm:$0xff]  ;;  %v318_v17 = vld [vmem:[%s1378_s24 + $0x70] sm:$0xff] }
  0x23   : > { %v351_v52 = vmul.f32 %v1380_v3, %v312_v44  ;;  %v367_v53 = vmul.f32 %v1380_v3, %v328_v45  ;;  %v382_v58 = vmax.f32 %v350_v48, 0.0  ;;  %v352_v60 = vmul.f32 %v1380_v3, %v313_v54  ;;  %v332_v6 = vld [vmem:[%s1378_s24 + $0xe0] sm:$0xff]  ;;  %v333_v16 = vld [vmem:[%s1378_s24 + $0xe8] sm:$0xff]  ;;  %v334_v18 = vld [vmem:[%s1378_s24 + $0xf0] sm:$0xff] }
  0x24   : > { %1083 = vmatmul.mubr.msk.f32.gmra.mrb[2].mxu0 %vm416_vm0, %v378_v34  ;;  %v398_v59 = vmax.f32 %v366_v49, 0.0  ;;  %v368_v61 = vmul.f32 %v1380_v3, %v329_v55  ;;  %v353_v0 = vmul.f32 %v1380_v3, %v314_v56  ;;  %v369_v1 = vmul.f32 %v1380_v3, %v330_v57  ;;  %v319_v27 = vld [vmem:[%s1378_s24 + $0x78] sm:$0xff]  ;;  %v755_v40 = vld [vmem:[%s1483_s29 + $0x88] sm:$0xff]  ;;  %v738_v44 = vld [vmem:[%s1483_s29] sm:$0xff] }
  0x25   : > { %1107 = vmatmul.mubr.msk.f32.gmra.mrb[2].mxu1 %vm416_vm0, %v394_v35  ;;  %1085 = vmatprep.mubr.msk.f32.mxu0 %vm416_vm0, %v379_v38  ;;  %v383_v62 = vmax.f32 %v351_v52, 0.0  ;;  %v399_v63 = vmax.f32 %v367_v53, 0.0  ;;  %v384_v7 = vmax.f32 %v352_v60, 0.0  ;;  %v354_v9 = vmul.f32 %v1380_v3, %v315_v2  ;;  %v335_v28 = vld [vmem:[%s1378_s24 + $0xf8] sm:$0xff]  ;;  %v739_v38 = vld [vmem:[%s1483_s29 + $0x8] sm:$0xff]  ;;  %s1270_s24 = smov [#allocation2]  }
  0x26   : > { %1109 = vmatprep.mubr.msk.f32.mxu1 %vm416_vm0, %v395_v39  ;;  %v400_v8 = vmax.f32 %v368_v61, 0.0  ;;  %v370_v10 = vmul.f32 %v1380_v3, %v331_v4  ;;  %v385_v11 = vmax.f32 %v353_v0, 0.0  ;;  %v401_v12 = vmax.f32 %v369_v1, 0.0  ;;  %v741_v54 = vld [vmem:[%s1483_s29 + $0x18] sm:$0xff]  ;;  %v756_v0 = vld [vmem:[%s1483_s29 + $0x90] sm:$0xff]  ;;  %s1194_s25 = sshll.u32 %s1270_s24, 4  ;;  %s1195_s25 = int_to_ptr.vmem [resolvable:$false] %s1194_s25 }
  0x27   : > { %v355_v13 = vmul.f32 %v1380_v3, %v316_v5  ;;  %v371_v14 = vmul.f32 %v1380_v3, %v332_v6  ;;  %v386_v19 = vmax.f32 %v354_v9, 0.0  ;;  %v356_v21 = vmul.f32 %v1380_v3, %v317_v15  ;;  %v757_v56 = vld [vmem:[%s1483_s29 + $0x98] sm:$0xff]  ;;  %s1196_s27 = scalar_lea.vmem %s1195_s25, 8192  ;;  %p1197_p1 = scmp.lt.s32.totalorder %s1622_s13, %s1195_s25 }
  0x28   : > { %1086 = vmatmul.mubr.msk.f32.gmra.mrb[4].mxu0 %vm416_vm0, %v380_v46  ;;  %v402_v20 = vmax.f32 %v370_v10, 0.0  ;;  %v372_v22 = vmul.f32 %v1380_v3, %v333_v16  ;;  %v357_v25 = vmul.f32 %v1380_v3, %v318_v17  ;;  %v373_v26 = vmul.f32 %v1380_v3, %v334_v18  ;;  %v754_v46 = vld [vmem:[%s1483_s29 + $0x80] sm:$0xff]  ;;  %p1198_p2 = scmp.lt.s32.totalorder %s1196_s27, %s1190_s17 }
  0x29   : > { %1110 = vmatmul.mubr.msk.f32.gmra.mrb[4].mxu1 %vm416_vm0, %v396_v47  ;;  %1088 = vmatprep.mubr.msk.f32.mxu0 %vm416_vm0, %v381_v50  ;;  %v387_v23 = vmax.f32 %v355_v13, 0.0  ;;  %v403_v24 = vmax.f32 %v371_v14, 0.0  ;;  %v388_v29 = vmax.f32 %v356_v21, 0.0  ;;  %v358_v31 = vmul.f32 %v1380_v3, %v319_v27  ;;  %v759_v13 = vld [vmem:[%s1483_s29 + $0xa8] sm:$0xff]  ;;  %v758_v21 = vld [vmem:[%s1483_s29 + $0xa0] sm:$0xff] }
  0x2a   : > { %1112 = vmatprep.mubr.msk.f32.mxu1 %vm416_vm0, %v397_v51  ;;  %v404_v30 = vmax.f32 %v372_v22, 0.0  ;;  %v374_v32 = vmul.f32 %v1380_v3, %v335_v28  ;;  %v389_v33 = vmax.f32 %v357_v25, 0.0  ;;  %v405_v34 = vmax.f32 %v373_v26, 0.0  ;;  %v1489_v3 = vld [vmem:[%s1683_s3] ss:$0 sm:$0xff]  ;;  %p1199_p3 = por %p1198_p2, %p1197_p1 }
  0x2b   : > { %v390_v35 = vmax.f32 %v358_v31, 0.0  ;;  %v745_v31 = vld [vmem:[%s1483_s29 + $0x38] sm:$0xff] }
  0x2c   : > { %1089 = vmatmul.mubr.msk.f32.gmra.mrb[6].mxu0 %vm416_vm0, %v382_v58  ;;  %v406_v36 = vmax.f32 %v374_v32, 0.0  ;;  %p1200_p5 = pnand %p1199_p3, %p1193_p0 }
  0x2d   : > { %1113 = vmatmul.mubr.msk.f32.gmra.mrb[6].mxu1 %vm416_vm0, %v398_v59  ;;  %1091 = vmatprep.mubr.msk.f32.mxu0 %vm416_vm0, %v383_v62  ;;  %v740_v62 = vld [vmem:[%s1483_s29 + $0x10] sm:$0xff] }
  0x2e   : > { %1115 = vmatprep.mubr.msk.f32.mxu1 %vm416_vm0, %v399_v63 }
  0x30   : > { %1092 = vmatmul.mubr.msk.f32.gmra.mrb[8].mxu0 %vm416_vm0, %v384_v7 }
  0x31   : > { %1116 = vmatmul.mubr.msk.f32.gmra.mrb[8].mxu1 %vm416_vm0, %v400_v8  ;;  %1094 = vmatprep.mubr.msk.f32.mxu0 %vm416_vm0, %v385_v11  ;;  %v743_v11 = vld [vmem:[%s1483_s29 + $0x28] sm:$0xff] }
  0x32   : > { %1118 = vmatprep.mubr.msk.f32.mxu1 %vm416_vm0, %v401_v12 }
  0x34   : > { %1095 = vmatmul.mubr.msk.f32.gmra.mrb[10].mxu0 %vm416_vm0, %v386_v19  ;;  %v742_v19 = vld [vmem:[%s1483_s29 + $0x20] sm:$0xff] }
  0x35   : > { %1119 = vmatmul.mubr.msk.f32.gmra.mrb[10].mxu1 %vm416_vm0, %v402_v20  ;;  %1097 = vmatprep.mubr.msk.f32.mxu0 %vm416_vm0, %v387_v23 }
  0x36   : > { %1121 = vmatprep.mubr.msk.f32.mxu1 %vm416_vm0, %v403_v24 }
  0x38   : > { %1098 = vmatmul.mubr.msk.f32.gmra.mrb[12].mxu0 %vm416_vm0, %v388_v29 }
  0x39   : > { %1122 = vmatmul.mubr.msk.f32.gmra.mrb[12].mxu1 %vm416_vm0, %v404_v30  ;;  %1100 = vmatprep.mubr.msk.f32.mxu0 %vm416_vm0, %v389_v33  ;;  %v761_v33 = vld [vmem:[%s1483_s29 + $0xb8] sm:$0xff] }
  0x3a   : > { %1124 = vmatprep.mubr.msk.f32.mxu1 %vm416_vm0, %v405_v34 }
  0x3c   : > { %1101 = vmatmul.mubr.msk.f32.gmra.mrb[14].mxu0 %vm416_vm0, %v390_v35 }
  0x3d   : > { %1125 = vmatmul.mubr.msk.f32.gmra.mrb[14].mxu1 %vm416_vm0, %v406_v36 }
  0xf3   : > { %v1081_v37 = vpop.f32.mrb[0].mxu0 }
  0xf4   : > { %v1105_v39 = vpop.f32.mrb[0].mxu1  ;;  %v585_v41 = vadd.f32 %v1081_v37, %v1489_v3  ;;  %v579_v43 = vpop.f32.mrb[1].mxu0 }
  0xf5   : > { %v665_v42 = vadd.f32 %v1105_v39, %v1489_v3  ;;  %v659_v45 = vpop.f32.mrb[1].mxu1  ;;  %v580_v47 = vadd.f32 %v1489_v3, %v579_v43  ;;  %v744_v39 = vld [vmem:[%s1483_s29 + $0x30] sm:$0xff] }
  0xf6   : > { %v660_v48 = vadd.f32 %v1489_v3, %v659_v45  ;;  %v771_v49 = vadd.f32 %v739_v38, %v585_v41  ;;  %v760_v41 = vld [vmem:[%s1483_s29 + $0xb0] sm:$0xff] }
  0xf7   : > { %v787_v50 = vadd.f32 %v755_v40, %v665_v42  ;;  %v770_v51 = vadd.f32 %v738_v44, %v580_v47  ;;  %v1084_v53 = vpop.f32.mrb[2].mxu0 }
  0xf8   : > { %v786_v52 = vadd.f32 %v754_v46, %v660_v48  ;;  %v1108_v55 = vpop.f32.mrb[2].mxu1  ;;  %v803_v57 = vmax.f32 %v771_v49, 0.0  ;;  %v595_v59 = vadd.f32 %v1084_v53, %v1489_v3  ;;  %v589_v61 = vpop.f32.mrb[3].mxu0  ;;  %v763_v53 = vld [vmem:[%s1483_s29 + $0xc8] sm:$0xff] }
  0xf9   : > { %v819_v58 = vmax.f32 %v787_v50, 0.0  ;;  %v675_v60 = vadd.f32 %v1108_v55, %v1489_v3  ;;  %v669_v63 = vpop.f32.mrb[3].mxu1  ;;  %v802_v1 = vmax.f32 %v770_v51, 0.0  ;;  %v590_v4 = vadd.f32 %v1489_v3, %v589_v61  ;;  %v747_v51 = vld [vmem:[%s1483_s29 + $0x48] sm:$0xff]  ;;  %v762_v61 = vld [vmem:[%s1483_s29 + $0xc0] sm:$0xff] }
  0xfa   : > { %v818_v2 = vmax.f32 %v786_v52, 0.0  ;;  %v670_v5 = vadd.f32 %v1489_v3, %v669_v63  ;;  %836 = vst.msk [vmem:[%s1509_s11 + $0x8] sm:$0xff] %vm834_vm1, %v803_v57  ;;  %v773_v6 = vadd.f32 %v741_v54, %v595_v59  ;;  %v746_v59 = vld [vmem:[%s1483_s29 + $0x40] sm:$0xff] }
  0xfb   : > { %852 = vst.msk [vmem:[%s1509_s11 + $0x88] sm:$0xff] %vm834_vm1, %v819_v58  ;;  %v789_v7 = vadd.f32 %v757_v56, %v675_v60  ;;  %835 = vst.msk [vmem:[%s1509_s11] sm:$0xff] %vm834_vm1, %v802_v1  ;;  %v772_v8 = vadd.f32 %v740_v62, %v590_v4  ;;  %v1087_v10 = vpop.f32.mrb[4].mxu0 }
  0xfc   : > { %851 = vst.msk [vmem:[%s1509_s11 + $0x80] sm:$0xff] %vm834_vm1, %v818_v2  ;;  %v788_v9 = vadd.f32 %v756_v0, %v670_v5  ;;  %v1111_v12 = vpop.f32.mrb[4].mxu1  ;;  %v805_v14 = vmax.f32 %v773_v6, 0.0  ;;  %v605_v16 = vadd.f32 %v1087_v10, %v1489_v3  ;;  %v599_v18 = vpop.f32.mrb[5].mxu0  ;;  %v765_v10 = vld [vmem:[%s1483_s29 + $0xd8] sm:$0xff] }
  0xfd   : > { %v821_v15 = vmax.f32 %v789_v7, 0.0  ;;  %v685_v17 = vadd.f32 %v1111_v12, %v1489_v3  ;;  %v679_v20 = vpop.f32.mrb[5].mxu1  ;;  %v804_v22 = vmax.f32 %v772_v8, 0.0  ;;  %v600_v24 = vadd.f32 %v1489_v3, %v599_v18  ;;  %v749_v8 = vld [vmem:[%s1483_s29 + $0x58] sm:$0xff]  ;;  %v764_v18 = vld [vmem:[%s1483_s29 + $0xd0] sm:$0xff] }
  0xfe   : > { %v820_v23 = vmax.f32 %v788_v9, 0.0  ;;  %v680_v25 = vadd.f32 %v1489_v3, %v679_v20  ;;  %838 = vst.msk [vmem:[%s1509_s11 + $0x18] sm:$0xff] %vm834_vm1, %v805_v14  ;;  %v775_v26 = vadd.f32 %v743_v11, %v605_v16  ;;  %v748_v16 = vld [vmem:[%s1483_s29 + $0x50] sm:$0xff] }
  0xff   : > { %854 = vst.msk [vmem:[%s1509_s11 + $0x98] sm:$0xff] %vm834_vm1, %v821_v15  ;;  %v791_v27 = vadd.f32 %v759_v13, %v685_v17  ;;  %837 = vst.msk [vmem:[%s1509_s11 + $0x10] sm:$0xff] %vm834_vm1, %v804_v22  ;;  %v774_v28 = vadd.f32 %v742_v19, %v600_v24  ;;  %v1090_v30 = vpop.f32.mrb[6].mxu0 }
 0x100   : > { %853 = vst.msk [vmem:[%s1509_s11 + $0x90] sm:$0xff] %vm834_vm1, %v820_v23  ;;  %v790_v29 = vadd.f32 %v758_v21, %v680_v25  ;;  %v1114_v32 = vpop.f32.mrb[6].mxu1  ;;  %v807_v34 = vmax.f32 %v775_v26, 0.0  ;;  %v615_v36 = vadd.f32 %v1090_v30, %v1489_v3  ;;  %v609_v38 = vpop.f32.mrb[7].mxu0  ;;  %v767_v30 = vld [vmem:[%s1483_s29 + $0xe8] sm:$0xff] }
 0x101   : > { %v823_v35 = vmax.f32 %v791_v27, 0.0  ;;  %v695_v37 = vadd.f32 %v1114_v32, %v1489_v3  ;;  %v689_v40 = vpop.f32.mrb[7].mxu1  ;;  %v806_v42 = vmax.f32 %v774_v28, 0.0  ;;  %v610_v44 = vadd.f32 %v1489_v3, %v609_v38  ;;  %v751_v28 = vld [vmem:[%s1483_s29 + $0x68] sm:$0xff]  ;;  %v766_v38 = vld [vmem:[%s1483_s29 + $0xe0] sm:$0xff] }
 0x102   : > { %v822_v43 = vmax.f32 %v790_v29, 0.0  ;;  %v690_v45 = vadd.f32 %v1489_v3, %v689_v40  ;;  %840 = vst.msk [vmem:[%s1509_s11 + $0x28] sm:$0xff] %vm834_vm1, %v807_v34  ;;  %v777_v46 = vadd.f32 %v745_v31, %v615_v36  ;;  %v750_v36 = vld [vmem:[%s1483_s29 + $0x60] sm:$0xff] }
 0x103   : > { %856 = vst.msk [vmem:[%s1509_s11 + $0xa8] sm:$0xff] %vm834_vm1, %v823_v35  ;;  %v793_v47 = vadd.f32 %v761_v33, %v695_v37  ;;  %839 = vst.msk [vmem:[%s1509_s11 + $0x20] sm:$0xff] %vm834_vm1, %v806_v42  ;;  %v776_v48 = vadd.f32 %v744_v39, %v610_v44  ;;  %v1093_v50 = vpop.f32.mrb[8].mxu0 }
 0x104   : > { %855 = vst.msk [vmem:[%s1509_s11 + $0xa0] sm:$0xff] %vm834_vm1, %v822_v43  ;;  %v792_v49 = vadd.f32 %v760_v41, %v690_v45  ;;  %v1117_v52 = vpop.f32.mrb[8].mxu1  ;;  %v809_v54 = vmax.f32 %v777_v46, 0.0  ;;  %v625_v56 = vadd.f32 %v1093_v50, %v1489_v3  ;;  %v619_v58 = vpop.f32.mrb[9].mxu0  ;;  %v769_v50 = vld [vmem:[%s1483_s29 + $0xf8] sm:$0xff] }
 0x105   : > { %v825_v55 = vmax.f32 %v793_v47, 0.0  ;;  %v705_v57 = vadd.f32 %v1117_v52, %v1489_v3  ;;  %v699_v60 = vpop.f32.mrb[9].mxu1  ;;  %v808_v62 = vmax.f32 %v776_v48, 0.0  ;;  %v620_v0 = vadd.f32 %v1489_v3, %v619_v58  ;;  %v753_v48 = vld [vmem:[%s1483_s29 + $0x78] sm:$0xff]  ;;  %v768_v58 = vld [vmem:[%s1483_s29 + $0xf0] sm:$0xff] }
 0x106   : > { %v824_v63 = vmax.f32 %v792_v49, 0.0  ;;  %v700_v1 = vadd.f32 %v1489_v3, %v699_v60  ;;  %842 = vst.msk [vmem:[%s1509_s11 + $0x38] sm:$0xff] %vm834_vm1, %v809_v54  ;;  %v779_v2 = vadd.f32 %v747_v51, %v625_v56  ;;  %v752_v56 = vld [vmem:[%s1483_s29 + $0x70] sm:$0xff] }
 0x107   : > { %858 = vst.msk [vmem:[%s1509_s11 + $0xb8] sm:$0xff] %vm834_vm1, %v825_v55  ;;  %v795_v4 = vadd.f32 %v763_v53, %v705_v57  ;;  %841 = vst.msk [vmem:[%s1509_s11 + $0x30] sm:$0xff] %vm834_vm1, %v808_v62  ;;  %v778_v5 = vadd.f32 %v746_v59, %v620_v0  ;;  %v1096_v7 = vpop.f32.mrb[10].mxu0 }
 0x108   : > { %857 = vst.msk [vmem:[%s1509_s11 + $0xb0] sm:$0xff] %vm834_vm1, %v824_v63  ;;  %v794_v6 = vadd.f32 %v762_v61, %v700_v1  ;;  %v1120_v9 = vpop.f32.mrb[10].mxu1  ;;  %v811_v11 = vmax.f32 %v779_v2, 0.0  ;;  %v635_v13 = vadd.f32 %v1096_v7, %v1489_v3  ;;  %v629_v15 = vpop.f32.mrb[11].mxu0 }
 0x109   : > { %v827_v12 = vmax.f32 %v795_v4, 0.0  ;;  %v715_v14 = vadd.f32 %v1120_v9, %v1489_v3  ;;  %v709_v17 = vpop.f32.mrb[11].mxu1  ;;  %v810_v19 = vmax.f32 %v778_v5, 0.0  ;;  %v630_v21 = vadd.f32 %v1489_v3, %v629_v15 }
 0x10a   : > { %v826_v20 = vmax.f32 %v794_v6, 0.0  ;;  %v710_v22 = vadd.f32 %v1489_v3, %v709_v17  ;;  %844 = vst.msk [vmem:[%s1509_s11 + $0x48] sm:$0xff] %vm834_vm1, %v811_v11  ;;  %v781_v23 = vadd.f32 %v749_v8, %v635_v13 }
 0x10b   : > { %860 = vst.msk [vmem:[%s1509_s11 + $0xc8] sm:$0xff] %vm834_vm1, %v827_v12  ;;  %v797_v24 = vadd.f32 %v765_v10, %v715_v14  ;;  %843 = vst.msk [vmem:[%s1509_s11 + $0x40] sm:$0xff] %vm834_vm1, %v810_v19  ;;  %v780_v25 = vadd.f32 %v748_v16, %v630_v21  ;;  %v1099_v27 = vpop.f32.mrb[12].mxu0 }
 0x10c   : > { %859 = vst.msk [vmem:[%s1509_s11 + $0xc0] sm:$0xff] %vm834_vm1, %v826_v20  ;;  %v796_v26 = vadd.f32 %v764_v18, %v710_v22  ;;  %v1123_v29 = vpop.f32.mrb[12].mxu1  ;;  %v813_v31 = vmax.f32 %v781_v23, 0.0  ;;  %v645_v33 = vadd.f32 %v1099_v27, %v1489_v3  ;;  %v639_v35 = vpop.f32.mrb[13].mxu0 }
 0x10d   : > { %v829_v32 = vmax.f32 %v797_v24, 0.0  ;;  %v725_v34 = vadd.f32 %v1123_v29, %v1489_v3  ;;  %v719_v37 = vpop.f32.mrb[13].mxu1  ;;  %v812_v39 = vmax.f32 %v780_v25, 0.0  ;;  %v640_v41 = vadd.f32 %v1489_v3, %v639_v35 }
 0x10e   : > { %v828_v40 = vmax.f32 %v796_v26, 0.0  ;;  %v720_v42 = vadd.f32 %v1489_v3, %v719_v37  ;;  %846 = vst.msk [vmem:[%s1509_s11 + $0x58] sm:$0xff] %vm834_vm1, %v813_v31  ;;  %v783_v43 = vadd.f32 %v751_v28, %v645_v33 }
 0x10f   : > { %862 = vst.msk [vmem:[%s1509_s11 + $0xd8] sm:$0xff] %vm834_vm1, %v829_v32  ;;  %v799_v44 = vadd.f32 %v767_v30, %v725_v34  ;;  %845 = vst.msk [vmem:[%s1509_s11 + $0x50] sm:$0xff] %vm834_vm1, %v812_v39  ;;  %v782_v45 = vadd.f32 %v750_v36, %v640_v41  ;;  %v1102_v47 = vpop.f32.mrb[14].mxu0 }
 0x110   : > { %861 = vst.msk [vmem:[%s1509_s11 + $0xd0] sm:$0xff] %vm834_vm1, %v828_v40  ;;  %v798_v46 = vadd.f32 %v766_v38, %v720_v42  ;;  %v1126_v49 = vpop.f32.mrb[14].mxu1  ;;  %v815_v51 = vmax.f32 %v783_v43, 0.0  ;;  %v655_v53 = vadd.f32 %v1102_v47, %v1489_v3  ;;  %v649_v55 = vpop.f32.mrb[15].mxu0 }
 0x111   : > { %v831_v52 = vmax.f32 %v799_v44, 0.0  ;;  %v735_v54 = vadd.f32 %v1126_v49, %v1489_v3  ;;  %v729_v57 = vpop.f32.mrb[15].mxu1  ;;  %v814_v59 = vmax.f32 %v782_v45, 0.0  ;;  %v650_v61 = vadd.f32 %v1489_v3, %v649_v55 }
 0x112   : > { %v830_v60 = vmax.f32 %v798_v46, 0.0  ;;  %v730_v62 = vadd.f32 %v1489_v3, %v729_v57  ;;  %848 = vst.msk [vmem:[%s1509_s11 + $0x68] sm:$0xff] %vm834_vm1, %v815_v51  ;;  %v785_v63 = vadd.f32 %v753_v48, %v655_v53 }
 0x113   : > { %864 = vst.msk [vmem:[%s1509_s11 + $0xe8] sm:$0xff] %vm834_vm1, %v831_v52  ;;  %v801_v0 = vadd.f32 %v769_v50, %v735_v54  ;;  %847 = vst.msk [vmem:[%s1509_s11 + $0x60] sm:$0xff] %vm834_vm1, %v814_v59  ;;  %v784_v1 = vadd.f32 %v752_v56, %v650_v61 }
 0x114   : > { %863 = vst.msk [vmem:[%s1509_s11 + $0xe0] sm:$0xff] %vm834_vm1, %v830_v60  ;;  %v800_v3 = vadd.f32 %v768_v58, %v730_v62  ;;  %v817_v2 = vmax.f32 %v785_v63, 0.0 }
 0x115   : > { %v833_v4 = vmax.f32 %v801_v0, 0.0  ;;  %v816_v5 = vmax.f32 %v784_v1, 0.0 }
 0x116   : > { %v832_v6 = vmax.f32 %v800_v3, 0.0  ;;  %850 = vst.msk [vmem:[%s1509_s11 + $0x78] sm:$0xff] %vm834_vm1, %v817_v2 }
 0x117   : > { %866 = vst.msk [vmem:[%s1509_s11 + $0xf8] sm:$0xff] %vm834_vm1, %v833_v4  ;;  %849 = vst.msk [vmem:[%s1509_s11 + $0x70] sm:$0xff] %vm834_vm1, %v816_v5 }
 0x118   : > { %865 = vst.msk [vmem:[%s1509_s11 + $0xf0] sm:$0xff] %vm834_vm1, %v832_v6 }
 0x119   : > { %1203 = shalt.err (!%p1200_p5)
}
 0x11a   : > { %s1204_s29 = scalar_lea.hbm %s1620_s15, 4096  ;;  %s1208_s9 = scalar_lea.hbm %s1685_s5, 8192 }
 0x11b   : > { %p1205_p6 = scmp.ne.s32.totalorder %s1620_s15, %s1204_s29  ;;  %p1209_p10 = scmp.lt.u32.totalorder %s1620_s15, %s1685_s5 }
 0x11c   : > { %p1210_p11 = scmp.lt.u32.totalorder %s1208_s9, %s1204_s29  ;;  %p1212_p13 = scmp.lt.u32.totalorder %s1204_s29, %s1620_s15 }
 0x11d   : > { %p1206_p7 = pnand %p1205_p6, %p1343_p4 }
 0x11e   : > { %p1211_p12 = por %p1210_p11, %p1209_p10 }
 0x11f   : > { %p1207_p9 = pneg %p1206_p7 }
 0x120   : > { %p1213_p0 = por %p1212_p13, %p1211_p12 }
 0x122   : > { %p1214_p1 = pnand %p1213_p0, %p1207_p9 }
 0x124   : > { %1217 = shalt.err (!%p1214_p1)
}
 0x125   : > { %s1271_s12 = smov 128   ;;  %s1272_s21 = smov 8  }
 0x126   : > { %1133 = dma.vmem_to_hbm [thread:$0]  (%p1343_p4), %s1622_s13, 4096, %s1620_s15, %s1634_s16, %s1271_s12, %s1271_s12, %s1272_s21  }
 0x127 PF: > { %p1139_p2 = scmp.ge.s32.totalorder %s1268_s23, 2  ;;  %s898_s14 = sand.u32 1, %s1248_s18  }
 0x128   : > { %s899_s17 = scalar_lea.sflag [#allocation3], %s898_s14 }
 0x129   : > { %p1136_p3 = pnand %p1139_p2, %p1350_p8 }
 0x12b   : > { %1243 = dma.done.wait (!%p1136_p3), %s899_s17, 4096  }
 0x12c   : > { %1245 = vsyncadd (!%p1136_p3), %s899_s17, 4294963200  ;;  %s18_s23 = sadd.s32 1, %s1268_s23   ;;  %s1688_s18 = smov %s1252_s19 }
 0x12d   : > { %p15_p5 = scmp.ge.s32.totalorder %s18_s23, 4   ;;  %s1689_s19 = smov %s1256_s20 }
 0x12e   : > { %s1690_s20 = smov %s1356_s6  ;;  %s1691_s21 = smov %s1264_s22 }
 0x12f   : > { %s1692_s22 = smov %s1694_s26  ;;  %17 = sbr.rel (!%p15_p5) target bundleno = 4 (0x4), region = 81 }
 0x136   :  { %904 = vsyncpa [#allocation3], 1 }
 0x137   :  { %906 = vsyncpa [#allocation3 + $0x1], 1 }

// kernel: oca2_forward.4
= control target key start
LH: loop header
LB: loop body
LE: loop exit
PB: predicated region body
PF: predicated region fallthrough
CT: control target
= control target key end

     0   :  { %s5573_s18 = smov 0   ;;  %s6787_s0 = inlined_call_operand.vmem [shape: f32[2,18,18,16], index: 0, kind: input, shape index: {}]   ;;  %s6788_s1 = inlined_call_operand.vmem [shape: f32[9,16,16], index: 1, kind: input, shape index: {}]   ;;  %s6789_s2 = inlined_call_operand.vmem [shape: f32[1,16], index: 2, kind: input, shape index: {}]   ;;  %s6790_s3 = inlined_call_operand.vmem [shape: f32[256,16], index: 3, kind: input, shape index: {}]   ;;  %s6791_s4 = inlined_call_operand.vmem [shape: f32[2,16,16,16], index: 4, kind: output, shape index: {0}]   ;;  %s6792_s5 = inlined_call_operand.vmem [shape: f32[2,1,16], index: 5, kind: output, shape index: {1}]  }
   0x1 LB: > { %s3950_s19 = sadd.s32 4294967295, %s5541_s18   ;;  %p3954_p0 = scmp.ge.s32.totalorder %s5541_s18, 1  ;;  %s5541_s18 = sphi %s5573_s18, %s16_s18  }
   0x2   : > { %p190_p1 = scmp.lt.s32.totalorder %s5541_s18, 3 }
   0x4   : > { %p191_p2 = pnand %p3954_p0, %p190_p1 }
   0x6   : > { %194 = sbr.rel (%p191_p2) target bundleno = 542 (0x21e), region = 36 }
   0xd   : > { %v3958_v0 = vld [vmem:[%s6788_s1 + $0x10] sm:$0xff]  ;;  %v3959_v1 = vld [vmem:[%s6788_s1 + $0x18] sm:$0xff]  ;;  %v4156_v2 = vld [vmem:[%s6788_s1 + $0x40] sm:$0xff]  ;;  %p221_p3 = scmp.lt.s32.totalorder %s3950_s19, 1  ;;  %vm303_vm0 = vcmask 130048   ;;  %vm3868_vm1 = vcmask 122880  }
   0xe   : > { %v5232_v3 = vpack.c.bf16 %v3959_v1, %v3958_v0  ;;  %v4157_v4 = vld [vmem:[%s6788_s1 + $0x48] sm:$0xff]  ;;  %v266_v5 = vld [vmem:[%s6788_s1] sm:$0xff]  ;;  %v4222_v9 = vld [vmem:[%s6788_s1 + $0x50] sm:$0xff] }
   0xf   : > { %v267_v6 = vld [vmem:[%s6788_s1 + $0x8] sm:$0xff]  ;;  %v5599_v7 = vpack.c.bf16 %v4157_v4, %v4156_v2  ;;  %s6905_s19 = smov (!%p221_p3, %s3950_s19), 1  ;;  %v4223_v10 = vld [vmem:[%s6788_s1 + $0x58] sm:$0xff]  ;;  %v4288_v12 = vld [vmem:[%s6788_s1 + $0x60] sm:$0xff] }
  0x10   : > { %v5236_v8 = vpack.c.bf16 %v267_v6, %v266_v5  ;;  %5233 = vmatprep.subr.bf16.mxu1 %v5232_v3  ;;  %v5252_v11 = vpack.c.bf16 %v4223_v10, %v4222_v9  ;;  %s5526_s11 = smul.u32 432, %s6905_s19  ;;  %v4289_v13 = vld [vmem:[%s6788_s1 + $0x68] sm:$0xff]  ;;  %v4024_v14 = vld [vmem:[%s6788_s1 + $0x20] sm:$0xff]  ;;  %v4354_v37 = vld [vmem:[%s6788_s1 + $0x70] sm:$0xff]  ;;  %s4457_s12 = sshll.u32 %s6905_s19, 8 }
  0x11   : > { %5249 = vmatprep.subr.bf16.mxu0 %v5599_v7  ;;  %5235 = vmatpush3.bf16.msra.mxu1 %v5232_v3  ;;  %v4025_v15 = vld [vmem:[%s6788_s1 + $0x28] sm:$0xff]  ;;  %v5256_v21 = vpack.c.bf16 %v4289_v13, %v4288_v12  ;;  %v4355_v38 = vld [vmem:[%s6788_s1 + $0x78] sm:$0xff]  ;;  %s6546_s17 = scalar_lea.vmem %s6791_s4, %s4457_s12  ;;  %s233_s20 = scalar_lea.vmem %s6792_s5, %s6905_s19 }
  0x12   : > { %5251 = vmatpush3.bf16.msra.mxu0 %v5599_v7  ;;  %5237 = vmatprep.subr.bf16.mxu1 %v5236_v8  ;;  %s5627_s24 = scalar_lea.vmem %s6787_s0, %s5526_s11  ;;  %v5638_v22 = vpack.c.bf16 %v4025_v15, %v4024_v14  ;;  %v5755_v41 = vpack.c.bf16 %v4355_v38, %v4354_v37  ;;  %v4091_v9 = vld [vmem:[%s6788_s1 + $0x38] sm:$0xff] }
  0x13   : > { %5253 = vmatprep.subr.bf16.mxu0 %v5252_v11  ;;  %v268_v16 = vld [vmem:[%s5627_s24 + $0x1] sm:$0xff]  ;;  %v4124_v17 = vld [vmem:[%s5627_s24 + $0x19] sm:$0xff]  ;;  %v269_v18 = vld [vmem:[%s5627_s24 + $0x9] sm:$0xff] }
  0x14   : > { %4768 = vmatprep.mubr.msk.f32.mxu1 %vm303_vm0, %v268_v16  ;;  %4976 = vmatprep.mubr.msk.f32.mxu0 %vm303_vm0, %v4124_v17  ;;  %v4125_v19 = vld [vmem:[%s5627_s24 + $0x21] sm:$0xff]  ;;  %v5636_v20 = vld [vmem:[%s5627_s24 + $0x31] sm:$0xff]  ;;  %v5643_v23 = vld [vmem:[%s5627_s24 + $0x39] sm:$0xff] }
  0x15   : > { %4769 = vmatmul.mubr.msk.f32.vlgmr.msra.gmra.mrb[0].mxu1 %vm303_vm0, %v269_v18  ;;  %4977 = vmatmul.mubr.msk.f32.vlgmr.msra.gmra.mrb[0].mxu0 %vm303_vm0, %v4125_v19  ;;  %v5649_v24 = vld [vmem:[%s5627_s24 + $0x49] sm:$0xff]  ;;  %v5660_v25 = vld [vmem:[%s5627_s24 + $0x51] sm:$0xff]  ;;  %v5663_v26 = vld [vmem:[%s5627_s24 + $0x61] sm:$0xff] }
  0x16   : > { %5239 = vmatpush3.bf16.msra.mxu1 %v5236_v8  ;;  %5255 = vmatpush3.bf16.msra.mxu0 %v5252_v11  ;;  %v5674_v27 = vld [vmem:[%s5627_s24 + $0x69] sm:$0xff]  ;;  %v5677_v28 = vld [vmem:[%s5627_s24 + $0x79] sm:$0xff]  ;;  %v5688_v29 = vld [vmem:[%s5627_s24 + $0x81] sm:$0xff] }
  0x17   : > { %4771 = vmatprep.mubr.msk.f32.mxu1 %vm303_vm0, %v4124_v17  ;;  %4979 = vmatprep.mubr.msk.f32.mxu0 %vm303_vm0, %v5636_v20  ;;  %v5691_v30 = vld [vmem:[%s5627_s24 + $0x91] sm:$0xff]  ;;  %v5702_v31 = vld [vmem:[%s5627_s24 + $0x99] sm:$0xff]  ;;  %v5705_v32 = vld [vmem:[%s5627_s24 + $0xa9] sm:$0xff] }
  0x18   : > { %5257 = vmatprep.subr.bf16.mxu0 %v5256_v21  ;;  %5241 = vmatprep.subr.bf16.mxu1 %v5638_v22  ;;  %v5716_v33 = vld [vmem:[%s5627_s24 + $0xb1] sm:$0xff]  ;;  %v5719_v34 = vld [vmem:[%s5627_s24 + $0xc1] sm:$0xff]  ;;  %v5730_v35 = vld [vmem:[%s5627_s24 + $0xc9] sm:$0xff] }
  0x19   : > { %4772 = vmatmul.mubr.msk.f32.gmra.mrb[2].mxu1 %vm303_vm0, %v4125_v19  ;;  %4980 = vmatmul.mubr.msk.f32.gmra.mrb[2].mxu0 %vm303_vm0, %v5643_v23  ;;  %v5733_v36 = vld [vmem:[%s5627_s24 + $0x1a] sm:$0xff]  ;;  %v5750_v39 = vld [vmem:[%s5627_s24 + $0x22] sm:$0xff]  ;;  %v5758_v42 = vld [vmem:[%s5627_s24 + $0x32] sm:$0xff] }
  0x1a   : > { %4774 = vmatprep.mubr.msk.f32.mxu1 %vm303_vm0, %v5636_v20  ;;  %4982 = vmatprep.mubr.msk.f32.mxu0 %vm303_vm0, %v5649_v24  ;;  %v5753_v40 = vld [vmem:[%s5627_s24 + $0xd9] sm:$0xff]  ;;  %v5767_v43 = vld [vmem:[%s5627_s24 + $0xe1] sm:$0xff]  ;;  %v5775_v45 = vld [vmem:[%s5627_s24 + $0xf1] sm:$0xff] }
  0x1b   : > { %6840 = vst [vmem:[#allocation2_spill] sm:$0xff] %v5753_v40  ;;  %6841 = vst [vmem:[#allocation3_spill] sm:$0xff] %v5767_v43  ;;  %v5770_v44 = vld [vmem:[%s5627_s24 + $0x3a] sm:$0xff]  ;;  %v5778_v46 = vld [vmem:[%s5627_s24 + $0x4a] sm:$0xff] }
  0x1c   : > { %6842 = vst [vmem:[#allocation4_spill] sm:$0xff] %v5775_v45  ;;  %v5790_v47 = vld [vmem:[%s5627_s24 + $0xf9] sm:$0xff]  ;;  %v5796_v49 = vld [vmem:[%s5627_s24 + $0x109] sm:$0xff]  ;;  %v5810_v51 = vld [vmem:[%s5627_s24 + $0x111] sm:$0xff] }
  0x1d   : > { %4775 = vmatmul.mubr.msk.f32.gmra.mrb[4].mxu1 %vm303_vm0, %v5643_v23  ;;  %4983 = vmatmul.mubr.msk.f32.gmra.mrb[4].mxu0 %vm303_vm0, %v5660_v25  ;;  %6843 = vst [vmem:[#allocation5_spill] sm:$0xff] %v5790_v47  ;;  %v5793_v48 = vld [vmem:[%s5627_s24 + $0x52] sm:$0xff]  ;;  %6844 = vst [vmem:[#allocation6_spill] sm:$0xff] %v5796_v49  ;;  %v5799_v50 = vld [vmem:[%s5627_s24 + $0x62] sm:$0xff] }
  0x1e   : > { %4777 = vmatprep.mubr.msk.f32.mxu1 %vm303_vm0, %v5649_v24  ;;  %4985 = vmatprep.mubr.msk.f32.mxu0 %vm303_vm0, %v5663_v26  ;;  %6845 = vst [vmem:[#allocation7_spill] sm:$0xff] %v5810_v51  ;;  %v5813_v52 = vld [vmem:[%s5627_s24 + $0x6a] sm:$0xff]  ;;  %v5816_v53 = vld [vmem:[%s5627_s24 + $0x121] sm:$0xff]  ;;  %v5836_v57 = vld [vmem:[%s5627_s24 + $0x139] sm:$0xff] }
  0x1f   : > { %6846 = vst [vmem:[#allocation8_spill] sm:$0xff] %v5816_v53  ;;  %v5819_v54 = vld [vmem:[%s5627_s24 + $0x7a] sm:$0xff]  ;;  %v5830_v55 = vld [vmem:[%s5627_s24 + $0x129] sm:$0xff]  ;;  %6848 = vst [vmem:[#allocation10_spill] sm:$0xff] %v5836_v57 }
  0x20   : > { %6847 = vst [vmem:[#allocation9_spill] sm:$0xff] %v5830_v55  ;;  %v5833_v56 = vld [vmem:[%s5627_s24 + $0x82] sm:$0xff]  ;;  %v5839_v58 = vld [vmem:[%s5627_s24 + $0x92] sm:$0xff]  ;;  %v5853_v60 = vld [vmem:[%s5627_s24 + $0x9a] sm:$0xff] }
  0x21   : > { %4778 = vmatmul.mubr.msk.f32.gmra.mrb[6].mxu1 %vm303_vm0, %v5660_v25  ;;  %4986 = vmatmul.mubr.msk.f32.gmra.mrb[6].mxu0 %vm303_vm0, %v5674_v27  ;;  %v5850_v59 = vld [vmem:[%s5627_s24 + $0x141] sm:$0xff]  ;;  %v5856_v61 = vld [vmem:[%s5627_s24 + $0x151] sm:$0xff]  ;;  %v5870_v63 = vld [vmem:[%s5627_s24 + $0x159] sm:$0xff] }
  0x22   : > { %4780 = vmatprep.mubr.msk.f32.mxu1 %vm303_vm0, %v5663_v26  ;;  %4988 = vmatprep.mubr.msk.f32.mxu0 %vm303_vm0, %v5677_v28  ;;  %6849 = vst [vmem:[#allocation11_spill] sm:$0xff] %v5850_v59  ;;  %6850 = vst [vmem:[#allocation12_spill] sm:$0xff] %v5856_v61  ;;  %v5859_v62 = vld [vmem:[%s5627_s24 + $0xaa] sm:$0xff]  ;;  %v5873_v0 = vld [vmem:[%s5627_s24 + $0xb2] sm:$0xff] }
  0x23   : > { %6851 = vst [vmem:[#allocation13_spill] sm:$0xff] %v5870_v63  ;;  %v5876_v1 = vld [vmem:[%s5627_s24 + $0x169] sm:$0xff]  ;;  %v5890_v3 = vld [vmem:[%s5627_s24 + $0x171] sm:$0xff]  ;;  %v234_v5 = vld [vmem:[%s5627_s24] sm:$0xff] }
  0x24   : > { %6852 = vst [vmem:[#allocation14_spill] sm:$0xff] %v5876_v1  ;;  %v5879_v2 = vld [vmem:[%s5627_s24 + $0xc2] sm:$0xff]  ;;  %6853 = vst [vmem:[#allocation15_spill] sm:$0xff] %v5890_v3  ;;  %v5893_v4 = vld [vmem:[%s5627_s24 + $0xca] sm:$0xff] }
  0x25   : > { %4781 = vmatmul.mubr.msk.f32.gmra.mrb[8].mxu1 %vm303_vm0, %v5674_v27  ;;  %4989 = vmatmul.mubr.msk.f32.gmra.mrb[8].mxu0 %vm303_vm0, %v5688_v29  ;;  %v5897_v6 = vld [vmem:[%s5627_s24 + $0xda] sm:$0xff]  ;;  %v4090_v8 = vld [vmem:[%s6788_s1 + $0x30] sm:$0xff]  ;;  %v235_v10 = vld [vmem:[%s5627_s24 + $0x8] sm:$0xff] }
  0x26   : > { %4783 = vmatprep.mubr.msk.f32.mxu1 %vm303_vm0, %v5677_v28  ;;  %4991 = vmatprep.mubr.msk.f32.mxu0 %vm303_vm0, %v5691_v30  ;;  %v5914_v11 = vld [vmem:[%s5627_s24 + $0xe2] sm:$0xff]  ;;  %v5917_v12 = vld [vmem:[%s5627_s24 + $0x18] sm:$0xff]  ;;  %v5919_v13 = vpack.c.bf16 %v4091_v9, %v4090_v8  ;;  %v5939_v17 = vld [vmem:[%s5627_s24 + $0x30] sm:$0xff] }
  0x27   : > { %6854 = vst [vmem:[#allocation16_spill] sm:$0xff] %v5917_v12  ;;  %v5922_v14 = vld [vmem:[%s5627_s24 + $0xf2] sm:$0xff]  ;;  %v5931_v15 = vld [vmem:[%s5627_s24 + $0x20] sm:$0xff]  ;;  %v5942_v18 = vld [vmem:[%s5627_s24 + $0x10a] sm:$0xff] }
  0x28   : > { %6855 = vst [vmem:[#allocation17_spill] sm:$0xff] %v5931_v15  ;;  %v5934_v16 = vld [vmem:[%s5627_s24 + $0xfa] sm:$0xff]  ;;  %v5963_v37 = vld [vmem:[%s5627_s24 + $0x122] sm:$0xff]  ;;  %v5974_v38 = vld [vmem:[%s5627_s24 + $0x50] sm:$0xff] }
  0x29   : > { %4784 = vmatmul.mubr.msk.f32.gmra.mrb[10].mxu1 %vm303_vm0, %v5688_v29  ;;  %4992 = vmatmul.mubr.msk.f32.gmra.mrb[10].mxu0 %vm303_vm0, %v5702_v31  ;;  %v5954_v19 = vld [vmem:[%s5627_s24 + $0x38] sm:$0xff]  ;;  %6857 = vst [vmem:[#allocation19_spill] sm:$0xff] %v5974_v38  ;;  %v5980_v8 = vld [vmem:[%s5627_s24 + $0x60] sm:$0xff] }
  0x2a   : > { %4786 = vmatprep.mubr.msk.f32.mxu1 %vm303_vm0, %v5691_v30  ;;  %4994 = vmatprep.mubr.msk.f32.mxu0 %vm303_vm0, %v5705_v32  ;;  %6858 = vst [vmem:[#allocation20_spill] sm:$0xff] %v5980_v8  ;;  %v5983_v9 = vld [vmem:[%s5627_s24 + $0x13a] sm:$0xff] }
  0x2d   : > { %4787 = vmatmul.mubr.msk.f32.gmra.mrb[12].mxu1 %vm303_vm0, %v5702_v31  ;;  %4995 = vmatmul.mubr.msk.f32.gmra.mrb[12].mxu0 %vm303_vm0, %v5716_v33 }
  0x2e   : > { %4789 = vmatprep.mubr.msk.f32.mxu1 %vm303_vm0, %v5705_v32  ;;  %4997 = vmatprep.mubr.msk.f32.mxu0 %vm303_vm0, %v5719_v34 }
  0x31   : > { %4790 = vmatmul.mubr.msk.f32.gmra.mrb[14].mxu1 %vm303_vm0, %v5716_v33  ;;  %4998 = vmatmul.mubr.msk.f32.gmra.mrb[14].mxu0 %vm303_vm0, %v5730_v35 }
  0x32   : > { %4792 = vmatprep.mubr.msk.f32.mxu1 %vm303_vm0, %v5719_v34  ;;  %5028 = vmatprep.mubr.msk.f32.mxu0 %vm303_vm0, %v5733_v36 }
  0x35   : > { %4793 = vmatmul.mubr.msk.f32.gmra.mrb[16].mxu1 %vm303_vm0, %v5730_v35  ;;  %5029 = vmatmul.mubr.msk.f32.vlgmr.msra.gmra.mrb[0].mxu0 %vm303_vm0, %v5750_v39 }
  0x36   : > { %5259 = vmatpush3.bf16.msra.mxu0 %v5256_v21  ;;  %4795 = vmatprep.mubr.msk.f32.mxu1 %vm303_vm0, %v5753_v40  ;;  %v5957_v21 = vld [vmem:[%s5627_s24 + $0x112] sm:$0xff] }
  0x37   : > { %5031 = vmatprep.mubr.msk.f32.mxu0 %vm303_vm0, %v5758_v42  ;;  %5261 = vmatprep.subr.bf16.mxu0 %v5755_v41  ;;  %v6080_v40 = vld [vmem:[%s5627_s24 + $0xd8] sm:$0xff] }
  0x39   : > { %4796 = vmatmul.mubr.msk.f32.gmra.mrb[18].mxu1 %vm303_vm0, %v5767_v43  ;;  %5032 = vmatmul.mubr.msk.f32.gmra.mrb[2].mxu0 %vm303_vm0, %v5770_v44  ;;  %v4420_v43 = vld [vmem:[%s6788_s1 + $0x80] sm:$0xff] }
  0x3a   : > { %4798 = vmatprep.mubr.msk.f32.mxu1 %vm303_vm0, %v5775_v45  ;;  %5034 = vmatprep.mubr.msk.f32.mxu0 %vm303_vm0, %v5778_v46  ;;  %v6057_v45 = vld [vmem:[%s5627_s24 + $0x18a] sm:$0xff] }
  0x3b   : > { %6869 = vst [vmem:[#allocation31_spill] sm:$0xff] %v6057_v45 }
  0x3d   : > { %4799 = vmatmul.mubr.msk.f32.gmra.mrb[20].mxu1 %vm303_vm0, %v5790_v47  ;;  %5035 = vmatmul.mubr.msk.f32.gmra.mrb[4].mxu0 %vm303_vm0, %v5793_v48  ;;  %v6043_v47 = vld [vmem:[%s5627_s24 + $0x182] sm:$0xff] }
  0x3e   : > { %4801 = vmatprep.mubr.msk.f32.mxu1 %vm303_vm0, %v5796_v49  ;;  %5037 = vmatprep.mubr.msk.f32.mxu0 %vm303_vm0, %v5799_v50  ;;  %v6040_v49 = vld [vmem:[%s5627_s24 + $0xa8] sm:$0xff]  ;;  %6867 = vst [vmem:[#allocation29_spill] sm:$0xff] %v6043_v47 }
  0x3f   : > { %6866 = vst [vmem:[#allocation28_spill] sm:$0xff] %v6040_v49 }
  0x41   : > { %4802 = vmatmul.mubr.msk.f32.gmra.mrb[22].mxu1 %vm303_vm0, %v5810_v51  ;;  %5038 = vmatmul.mubr.msk.f32.gmra.mrb[6].mxu0 %vm303_vm0, %v5813_v52  ;;  %v6037_v51 = vld [vmem:[%s5627_s24 + $0x172] sm:$0xff] }
  0x42   : > { %4804 = vmatprep.mubr.msk.f32.mxu1 %vm303_vm0, %v5816_v53  ;;  %5040 = vmatprep.mubr.msk.f32.mxu0 %vm303_vm0, %v5819_v54  ;;  %v6034_v53 = vld [vmem:[%s5627_s24 + $0x98] sm:$0xff]  ;;  %6865 = vst [vmem:[#allocation27_spill] sm:$0xff] %v6037_v51 }
  0x43   : > { %6864 = vst [vmem:[#allocation26_spill] sm:$0xff] %v6034_v53 }
  0x45   : > { %4805 = vmatmul.mubr.msk.f32.gmra.mrb[24].mxu1 %vm303_vm0, %v5830_v55  ;;  %5041 = vmatmul.mubr.msk.f32.gmra.mrb[8].mxu0 %vm303_vm0, %v5833_v56  ;;  %v6023_v55 = vld [vmem:[%s5627_s24 + $0x16a] sm:$0xff] }
  0x46   : > { %4807 = vmatprep.mubr.msk.f32.mxu1 %vm303_vm0, %v5836_v57  ;;  %5043 = vmatprep.mubr.msk.f32.mxu0 %vm303_vm0, %v5839_v58  ;;  %v6020_v57 = vld [vmem:[%s5627_s24 + $0x90] sm:$0xff]  ;;  %6863 = vst [vmem:[#allocation25_spill] sm:$0xff] %v6023_v55 }
  0x47   : > { %6862 = vst [vmem:[#allocation24_spill] sm:$0xff] %v6020_v57 }
  0x49   : > { %4808 = vmatmul.mubr.msk.f32.gmra.mrb[26].mxu1 %vm303_vm0, %v5850_v59  ;;  %5044 = vmatmul.mubr.msk.f32.gmra.mrb[10].mxu0 %vm303_vm0, %v5853_v60  ;;  %v6017_v59 = vld [vmem:[%s5627_s24 + $0x15a] sm:$0xff] }
  0x4a   : > { %4810 = vmatprep.mubr.msk.f32.mxu1 %vm303_vm0, %v5856_v61  ;;  %5046 = vmatprep.mubr.msk.f32.mxu0 %vm303_vm0, %v5859_v62  ;;  %v6014_v61 = vld [vmem:[%s5627_s24 + $0x80] sm:$0xff] }
  0x4b   : > { %6861 = vst [vmem:[#allocation23_spill] sm:$0xff] %v6014_v61 }
  0x4d   : > { %4811 = vmatmul.mubr.msk.f32.gmra.mrb[28].mxu1 %vm303_vm0, %v5870_v63  ;;  %5047 = vmatmul.mubr.msk.f32.gmra.mrb[12].mxu0 %vm303_vm0, %v5873_v0  ;;  %v6003_v63 = vld [vmem:[%s5627_s24 + $0x152] sm:$0xff] }
  0x4e   : > { %4813 = vmatprep.mubr.msk.f32.mxu1 %vm303_vm0, %v5876_v1  ;;  %5049 = vmatprep.mubr.msk.f32.mxu0 %vm303_vm0, %v5879_v2  ;;  %v6000_v1 = vld [vmem:[%s5627_s24 + $0x78] sm:$0xff] }
  0x4f   : > { %6860 = vst [vmem:[#allocation22_spill] sm:$0xff] %v6000_v1 }
  0x51   : > { %4814 = vmatmul.mubr.msk.f32.gmra.mrb[30].mxu1 %vm303_vm0, %v5890_v3  ;;  %5050 = vmatmul.mubr.msk.f32.gmra.mrb[14].mxu0 %vm303_vm0, %v5893_v4  ;;  %v5997_v3 = vld [vmem:[%s5627_s24 + $0x142] sm:$0xff] }
  0x52   : > { %4820 = vmatprep.mubr.msk.f32.mxu1 %vm303_vm0, %v234_v5  ;;  %5052 = vmatprep.mubr.msk.f32.mxu0 %vm303_vm0, %v5897_v6  ;;  %v5977_v5 = vld [vmem:[%s5627_s24 + $0x12a] sm:$0xff] }
  0x55   : > { %4821 = vmatmul.mubr.msk.f32.vlgmr.msra.gmra.mrb[0].mxu1 %vm303_vm0, %v235_v10  ;;  %5053 = vmatmul.mubr.msk.f32.gmra.mrb[16].mxu0 %vm303_vm0, %v5914_v11  ;;  %v5994_v10 = vld [vmem:[%s5627_s24 + $0x68] sm:$0xff] }
  0x56   : > { %5243 = vmatpush3.bf16.msra.mxu1 %v5638_v22  ;;  %4823 = vmatprep.mubr.msk.f32.mxu1 %vm303_vm0, %v5917_v12  ;;  %v5960_v22 = vld [vmem:[%s5627_s24 + $0x48] sm:$0xff]  ;;  %6859 = vst [vmem:[#allocation21_spill] sm:$0xff] %v5994_v10  ;;  %v6060_v12 = vld [vmem:[%s5627_s24 + $0xc0] sm:$0xff] }
  0x57   : > { %5055 = vmatprep.mubr.msk.f32.mxu0 %vm303_vm0, %v5922_v14  ;;  %5245 = vmatprep.subr.bf16.mxu1 %v5919_v13  ;;  %6856 = vst [vmem:[#allocation18_spill] sm:$0xff] %v5960_v22 }
  0x59   : > { %4824 = vmatmul.mubr.msk.f32.gmra.mrb[2].mxu1 %vm303_vm0, %v5931_v15  ;;  %5056 = vmatmul.mubr.msk.f32.gmra.mrb[18].mxu0 %vm303_vm0, %v5934_v16  ;;  %v6054_v15 = vld [vmem:[%s5627_s24 + $0xb0] sm:$0xff] }
  0x5a   : > { %4826 = vmatprep.mubr.msk.f32.mxu1 %vm303_vm0, %v5939_v17  ;;  %5058 = vmatprep.mubr.msk.f32.mxu0 %vm303_vm0, %v5942_v18  ;;  %6868 = vst [vmem:[#allocation30_spill] sm:$0xff] %v6054_v15 }
  0x5d   : > { %4827 = vmatmul.mubr.msk.f32.gmra.mrb[4].mxu1 %vm303_vm0, %v5954_v19  ;;  %5059 = vmatmul.mubr.msk.f32.gmra.mrb[20].mxu0 %vm303_vm0, %v5957_v21 }
  0x5e   : > { %4829 = vmatprep.mubr.msk.f32.mxu1 %vm303_vm0, %v5960_v22  ;;  %5061 = vmatprep.mubr.msk.f32.mxu0 %vm303_vm0, %v5963_v37 }
  0x61   : > { %4830 = vmatmul.mubr.msk.f32.gmra.mrb[6].mxu1 %vm303_vm0, %v5974_v38  ;;  %5062 = vmatmul.mubr.msk.f32.gmra.mrb[22].mxu0 %vm303_vm0, %v5977_v5 }
  0x62   : > { %4832 = vmatprep.mubr.msk.f32.mxu1 %vm303_vm0, %v5980_v8  ;;  %5064 = vmatprep.mubr.msk.f32.mxu0 %vm303_vm0, %v5983_v9 }
  0x65   : > { %4833 = vmatmul.mubr.msk.f32.gmra.mrb[8].mxu1 %vm303_vm0, %v5994_v10  ;;  %5065 = vmatmul.mubr.msk.f32.gmra.mrb[24].mxu0 %vm303_vm0, %v5997_v3 }
  0x66   : > { %4835 = vmatprep.mubr.msk.f32.mxu1 %vm303_vm0, %v6000_v1  ;;  %5067 = vmatprep.mubr.msk.f32.mxu0 %vm303_vm0, %v6003_v63 }
  0x69   : > { %4836 = vmatmul.mubr.msk.f32.gmra.mrb[10].mxu1 %vm303_vm0, %v6014_v61  ;;  %5068 = vmatmul.mubr.msk.f32.gmra.mrb[26].mxu0 %vm303_vm0, %v6017_v59 }
  0x6a   : > { %4838 = vmatprep.mubr.msk.f32.mxu1 %vm303_vm0, %v6020_v57  ;;  %5070 = vmatprep.mubr.msk.f32.mxu0 %vm303_vm0, %v6023_v55 }
  0x6d   : > { %4839 = vmatmul.mubr.msk.f32.gmra.mrb[12].mxu1 %vm303_vm0, %v6034_v53  ;;  %5071 = vmatmul.mubr.msk.f32.gmra.mrb[28].mxu0 %vm303_vm0, %v6037_v51  ;;  %v4421_v51 = vld [vmem:[%s6788_s1 + $0x88] sm:$0xff] }
  0x6e   : > { %4841 = vmatprep.mubr.msk.f32.mxu1 %vm303_vm0, %v6040_v49  ;;  %5073 = vmatprep.mubr.msk.f32.mxu0 %vm303_vm0, %v6043_v47  ;;  %v6077_v47 = vld [vmem:[%s5627_s24 + $0xc8] sm:$0xff]  ;;  %v6082_v55 = vpack.c.bf16 %v4421_v51, %v4420_v43  ;;  %v6097_v43 = vld [vmem:[%s5627_s24 + $0xf0] sm:$0xff] }
  0x6f   : > { %6870 = vst [vmem:[#allocation32_spill] sm:$0xff] %v6077_v47  ;;  %v6112_v51 = vld [vmem:[%s5627_s24 + $0x108] sm:$0xff] }
  0x71   : > { %4842 = vmatmul.mubr.msk.f32.gmra.mrb[14].mxu1 %vm303_vm0, %v6054_v15  ;;  %5074 = vmatmul.mubr.msk.f32.gmra.mrb[30].mxu0 %vm303_vm0, %v6057_v45  ;;  %v6092_v45 = vld [vmem:[%s5627_s24 + $0xe0] sm:$0xff] }
  0x72   : > { %4844 = vmatprep.mubr.msk.f32.mxu1 %vm303_vm0, %v6060_v12  ;;  %5080 = vmatprep.mubr.msk.f32.mxu0 %vm303_vm0, %v5939_v17 }
  0x75   : > { %4845 = vmatmul.mubr.msk.f32.gmra.mrb[16].mxu1 %vm303_vm0, %v6077_v47  ;;  %5081 = vmatmul.mubr.msk.f32.vlgmr.msra.gmra.mrb[0].mxu0 %vm303_vm0, %v5954_v19 }
  0x76   : > { %5263 = vmatpush3.bf16.msra.mxu0 %v5755_v41  ;;  %4847 = vmatprep.mubr.msk.f32.mxu1 %vm303_vm0, %v6080_v40  ;;  %v6109_v41 = vld [vmem:[%s5627_s24 + $0xf8] sm:$0xff] }
  0x77   : > { %5083 = vmatprep.mubr.msk.f32.mxu0 %vm303_vm0, %v5960_v22  ;;  %5265 = vmatprep.subr.bf16.mxu0 %v6082_v55  ;;  %v946_v22 = vld [vmem:[%s5627_s24 + $0x2] sm:$0xff] }
  0x79   : > { %4848 = vmatmul.mubr.msk.f32.gmra.mrb[18].mxu1 %vm303_vm0, %v6092_v45  ;;  %5084 = vmatmul.mubr.msk.f32.gmra.mrb[2].mxu0 %vm303_vm0, %v5974_v38  ;;  %v6123_v38 = vld [vmem:[%s5627_s24 + $0x110] sm:$0xff] }
  0x7a   : > { %4850 = vmatprep.mubr.msk.f32.mxu1 %vm303_vm0, %v6097_v43  ;;  %5086 = vmatprep.mubr.msk.f32.mxu0 %vm303_vm0, %v5980_v8  ;;  %v6126_v8 = vld [vmem:[%s5627_s24 + $0x120] sm:$0xff] }
  0x7d   : > { %4851 = vmatmul.mubr.msk.f32.gmra.mrb[20].mxu1 %vm303_vm0, %v6109_v41  ;;  %5087 = vmatmul.mubr.msk.f32.gmra.mrb[4].mxu0 %vm303_vm0, %v5994_v10  ;;  %v6137_v10 = vld [vmem:[%s5627_s24 + $0x128] sm:$0xff] }
  0x7e   : > { %4853 = vmatprep.mubr.msk.f32.mxu1 %vm303_vm0, %v6112_v51  ;;  %5089 = vmatprep.mubr.msk.f32.mxu0 %vm303_vm0, %v6000_v1  ;;  %v6140_v1 = vld [vmem:[%s5627_s24 + $0x138] sm:$0xff] }
  0x81   : > { %4854 = vmatmul.mubr.msk.f32.gmra.mrb[22].mxu1 %vm303_vm0, %v6123_v38  ;;  %5090 = vmatmul.mubr.msk.f32.gmra.mrb[6].mxu0 %vm303_vm0, %v6014_v61  ;;  %v6151_v61 = vld [vmem:[%s5627_s24 + $0x140] sm:$0xff] }
  0x82   : > { %4856 = vmatprep.mubr.msk.f32.mxu1 %vm303_vm0, %v6126_v8  ;;  %5092 = vmatprep.mubr.msk.f32.mxu0 %vm303_vm0, %v6020_v57  ;;  %v6154_v57 = vld [vmem:[%s5627_s24 + $0x150] sm:$0xff] }
  0x85   : > { %4857 = vmatmul.mubr.msk.f32.gmra.mrb[24].mxu1 %vm303_vm0, %v6137_v10  ;;  %5093 = vmatmul.mubr.msk.f32.gmra.mrb[8].mxu0 %vm303_vm0, %v6034_v53  ;;  %v6165_v53 = vld [vmem:[%s5627_s24 + $0x158] sm:$0xff] }
  0x86   : > { %4859 = vmatprep.mubr.msk.f32.mxu1 %vm303_vm0, %v6140_v1  ;;  %5095 = vmatprep.mubr.msk.f32.mxu0 %vm303_vm0, %v6040_v49  ;;  %v6168_v49 = vld [vmem:[%s5627_s24 + $0x168] sm:$0xff] }
  0x89   : > { %4860 = vmatmul.mubr.msk.f32.gmra.mrb[26].mxu1 %vm303_vm0, %v6151_v61  ;;  %5096 = vmatmul.mubr.msk.f32.gmra.mrb[10].mxu0 %vm303_vm0, %v6054_v15  ;;  %v6179_v15 = vld [vmem:[%s5627_s24 + $0x170] sm:$0xff] }
  0x8a   : > { %4862 = vmatprep.mubr.msk.f32.mxu1 %vm303_vm0, %v6154_v57  ;;  %5098 = vmatprep.mubr.msk.f32.mxu0 %vm303_vm0, %v6060_v12 }
  0x8d   : > { %4863 = vmatmul.mubr.msk.f32.gmra.mrb[28].mxu1 %vm303_vm0, %v6165_v53  ;;  %5099 = vmatmul.mubr.msk.f32.gmra.mrb[12].mxu0 %vm303_vm0, %v6077_v47  ;;  %v947_v47 = vld [vmem:[%s5627_s24 + $0xa] sm:$0xff] }
  0x8e   : > { %4865 = vmatprep.mubr.msk.f32.mxu1 %vm303_vm0, %v6168_v49  ;;  %5101 = vmatprep.mubr.msk.f32.mxu0 %vm303_vm0, %v6080_v40 }
  0x91   : > { %4866 = vmatmul.mubr.msk.f32.gmra.mrb[30].mxu1 %vm303_vm0, %v6179_v15  ;;  %5102 = vmatmul.mubr.msk.f32.gmra.mrb[14].mxu0 %vm303_vm0, %v6092_v45 }
  0x92   : > { %4872 = vmatprep.mubr.msk.f32.mxu1 %vm303_vm0, %v946_v22  ;;  %5104 = vmatprep.mubr.msk.f32.mxu0 %vm303_vm0, %v6097_v43  ;;  %v6889_v22 = vld [vmem:[#allocation22_spill] sm:$0xff] }
  0x95   : > { %4873 = vmatmul.mubr.msk.f32.vlgmr.msra.gmra.mrb[0].mxu1 %vm303_vm0, %v947_v47  ;;  %5105 = vmatmul.mubr.msk.f32.gmra.mrb[16].mxu0 %vm303_vm0, %v6109_v41  ;;  %v4286_v47 = vld [vmem:[%s5627_s24 + $0x198] sm:$0xff] }
  0x96   : > { %5247 = vmatpush3.bf16.msra.mxu1 %v5919_v13  ;;  %4875 = vmatprep.mubr.msk.f32.mxu1 %vm303_vm0, %v5733_v36  ;;  %v6232_v36 = vld [vmem:[%s5627_s24 + $0x180] sm:$0xff] }
  0x97   : > { %5107 = vmatprep.mubr.msk.f32.mxu0 %vm303_vm0, %v6112_v51  ;;  %5268 = vmatprep.subr.bf16.mxu1 %v5599_v7  ;;  %v4287_v13 = vld [vmem:[%s5627_s24 + $0x1a0] sm:$0xff] }
  0x99   : > { %4876 = vmatmul.mubr.msk.f32.gmra.mrb[2].mxu1 %vm303_vm0, %v5750_v39  ;;  %5108 = vmatmul.mubr.msk.f32.gmra.mrb[18].mxu0 %vm303_vm0, %v6123_v38  ;;  %v6243_v39 = vld [vmem:[%s5627_s24 + $0x188] sm:$0xff] }
  0x9a   : > { %4878 = vmatprep.mubr.msk.f32.mxu1 %vm303_vm0, %v5758_v42  ;;  %5110 = vmatprep.mubr.msk.f32.mxu0 %vm303_vm0, %v6126_v8 }
  0x9d   : > { %4879 = vmatmul.mubr.msk.f32.gmra.mrb[4].mxu1 %vm303_vm0, %v5770_v44  ;;  %5111 = vmatmul.mubr.msk.f32.gmra.mrb[20].mxu0 %vm303_vm0, %v6137_v10 }
  0x9e   : > { %4881 = vmatprep.mubr.msk.f32.mxu1 %vm303_vm0, %v5778_v46  ;;  %5113 = vmatprep.mubr.msk.f32.mxu0 %vm303_vm0, %v6140_v1 }
  0xa1   : > { %4882 = vmatmul.mubr.msk.f32.gmra.mrb[6].mxu1 %vm303_vm0, %v5793_v48  ;;  %5114 = vmatmul.mubr.msk.f32.gmra.mrb[22].mxu0 %vm303_vm0, %v6151_v61 }
  0xa2   : > { %4884 = vmatprep.mubr.msk.f32.mxu1 %vm303_vm0, %v5799_v50  ;;  %5116 = vmatprep.mubr.msk.f32.mxu0 %vm303_vm0, %v6154_v57 }
  0xa5   : > { %4885 = vmatmul.mubr.msk.f32.gmra.mrb[8].mxu1 %vm303_vm0, %v5813_v52  ;;  %5117 = vmatmul.mubr.msk.f32.gmra.mrb[24].mxu0 %vm303_vm0, %v6165_v53 }
  0xa6   : > { %4887 = vmatprep.mubr.msk.f32.mxu1 %vm303_vm0, %v5819_v54  ;;  %5119 = vmatprep.mubr.msk.f32.mxu0 %vm303_vm0, %v6168_v49 }
  0xa9   : > { %4888 = vmatmul.mubr.msk.f32.gmra.mrb[10].mxu1 %vm303_vm0, %v5833_v56  ;;  %5120 = vmatmul.mubr.msk.f32.gmra.mrb[26].mxu0 %vm303_vm0, %v6179_v15 }
  0xaa   : > { %4890 = vmatprep.mubr.msk.f32.mxu1 %vm303_vm0, %v5839_v58  ;;  %5122 = vmatprep.mubr.msk.f32.mxu0 %vm303_vm0, %v6232_v36 }
  0xad   : > { %4891 = vmatmul.mubr.msk.f32.gmra.mrb[12].mxu1 %vm303_vm0, %v5853_v60  ;;  %5123 = vmatmul.mubr.msk.f32.gmra.mrb[28].mxu0 %vm303_vm0, %v6243_v39 }
  0xae   : > { %4893 = vmatprep.mubr.msk.f32.mxu1 %vm303_vm0, %v5859_v62  ;;  %5125 = vmatprep.mubr.msk.f32.mxu0 %vm303_vm0, %v4286_v47  ;;  %v6890_v47 = vld [vmem:[#allocation12_spill] sm:$0xff] }
  0xb1   : > { %4894 = vmatmul.mubr.msk.f32.gmra.mrb[14].mxu1 %vm303_vm0, %v5873_v0  ;;  %5126 = vmatmul.mubr.msk.f32.gmra.mrb[30].mxu0 %vm303_vm0, %v4287_v13  ;;  %v6891_v13 = vld [vmem:[#allocation23_spill] sm:$0xff] }
  0xb2   : > { %4896 = vmatprep.mubr.msk.f32.mxu1 %vm303_vm0, %v5879_v2  ;;  %5132 = vmatprep.mubr.msk.f32.mxu0 %vm303_vm0, %v5636_v20  ;;  %v6871_v20 = vld [vmem:[#allocation25_spill] sm:$0xff] }
  0xb5   : > { %4897 = vmatmul.mubr.msk.f32.gmra.mrb[16].mxu1 %vm303_vm0, %v5893_v4  ;;  %5133 = vmatmul.mubr.msk.f32.vlgmr.msra.gmra.mrb[0].mxu0 %vm303_vm0, %v5643_v23  ;;  %v6872_v23 = vld [vmem:[#allocation2_spill] sm:$0xff] }
  0xb6   : > { %5267 = vmatpush3.bf16.msra.mxu0 %v6082_v55  ;;  %4899 = vmatprep.mubr.msk.f32.mxu1 %vm303_vm0, %v5897_v6  ;;  %v6886_v55 = vld [vmem:[#allocation10_spill] sm:$0xff] }
  0xb7   : > { %5135 = vmatprep.mubr.msk.f32.mxu0 %vm303_vm0, %v5649_v24  ;;  %v6873_v24 = vld [vmem:[#allocation27_spill] sm:$0xff] }
  0xb9   : > { %4900 = vmatmul.mubr.msk.f32.gmra.mrb[18].mxu1 %vm303_vm0, %v5914_v11  ;;  %5136 = vmatmul.mubr.msk.f32.gmra.mrb[2].mxu0 %vm303_vm0, %v5660_v25  ;;  %v6874_v25 = vld [vmem:[#allocation3_spill] sm:$0xff] }
  0xba   : > { %4902 = vmatprep.mubr.msk.f32.mxu1 %vm303_vm0, %v5922_v14  ;;  %5138 = vmatprep.mubr.msk.f32.mxu0 %vm303_vm0, %v5663_v26  ;;  %v6875_v26 = vld [vmem:[#allocation16_spill] sm:$0xff] }
  0xbd   : > { %4903 = vmatmul.mubr.msk.f32.gmra.mrb[20].mxu1 %vm303_vm0, %v5934_v16  ;;  %5139 = vmatmul.mubr.msk.f32.gmra.mrb[4].mxu0 %vm303_vm0, %v5674_v27  ;;  %v6876_v27 = vld [vmem:[#allocation4_spill] sm:$0xff] }
  0xbe   : > { %4905 = vmatprep.mubr.msk.f32.mxu1 %vm303_vm0, %v5942_v18  ;;  %5141 = vmatprep.mubr.msk.f32.mxu0 %vm303_vm0, %v5677_v28  ;;  %v6877_v28 = vld [vmem:[#allocation17_spill] sm:$0xff] }
  0xc1   : > { %4906 = vmatmul.mubr.msk.f32.gmra.mrb[22].mxu1 %vm303_vm0, %v5957_v21  ;;  %5142 = vmatmul.mubr.msk.f32.gmra.mrb[6].mxu0 %vm303_vm0, %v5688_v29  ;;  %v6878_v29 = vld [vmem:[#allocation5_spill] sm:$0xff] }
  0xc2   : > { %4908 = vmatprep.mubr.msk.f32.mxu1 %vm303_vm0, %v5963_v37  ;;  %5144 = vmatprep.mubr.msk.f32.mxu0 %vm303_vm0, %v5691_v30  ;;  %v6879_v30 = vld [vmem:[#allocation6_spill] sm:$0xff] }
  0xc5   : > { %4909 = vmatmul.mubr.msk.f32.gmra.mrb[24].mxu1 %vm303_vm0, %v5977_v5  ;;  %5145 = vmatmul.mubr.msk.f32.gmra.mrb[8].mxu0 %vm303_vm0, %v5702_v31  ;;  %v6880_v31 = vld [vmem:[#allocation7_spill] sm:$0xff] }
  0xc6   : > { %4911 = vmatprep.mubr.msk.f32.mxu1 %vm303_vm0, %v5983_v9  ;;  %5147 = vmatprep.mubr.msk.f32.mxu0 %vm303_vm0, %v5705_v32  ;;  %v6881_v32 = vld [vmem:[#allocation18_spill] sm:$0xff] }
  0xc9   : > { %4912 = vmatmul.mubr.msk.f32.gmra.mrb[26].mxu1 %vm303_vm0, %v5997_v3  ;;  %5148 = vmatmul.mubr.msk.f32.gmra.mrb[10].mxu0 %vm303_vm0, %v5716_v33  ;;  %v6882_v33 = vld [vmem:[#allocation8_spill] sm:$0xff] }
  0xca   : > { %4914 = vmatprep.mubr.msk.f32.mxu1 %vm303_vm0, %v6003_v63  ;;  %5150 = vmatprep.mubr.msk.f32.mxu0 %vm303_vm0, %v5719_v34  ;;  %v6884_v34 = vld [vmem:[#allocation9_spill] sm:$0xff] }
  0xcd   : > { %4915 = vmatmul.mubr.msk.f32.gmra.mrb[28].mxu1 %vm303_vm0, %v6017_v59  ;;  %5151 = vmatmul.mubr.msk.f32.gmra.mrb[12].mxu0 %vm303_vm0, %v5730_v35  ;;  %v6885_v35 = vld [vmem:[#allocation20_spill] sm:$0xff] }
  0xce   : > { %4917 = vmatprep.mubr.msk.f32.mxu1 %vm303_vm0, %v6871_v20  ;;  %5153 = vmatprep.mubr.msk.f32.mxu0 %vm303_vm0, %v6872_v23 }
  0xd1   : > { %4918 = vmatmul.mubr.msk.f32.gmra.mrb[30].mxu1 %vm303_vm0, %v6873_v24  ;;  %5154 = vmatmul.mubr.msk.f32.gmra.mrb[14].mxu0 %vm303_vm0, %v6874_v25  ;;  %v6898_v24 = vld [vmem:[#allocation30_spill] sm:$0xff] }
  0xd2   : > { %4924 = vmatprep.mubr.msk.f32.mxu1 %vm303_vm0, %v6875_v26  ;;  %5156 = vmatprep.mubr.msk.f32.mxu0 %vm303_vm0, %v6876_v27  ;;  %v6892_v26 = vld [vmem:[#allocation13_spill] sm:$0xff] }
  0xd5   : > { %4925 = vmatmul.mubr.msk.f32.vlgmr.msra.gmra.mrb[0].mxu1 %vm303_vm0, %v6877_v28  ;;  %5157 = vmatmul.mubr.msk.f32.gmra.mrb[16].mxu0 %vm303_vm0, %v6878_v29  ;;  %v6893_v28 = vld [vmem:[#allocation24_spill] sm:$0xff] }
  0xd6   : > { %5269 = vmatpush3.bf16.msra.mxu1 %v5599_v7  ;;  %4927 = vmatprep.mubr.msk.f32.mxu1 %vm303_vm0, %v5939_v17  ;;  %v6883_v7 = vld [vmem:[#allocation19_spill] sm:$0xff]  ;;  %v6887_v17 = vld [vmem:[#allocation21_spill] sm:$0xff] }
  0xd7   : > { %5159 = vmatprep.mubr.msk.f32.mxu0 %vm303_vm0, %v6879_v30 }
  0xd9   : > { %4928 = vmatmul.mubr.msk.f32.gmra.mrb[2].mxu1 %vm303_vm0, %v5954_v19  ;;  %5160 = vmatmul.mubr.msk.f32.gmra.mrb[18].mxu0 %vm303_vm0, %v6880_v31  ;;  %v6888_v19 = vld [vmem:[#allocation11_spill] sm:$0xff] }
  0xda   : > { %4930 = vmatprep.mubr.msk.f32.mxu1 %vm303_vm0, %v6881_v32  ;;  %5162 = vmatprep.mubr.msk.f32.mxu0 %vm303_vm0, %v6882_v33  ;;  %v6894_v32 = vld [vmem:[#allocation14_spill] sm:$0xff] }
  0xdd   : > { %4931 = vmatmul.mubr.msk.f32.gmra.mrb[4].mxu1 %vm303_vm0, %v6883_v7  ;;  %5163 = vmatmul.mubr.msk.f32.gmra.mrb[20].mxu0 %vm303_vm0, %v6884_v34  ;;  %v6368_v7 = vld [vmem:[%s5627_s24 + $0x181] sm:$0xff] }
  0xde   : > { %4933 = vmatprep.mubr.msk.f32.mxu1 %vm303_vm0, %v6885_v35  ;;  %5165 = vmatprep.mubr.msk.f32.mxu0 %vm303_vm0, %v6886_v55  ;;  %v6895_v35 = vld [vmem:[#allocation26_spill] sm:$0xff] }
  0xe1   : > { %4934 = vmatmul.mubr.msk.f32.gmra.mrb[6].mxu1 %vm303_vm0, %v6887_v17  ;;  %5166 = vmatmul.mubr.msk.f32.gmra.mrb[22].mxu0 %vm303_vm0, %v6888_v19  ;;  %v6896_v17 = vld [vmem:[#allocation15_spill] sm:$0xff] }
  0xe2   : > { %4936 = vmatprep.mubr.msk.f32.mxu1 %vm303_vm0, %v6889_v22  ;;  %5168 = vmatprep.mubr.msk.f32.mxu0 %vm303_vm0, %v6890_v47  ;;  %v6897_v22 = vld [vmem:[#allocation28_spill] sm:$0xff] }
  0xe5   : > { %4937 = vmatmul.mubr.msk.f32.gmra.mrb[8].mxu1 %vm303_vm0, %v6891_v13  ;;  %5169 = vmatmul.mubr.msk.f32.gmra.mrb[24].mxu0 %vm303_vm0, %v6892_v26  ;;  %v6379_v13 = vld [vmem:[%s5627_s24 + $0x189] sm:$0xff] }
  0xe6   : > { %4939 = vmatprep.mubr.msk.f32.mxu1 %vm303_vm0, %v6893_v28  ;;  %5171 = vmatprep.mubr.msk.f32.mxu0 %vm303_vm0, %v6894_v32  ;;  %v4352_v28 = vld [vmem:[%s5627_s24 + $0x199] sm:$0xff] }
  0xe9   : > { %4940 = vmatmul.mubr.msk.f32.gmra.mrb[10].mxu1 %vm303_vm0, %v6895_v35  ;;  %5172 = vmatmul.mubr.msk.f32.gmra.mrb[26].mxu0 %vm303_vm0, %v6896_v17  ;;  %v4353_v35 = vld [vmem:[%s5627_s24 + $0x1a1] sm:$0xff]  ;;  %v6899_v17 = vld [vmem:[#allocation32_spill] sm:$0xff] }
  0xea   : > { %4942 = vmatprep.mubr.msk.f32.mxu1 %vm303_vm0, %v6897_v22  ;;  %5174 = vmatprep.mubr.msk.f32.mxu0 %vm303_vm0, %v6368_v7 }
  0xed   : > { %4943 = vmatmul.mubr.msk.f32.gmra.mrb[12].mxu1 %vm303_vm0, %v6898_v24  ;;  %5175 = vmatmul.mubr.msk.f32.gmra.mrb[28].mxu0 %vm303_vm0, %v6379_v13 }
  0xee   : > { %4945 = vmatprep.mubr.msk.f32.mxu1 %vm303_vm0, %v6060_v12  ;;  %5177 = vmatprep.mubr.msk.f32.mxu0 %vm303_vm0, %v4352_v28  ;;  %v3736_v12 = vld [vmem:[%s6790_s3 + $0x8] sm:$0xff] }
  0xf1   : > { %4946 = vmatmul.mubr.msk.f32.gmra.mrb[14].mxu1 %vm303_vm0, %v6899_v17  ;;  %5178 = vmatmul.mubr.msk.f32.gmra.mrb[30].mxu0 %vm303_vm0, %v4353_v35 }
  0xf2   : > { %4948 = vmatprep.mubr.msk.f32.mxu1 %vm303_vm0, %v6080_v40  ;;  %5184 = vmatprep.mubr.msk.f32.mxu0 %vm303_vm0, %v5758_v42  ;;  %v6900_v40 = vld [vmem:[#allocation27_spill] sm:$0xff]  ;;  %v6901_v42 = vld [vmem:[#allocation29_spill] sm:$0xff] }
  0xf5   : > { %4949 = vmatmul.mubr.msk.f32.gmra.mrb[16].mxu1 %vm303_vm0, %v6092_v45  ;;  %5185 = vmatmul.mubr.msk.f32.vlgmr.msra.gmra.mrb[0].mxu0 %vm303_vm0, %v5770_v44  ;;  %v4418_v44 = vld [vmem:[%s5627_s24 + $0x19a] sm:$0xff]  ;;  %v6902_v45 = vld [vmem:[#allocation15_spill] sm:$0xff] }
  0xf6   : > { %4951 = vmatprep.mubr.msk.f32.mxu1 %vm303_vm0, %v6097_v43  ;;  %5187 = vmatprep.mubr.msk.f32.mxu0 %vm303_vm0, %v5778_v46  ;;  %v6903_v46 = vld [vmem:[#allocation31_spill] sm:$0xff] }
  0xf9   : > { %4952 = vmatmul.mubr.msk.f32.gmra.mrb[18].mxu1 %vm303_vm0, %v6109_v41  ;;  %5188 = vmatmul.mubr.msk.f32.gmra.mrb[2].mxu0 %vm303_vm0, %v5793_v48  ;;  %v4419_v48 = vld [vmem:[%s5627_s24 + $0x1a2] sm:$0xff]  ;;  %v3738_v41 = vld [vmem:[%s6790_s3 + $0x18] sm:$0xff] }
  0xfa   : > { %4954 = vmatprep.mubr.msk.f32.mxu1 %vm303_vm0, %v6112_v51  ;;  %5190 = vmatprep.mubr.msk.f32.mxu0 %vm303_vm0, %v5799_v50  ;;  %v3737_v51 = vld [vmem:[%s6790_s3 + $0x10] sm:$0xff] }
  0xfd   : > { %4955 = vmatmul.mubr.msk.f32.gmra.mrb[20].mxu1 %vm303_vm0, %v6123_v38  ;;  %5191 = vmatmul.mubr.msk.f32.gmra.mrb[4].mxu0 %vm303_vm0, %v5813_v52 }
  0xfe   : > { %4957 = vmatprep.mubr.msk.f32.mxu1 %vm303_vm0, %v6126_v8  ;;  %5193 = vmatprep.mubr.msk.f32.mxu0 %vm303_vm0, %v5819_v54 }
 0x101   : > { %4958 = vmatmul.mubr.msk.f32.gmra.mrb[22].mxu1 %vm303_vm0, %v6137_v10  ;;  %5194 = vmatmul.mubr.msk.f32.gmra.mrb[6].mxu0 %vm303_vm0, %v5833_v56 }
 0x102   : > { %4960 = vmatprep.mubr.msk.f32.mxu1 %vm303_vm0, %v6140_v1  ;;  %5196 = vmatprep.mubr.msk.f32.mxu0 %vm303_vm0, %v5839_v58 }
 0x105   : > { %4961 = vmatmul.mubr.msk.f32.gmra.mrb[24].mxu1 %vm303_vm0, %v6151_v61  ;;  %5197 = vmatmul.mubr.msk.f32.gmra.mrb[8].mxu0 %vm303_vm0, %v5853_v60 }
 0x106   : > { %4963 = vmatprep.mubr.msk.f32.mxu1 %vm303_vm0, %v6154_v57  ;;  %5199 = vmatprep.mubr.msk.f32.mxu0 %vm303_vm0, %v5859_v62 }
 0x109   : > { %4964 = vmatmul.mubr.msk.f32.gmra.mrb[26].mxu1 %vm303_vm0, %v6165_v53  ;;  %5200 = vmatmul.mubr.msk.f32.gmra.mrb[10].mxu0 %vm303_vm0, %v5873_v0 }
 0x10a   : > { %4966 = vmatprep.mubr.msk.f32.mxu1 %vm303_vm0, %v6168_v49  ;;  %5202 = vmatprep.mubr.msk.f32.mxu0 %vm303_vm0, %v5879_v2 }
 0x10d   : > { %4967 = vmatmul.mubr.msk.f32.gmra.mrb[28].mxu1 %vm303_vm0, %v6179_v15  ;;  %5203 = vmatmul.mubr.msk.f32.gmra.mrb[12].mxu0 %vm303_vm0, %v5893_v4  ;;  %v6541_v4 = vld [vmem:[%s6789_s2] ss:$0 sm:$0xff] }
 0x10e   : > { %4969 = vmatprep.mubr.msk.f32.mxu1 %vm303_vm0, %v6232_v36  ;;  %5205 = vmatprep.mubr.msk.f32.mxu0 %vm303_vm0, %v5897_v6 }
 0x111   : > { %4970 = vmatmul.mubr.msk.f32.gmra.mrb[30].mxu1 %vm303_vm0, %v6243_v39  ;;  %5206 = vmatmul.mubr.msk.f32.gmra.mrb[14].mxu0 %vm303_vm0, %v5914_v11 }
 0x112   : > { %5000 = vmatprep.mubr.msk.f32.mxu1 %vm303_vm0, %v6872_v23  ;;  %5208 = vmatprep.mubr.msk.f32.mxu0 %vm303_vm0, %v5922_v14 }
 0x115   : > { %5001 = vmatmul.mubr.msk.f32.vlgmr.msra.gmra.mrb[16].mxu1 %vm303_vm0, %v6874_v25  ;;  %5209 = vmatmul.mubr.msk.f32.gmra.mrb[16].mxu0 %vm303_vm0, %v5934_v16  ;;  %v3735_v16 = vld [vmem:[%s6790_s3] sm:$0xff] }
 0x116   : > { %5003 = vmatprep.mubr.msk.f32.mxu1 %vm303_vm0, %v6876_v27  ;;  %5211 = vmatprep.mubr.msk.f32.mxu0 %vm303_vm0, %v5942_v18 }
 0x119   : > { %5004 = vmatmul.mubr.msk.f32.gmra.mrb[18].mxu1 %vm303_vm0, %v6878_v29  ;;  %5212 = vmatmul.mubr.msk.f32.gmra.mrb[18].mxu0 %vm303_vm0, %v5957_v21 }
 0x11a   : > { %5006 = vmatprep.mubr.msk.f32.mxu1 %vm303_vm0, %v6879_v30  ;;  %5214 = vmatprep.mubr.msk.f32.mxu0 %vm303_vm0, %v5963_v37 }
 0x11d   : > { %5007 = vmatmul.mubr.msk.f32.gmra.mrb[20].mxu1 %vm303_vm0, %v6880_v31  ;;  %5215 = vmatmul.mubr.msk.f32.gmra.mrb[20].mxu0 %vm303_vm0, %v5977_v5 }
 0x11e   : > { %5009 = vmatprep.mubr.msk.f32.mxu1 %vm303_vm0, %v6882_v33  ;;  %5217 = vmatprep.mubr.msk.f32.mxu0 %vm303_vm0, %v5983_v9  ;;  %v3740_v33 = vld [vmem:[%s6790_s3 + $0x28] sm:$0xff] }
 0x121   : > { %5010 = vmatmul.mubr.msk.f32.gmra.mrb[22].mxu1 %vm303_vm0, %v6884_v34  ;;  %5218 = vmatmul.mubr.msk.f32.gmra.mrb[22].mxu0 %vm303_vm0, %v5997_v3  ;;  %v3739_v34 = vld [vmem:[%s6790_s3 + $0x20] sm:$0xff] }
 0x122   : > { %5012 = vmatprep.mubr.msk.f32.mxu1 %vm303_vm0, %v6886_v55  ;;  %5220 = vmatprep.mubr.msk.f32.mxu0 %vm303_vm0, %v6003_v63 }
 0x125   : > { %5013 = vmatmul.mubr.msk.f32.gmra.mrb[24].mxu1 %vm303_vm0, %v6888_v19  ;;  %5221 = vmatmul.mubr.msk.f32.gmra.mrb[24].mxu0 %vm303_vm0, %v6017_v59 }
 0x126   : > { %5015 = vmatprep.mubr.msk.f32.mxu1 %vm303_vm0, %v6890_v47  ;;  %5223 = vmatprep.mubr.msk.f32.mxu0 %vm303_vm0, %v6871_v20 }
 0x129   : > { %5016 = vmatmul.mubr.msk.f32.gmra.mrb[26].mxu1 %vm303_vm0, %v6892_v26  ;;  %5224 = vmatmul.mubr.msk.f32.gmra.mrb[26].mxu0 %vm303_vm0, %v6900_v40 }
 0x12a   : > { %5018 = vmatprep.mubr.msk.f32.mxu1 %vm303_vm0, %v6894_v32  ;;  %5226 = vmatprep.mubr.msk.f32.mxu0 %vm303_vm0, %v6901_v42  ;;  %v3742_v42 = vld [vmem:[%s6790_s3 + $0x38] sm:$0xff] }
 0x12d   : > { %5019 = vmatmul.mubr.msk.f32.gmra.mrb[28].mxu1 %vm303_vm0, %v6902_v45  ;;  %5227 = vmatmul.mubr.msk.f32.gmra.mrb[28].mxu0 %vm303_vm0, %v6903_v46 }
 0x12e   : > { %5021 = vmatprep.mubr.msk.f32.mxu1 %vm303_vm0, %v6368_v7  ;;  %5229 = vmatprep.mubr.msk.f32.mxu0 %vm303_vm0, %v4418_v44  ;;  %v3741_v44 = vld [vmem:[%s6790_s3 + $0x30] sm:$0xff] }
 0x131   : > { %5022 = vmatmul.mubr.msk.f32.gmra.mrb[30].mxu1 %vm303_vm0, %v6379_v13  ;;  %5230 = vmatmul.mubr.msk.f32.gmra.mrb[30].mxu0 %vm303_vm0, %v4419_v48 }
 0x1a8   : > { %v4926_v49 = vpop.f32.mrb[0].mxu1 }
 0x1a9   : > { %v1532_v50 = vpop.f32.mrb[1].mxu1 }
 0x1ac   : > { %v4929_v52 = vpop.f32.mrb[2].mxu1 }
 0x1ad   : > { %v1542_v53 = vpop.f32.mrb[3].mxu1 }
 0x1b0   : > { %v4932_v54 = vpop.f32.mrb[4].mxu1 }
 0x1b1   : > { %v1552_v56 = vpop.f32.mrb[5].mxu1 }
 0x1b4   : > { %v4935_v57 = vpop.f32.mrb[6].mxu1 }
 0x1b5   : > { %v1562_v58 = vpop.f32.mrb[7].mxu1 }
 0x1b8   : > { %v6521_v59 = vpop.f32.mrb[8].mxu1 }
 0x1b9   : > { %v6523_v60 = vpop.f32.mrb[9].mxu1 }
 0x1bc   : > { %v6525_v61 = vpop.f32.mrb[10].mxu1 }
 0x1bd   : > { %v6527_v62 = vpop.f32.mrb[11].mxu1 }
 0x1c0   : > { %v6529_v63 = vpop.f32.mrb[12].mxu1 }
 0x1c1   : > { %v6531_v0 = vpop.f32.mrb[13].mxu1 }
 0x1c4   : > { %v6533_v1 = vpop.f32.mrb[14].mxu1 }
 0x1c5   : > { %v6535_v2 = vpop.f32.mrb[15].mxu1 }
 0x1c8   : > { %v5186_v3 = vpop.f32.mrb[0].mxu0 }
 0x1c9   : > { %v5270_v6 = vadd.f32 %v5186_v3, %v4926_v49  ;;  %v3473_v11 = vpop.f32.mrb[1].mxu0 }
 0x1ca   : > { %v5271_v14 = vadd.f32 %v3473_v11, %v1532_v50 }
 0x1cb   : > { %v3672_v15 = vadd.f32 %v5270_v6, %v6541_v4  ;;  %v3744_v6 = vld [vmem:[%s6790_s3 + $0x48] sm:$0xff] }
 0x1cc   : > { %v3671_v18 = vadd.f32 %v5271_v14, %v6541_v4  ;;  %v5189_v21 = vpop.f32.mrb[2].mxu0 }
 0x1cd   : > { %3704 = vst.msk [vmem:[%s6546_s17 + $0x8] sm:$0xff] %vm303_vm0, %v3672_v15  ;;  %v3768_v37 = vmul.f32 %v3736_v12, %v3672_v15  ;;  %v5272_v38 = vadd.f32 %v5189_v21, %v4929_v52  ;;  %v3483_v5 = vpop.f32.mrb[3].mxu0 }
 0x1ce   : > { %3703 = vst.msk [vmem:[%s6546_s17] sm:$0xff] %vm303_vm0, %v3671_v18  ;;  %v3767_v8 = vmul.f32 %v3735_v16, %v3671_v18  ;;  %v5273_v9 = vadd.f32 %v3483_v5, %v1542_v53 }
 0x1cf   : > { %v3800_v10 = vsel %vm303_vm0, %v3768_v37, 0.0  ;;  %v3674_v43 = vadd.f32 %v5272_v38, %v6541_v4 }
 0x1d0   : > { %v3799_v36 = vsel %vm303_vm0, %v3767_v8, 0.0  ;;  %v3673_v39 = vadd.f32 %v5273_v9, %v6541_v4  ;;  %v5192_v20 = vpop.f32.mrb[4].mxu0  ;;  %v3746_v9 = vld [vmem:[%s6790_s3 + $0x58] sm:$0xff] }
 0x1d1   : > { %v3801_v23 = vadd.f32 %v3800_v10, %v3799_v36  ;;  %3706 = vst.msk [vmem:[%s6546_s17 + $0x18] sm:$0xff] %vm303_vm0, %v3674_v43  ;;  %v5274_v24 = vadd.f32 %v5192_v20, %v4932_v54  ;;  %v3493_v25 = vpop.f32.mrb[5].mxu0  ;;  %v3770_v27 = vmul.f32 %v3738_v41, %v3674_v43 }
 0x1d2   : > { %3705 = vst.msk [vmem:[%s6546_s17 + $0x10] sm:$0xff] %vm303_vm0, %v3673_v39  ;;  %v3769_v29 = vmul.f32 %v3737_v51, %v3673_v39  ;;  %v5275_v30 = vadd.f32 %v3493_v25, %v1552_v56 }
 0x1d3   : > { %v3676_v31 = vadd.f32 %v5274_v24, %v6541_v4  ;;  %v3804_v17 = vsel %vm303_vm0, %v3770_v27, 0.0 }
 0x1d4   : > { %v3802_v55 = vsel %vm303_vm0, %v3769_v29, 0.0  ;;  %v3675_v19 = vadd.f32 %v5275_v30, %v6541_v4  ;;  %v5195_v47 = vpop.f32.mrb[6].mxu0  ;;  %v3748_v29 = vld [vmem:[%s6790_s3 + $0x68] sm:$0xff] }
 0x1d5   : > { %v3803_v26 = vadd.f32 %v3802_v55, %v3801_v23  ;;  %3708 = vst.msk [vmem:[%s6546_s17 + $0x28] sm:$0xff] %vm303_vm0, %v3676_v31  ;;  %v5276_v32 = vadd.f32 %v5195_v47, %v4935_v57  ;;  %v3503_v7 = vpop.f32.mrb[7].mxu0  ;;  %v3772_v22 = vmul.f32 %v3740_v33, %v3676_v31 }
 0x1d6   : > { %3707 = vst.msk [vmem:[%s6546_s17 + $0x20] sm:$0xff] %vm303_vm0, %v3675_v19  ;;  %v3771_v13 = vmul.f32 %v3739_v34, %v3675_v19  ;;  %v5277_v28 = vadd.f32 %v3503_v7, %v1562_v58 }
 0x1d7   : > { %v3805_v35 = vadd.f32 %v3804_v17, %v3803_v26  ;;  %v3678_v40 = vadd.f32 %v5276_v32, %v6541_v4  ;;  %v3808_v53 = vsel %vm303_vm0, %v3772_v22, 0.0  ;;  %v3750_v22 = vld [vmem:[%s6790_s3 + $0x78] sm:$0xff] }
 0x1d8   : > { %v3806_v45 = vsel %vm303_vm0, %v3771_v13, 0.0  ;;  %v3677_v46 = vadd.f32 %v5277_v28, %v6541_v4  ;;  %v5198_v48 = vpop.f32.mrb[8].mxu0 }
 0x1d9   : > { %v3807_v49 = vadd.f32 %v3806_v45, %v3805_v35  ;;  %3710 = vst.msk [vmem:[%s6546_s17 + $0x38] sm:$0xff] %vm303_vm0, %v3678_v40  ;;  %v5278_v50 = vadd.f32 %v5198_v48, %v6521_v59  ;;  %v3513_v52 = vpop.f32.mrb[9].mxu0  ;;  %v3774_v54 = vmul.f32 %v3742_v42, %v3678_v40  ;;  %v3743_v59 = vld [vmem:[%s6790_s3 + $0x40] sm:$0xff] }
 0x1da   : > { %3709 = vst.msk [vmem:[%s6546_s17 + $0x30] sm:$0xff] %vm303_vm0, %v3677_v46  ;;  %v3773_v56 = vmul.f32 %v3741_v44, %v3677_v46  ;;  %v5279_v57 = vadd.f32 %v3513_v52, %v6523_v60 }
 0x1db   : > { %v3809_v58 = vadd.f32 %v3808_v53, %v3807_v49  ;;  %v3680_v3 = vadd.f32 %v5278_v50, %v6541_v4  ;;  %v3812_v18 = vsel %vm303_vm0, %v3774_v54, 0.0  ;;  %v3752_v54 = vld [vmem:[%s6790_s3 + $0x88] sm:$0xff] }
 0x1dc   : > { %v3810_v11 = vsel %vm303_vm0, %v3773_v56, 0.0  ;;  %v3679_v12 = vadd.f32 %v5279_v57, %v6541_v4  ;;  %v5201_v14 = vpop.f32.mrb[10].mxu0  ;;  %v3751_v56 = vld [vmem:[%s6790_s3 + $0x80] sm:$0xff] }
 0x1dd   : > { %v3811_v15 = vadd.f32 %v3810_v11, %v3809_v58  ;;  %3712 = vst.msk [vmem:[%s6546_s17 + $0x48] sm:$0xff] %vm303_vm0, %v3680_v3  ;;  %v5280_v60 = vadd.f32 %v5201_v14, %v6525_v61  ;;  %v3523_v16 = vpop.f32.mrb[11].mxu0  ;;  %v3776_v21 = vmul.f32 %v3744_v6, %v3680_v3  ;;  %v3745_v61 = vld [vmem:[%s6790_s3 + $0x50] sm:$0xff] }
 0x1de   : > { %3711 = vst.msk [vmem:[%s6546_s17 + $0x40] sm:$0xff] %vm303_vm0, %v3679_v12  ;;  %v3775_v37 = vmul.f32 %v3743_v59, %v3679_v12  ;;  %v5281_v38 = vadd.f32 %v3523_v16, %v6527_v62 }
 0x1df   : > { %v3813_v5 = vadd.f32 %v3812_v18, %v3811_v15  ;;  %v3682_v8 = vadd.f32 %v5280_v60, %v6541_v4  ;;  %v3816_v39 = vsel %vm303_vm0, %v3776_v21, 0.0 }
 0x1e0   : > { %v3814_v10 = vsel %vm303_vm0, %v3775_v37, 0.0  ;;  %v3681_v43 = vadd.f32 %v5281_v38, %v6541_v4  ;;  %v5204_v41 = vpop.f32.mrb[12].mxu0  ;;  %v3754_v38 = vld [vmem:[%s6790_s3 + $0x98] sm:$0xff] }
 0x1e1   : > { %v3815_v51 = vadd.f32 %v3814_v10, %v3813_v5  ;;  %3714 = vst.msk [vmem:[%s6546_s17 + $0x58] sm:$0xff] %vm303_vm0, %v3682_v8  ;;  %v5282_v62 = vadd.f32 %v5204_v41, %v6529_v63  ;;  %v3533_v36 = vpop.f32.mrb[13].mxu0  ;;  %v3778_v20 = vmul.f32 %v3746_v9, %v3682_v8  ;;  %v3747_v63 = vld [vmem:[%s6790_s3 + $0x60] sm:$0xff]  ;;  %v3753_v5 = vld [vmem:[%s6790_s3 + $0x90] sm:$0xff] }
 0x1e2   : > { %3713 = vst.msk [vmem:[%s6546_s17 + $0x50] sm:$0xff] %vm303_vm0, %v3681_v43  ;;  %v3777_v23 = vmul.f32 %v3745_v61, %v3681_v43  ;;  %v5283_v24 = vadd.f32 %v3533_v36, %v6531_v0 }
 0x1e3   : > { %v3817_v25 = vadd.f32 %v3816_v39, %v3815_v51  ;;  %v3684_v27 = vadd.f32 %v5282_v62, %v6541_v4  ;;  %v3820_v19 = vsel %vm303_vm0, %v3778_v20, 0.0 }
 0x1e4   : > { %v3818_v30 = vsel %vm303_vm0, %v3777_v23, 0.0  ;;  %v3683_v31 = vadd.f32 %v5283_v24, %v6541_v4  ;;  %v5207_v33 = vpop.f32.mrb[14].mxu0 }
 0x1e5   : > { %v3819_v34 = vadd.f32 %v3818_v30, %v3817_v25  ;;  %3716 = vst.msk [vmem:[%s6546_s17 + $0x68] sm:$0xff] %vm303_vm0, %v3684_v27  ;;  %v5284_v0 = vadd.f32 %v5207_v33, %v6533_v1  ;;  %v3543_v55 = vpop.f32.mrb[15].mxu0  ;;  %v3780_v47 = vmul.f32 %v3748_v29, %v3684_v27  ;;  %v3749_v1 = vld [vmem:[%s6790_s3 + $0x70] sm:$0xff]  ;;  %v3756_v27 = vld [vmem:[%s6790_s3 + $0xa8] sm:$0xff]  ;;  %v3755_v29 = vld [vmem:[%s6790_s3 + $0xa0] sm:$0xff] }
 0x1e6   : > { %3715 = vst.msk [vmem:[%s6546_s17 + $0x60] sm:$0xff] %vm303_vm0, %v3683_v31  ;;  %v3779_v26 = vmul.f32 %v3747_v63, %v3683_v31  ;;  %v5285_v32 = vadd.f32 %v3543_v55, %v6535_v2 }
 0x1e7   : > { %v3821_v7 = vadd.f32 %v3820_v19, %v3819_v34  ;;  %v3686_v17 = vadd.f32 %v5284_v0, %v6541_v4  ;;  %v3824_v46 = vsel %vm303_vm0, %v3780_v47, 0.0 }
 0x1e8   : > { %v3822_v13 = vsel %vm303_vm0, %v3779_v26, 0.0  ;;  %v3685_v28 = vadd.f32 %v5285_v32, %v6541_v4  ;;  %v5002_v35 = vpop.f32.mrb[16].mxu1  ;;  %v5210_v40 = vpop.f32.mrb[16].mxu0 }
 0x1e9   : > { %v3823_v42 = vadd.f32 %v3822_v13, %v3821_v7  ;;  %3718 = vst.msk [vmem:[%s6546_s17 + $0x78] sm:$0xff] %vm303_vm0, %v3686_v17  ;;  %v5286_v2 = vadd.f32 %v5210_v40, %v5002_v35  ;;  %v2000_v44 = vpop.f32.mrb[17].mxu1  ;;  %v3553_v45 = vpop.f32.mrb[17].mxu0  ;;  %v3782_v48 = vmul.f32 %v3750_v22, %v3686_v17  ;;  %v3757_v13 = vld [vmem:[%s6790_s3 + $0xb0] sm:$0xff] }
 0x1ea   : > { %3717 = vst.msk [vmem:[%s6546_s17 + $0x70] sm:$0xff] %vm303_vm0, %v3685_v28  ;;  %v3781_v49 = vmul.f32 %v3749_v1, %v3685_v28  ;;  %v5287_v50 = vadd.f32 %v3553_v45, %v2000_v44  ;;  %v3758_v1 = vld [vmem:[%s6790_s3 + $0xb8] sm:$0xff] }
 0x1eb   : > { %v3825_v52 = vadd.f32 %v3824_v46, %v3823_v42  ;;  %v3688_v53 = vadd.f32 %v5286_v2, %v6541_v4  ;;  %v3828_v15 = vsel %vm303_vm0, %v3782_v48, 0.0 }
 0x1ec   : > { %v3826_v57 = vsel %vm303_vm0, %v3781_v49, 0.0  ;;  %v3687_v58 = vadd.f32 %v5287_v50, %v6541_v4  ;;  %v5005_v3 = vpop.f32.mrb[18].mxu1  ;;  %v5213_v6 = vpop.f32.mrb[18].mxu0 }
 0x1ed   : > { %v3827_v59 = vadd.f32 %v3826_v57, %v3825_v52  ;;  %3720 = vst.msk [vmem:[%s6546_s17 + $0x88] sm:$0xff] %vm303_vm0, %v3688_v53  ;;  %v5288_v11 = vadd.f32 %v5213_v6, %v5005_v3  ;;  %v2010_v12 = vpop.f32.mrb[19].mxu1  ;;  %v3563_v14 = vpop.f32.mrb[19].mxu0  ;;  %v3784_v60 = vmul.f32 %v3752_v54, %v3688_v53  ;;  %v3759_v57 = vld [vmem:[%s6790_s3 + $0xc0] sm:$0xff] }
 0x1ee   : > { %3719 = vst.msk [vmem:[%s6546_s17 + $0x80] sm:$0xff] %vm303_vm0, %v3687_v58  ;;  %v3783_v16 = vmul.f32 %v3751_v56, %v3687_v58  ;;  %v5289_v18 = vadd.f32 %v3563_v14, %v2010_v12  ;;  %v3760_v56 = vld [vmem:[%s6790_s3 + $0xc8] sm:$0xff] }
 0x1ef   : > { %v3829_v21 = vadd.f32 %v3828_v15, %v3827_v59  ;;  %v3690_v37 = vadd.f32 %v5288_v11, %v6541_v4  ;;  %v3832_v36 = vsel %vm303_vm0, %v3784_v60, 0.0 }
 0x1f0   : > { %v3830_v8 = vsel %vm303_vm0, %v3783_v16, 0.0  ;;  %v3689_v9 = vadd.f32 %v5289_v18, %v6541_v4  ;;  %v5008_v61 = vpop.f32.mrb[20].mxu1  ;;  %v5216_v10 = vpop.f32.mrb[20].mxu0 }
 0x1f1   : > { %v3831_v43 = vadd.f32 %v3830_v8, %v3829_v21  ;;  %3722 = vst.msk [vmem:[%s6546_s17 + $0x98] sm:$0xff] %vm303_vm0, %v3690_v37  ;;  %v5290_v41 = vadd.f32 %v5216_v10, %v5008_v61  ;;  %v2020_v51 = vpop.f32.mrb[21].mxu1  ;;  %v3573_v62 = vpop.f32.mrb[21].mxu0  ;;  %v3786_v39 = vmul.f32 %v3754_v38, %v3690_v37  ;;  %v3761_v8 = vld [vmem:[%s6790_s3 + $0xd0] sm:$0xff] }
 0x1f2   : > { %3721 = vst.msk [vmem:[%s6546_s17 + $0x90] sm:$0xff] %vm303_vm0, %v3689_v9  ;;  %v3785_v20 = vmul.f32 %v3753_v5, %v3689_v9  ;;  %v5291_v23 = vadd.f32 %v3573_v62, %v2020_v51  ;;  %v3762_v5 = vld [vmem:[%s6790_s3 + $0xd8] sm:$0xff] }
 0x1f3   : > { %v3833_v24 = vadd.f32 %v3832_v36, %v3831_v43  ;;  %v3692_v25 = vadd.f32 %v5290_v41, %v6541_v4  ;;  %v3836_v47 = vsel %vm303_vm0, %v3786_v39, 0.0 }
 0x1f4   : > { %v3834_v63 = vsel %vm303_vm0, %v3785_v20, 0.0  ;;  %v3691_v30 = vadd.f32 %v5291_v23, %v6541_v4  ;;  %v5011_v31 = vpop.f32.mrb[22].mxu1  ;;  %v5219_v33 = vpop.f32.mrb[22].mxu0 }
 0x1f5   : > { %v3835_v34 = vadd.f32 %v3834_v63, %v3833_v24  ;;  %3724 = vst.msk [vmem:[%s6546_s17 + $0xa8] sm:$0xff] %vm303_vm0, %v3692_v25  ;;  %v5292_v0 = vadd.f32 %v5219_v33, %v5011_v31  ;;  %v2030_v55 = vpop.f32.mrb[23].mxu1  ;;  %v3583_v19 = vpop.f32.mrb[23].mxu0  ;;  %v3788_v26 = vmul.f32 %v3756_v27, %v3692_v25  ;;  %v3763_v63 = vld [vmem:[%s6790_s3 + $0xe0] sm:$0xff] }
 0x1f6   : > { %3723 = vst.msk [vmem:[%s6546_s17 + $0xa0] sm:$0xff] %vm303_vm0, %v3691_v30  ;;  %v3787_v32 = vmul.f32 %v3755_v29, %v3691_v30  ;;  %v5293_v7 = vadd.f32 %v3583_v19, %v2030_v55  ;;  %v3764_v29 = vld [vmem:[%s6790_s3 + $0xe8] sm:$0xff] }
 0x1f7   : > { %v3837_v17 = vadd.f32 %v3836_v47, %v3835_v34  ;;  %v3694_v22 = vadd.f32 %v5292_v0, %v6541_v4  ;;  %v3840_v48 = vsel %vm303_vm0, %v3788_v26, 0.0 }
 0x1f8   : > { %v3838_v28 = vsel %vm303_vm0, %v3787_v32, 0.0  ;;  %v3693_v35 = vadd.f32 %v5293_v7, %v6541_v4  ;;  %v5014_v40 = vpop.f32.mrb[24].mxu1  ;;  %v5222_v42 = vpop.f32.mrb[24].mxu0 }
 0x1f9   : > { %v3839_v2 = vadd.f32 %v3838_v28, %v3837_v17  ;;  %3726 = vst.msk [vmem:[%s6546_s17 + $0xb8] sm:$0xff] %vm303_vm0, %v3694_v22  ;;  %v5294_v44 = vadd.f32 %v5222_v42, %v5014_v40  ;;  %v2040_v45 = vpop.f32.mrb[25].mxu1  ;;  %v3593_v46 = vpop.f32.mrb[25].mxu0  ;;  %v3790_v49 = vmul.f32 %v3758_v1, %v3694_v22  ;;  %v3765_v28 = vld [vmem:[%s6790_s3 + $0xf0] sm:$0xff] }
 0x1fa   : > { %3725 = vst.msk [vmem:[%s6546_s17 + $0xb0] sm:$0xff] %vm303_vm0, %v3693_v35  ;;  %v3789_v50 = vmul.f32 %v3757_v13, %v3693_v35  ;;  %v5295_v52 = vadd.f32 %v3593_v46, %v2040_v45  ;;  %v3766_v13 = vld [vmem:[%s6790_s3 + $0xf8] sm:$0xff] }
 0x1fb   : > { %v3841_v53 = vadd.f32 %v3840_v48, %v3839_v2  ;;  %v3696_v54 = vadd.f32 %v5294_v44, %v6541_v4  ;;  %v3844_v60 = vsel %vm303_vm0, %v3790_v49, 0.0 }
 0x1fc   : > { %v3842_v58 = vsel %vm303_vm0, %v3789_v50, 0.0  ;;  %v3695_v3 = vadd.f32 %v5295_v52, %v6541_v4  ;;  %v5017_v6 = vpop.f32.mrb[26].mxu1  ;;  %v5225_v59 = vpop.f32.mrb[26].mxu0 }
 0x1fd   : > { %v3843_v11 = vadd.f32 %v3842_v58, %v3841_v53  ;;  %3728 = vst.msk [vmem:[%s6546_s17 + $0xc8] sm:$0xff] %vm303_vm0, %v3696_v54  ;;  %v5296_v12 = vadd.f32 %v5225_v59, %v5017_v6  ;;  %v2050_v14 = vpop.f32.mrb[27].mxu1  ;;  %v3603_v15 = vpop.f32.mrb[27].mxu0  ;;  %v3792_v16 = vmul.f32 %v3760_v56, %v3696_v54 }
 0x1fe   : > { %3727 = vst.msk [vmem:[%s6546_s17 + $0xc0] sm:$0xff] %vm303_vm0, %v3695_v3  ;;  %v3791_v18 = vmul.f32 %v3759_v57, %v3695_v3  ;;  %v5297_v21 = vadd.f32 %v3603_v15, %v2050_v14 }
 0x1ff   : > { %v3845_v37 = vadd.f32 %v3844_v60, %v3843_v11  ;;  %v3698_v38 = vadd.f32 %v5296_v12, %v6541_v4  ;;  %v3848_v39 = vsel %vm303_vm0, %v3792_v16, 0.0 }
 0x200   : > { %v3846_v9 = vsel %vm303_vm0, %v3791_v18, 0.0  ;;  %v3697_v61 = vadd.f32 %v5297_v21, %v6541_v4  ;;  %v5020_v10 = vpop.f32.mrb[28].mxu1  ;;  %v5228_v43 = vpop.f32.mrb[28].mxu0 }
 0x201   : > { %v3847_v41 = vadd.f32 %v3846_v9, %v3845_v37  ;;  %3730 = vst.msk [vmem:[%s6546_s17 + $0xd8] sm:$0xff] %vm303_vm0, %v3698_v38  ;;  %v5298_v51 = vadd.f32 %v5228_v43, %v5020_v10  ;;  %v2060_v62 = vpop.f32.mrb[29].mxu1  ;;  %v3613_v36 = vpop.f32.mrb[29].mxu0  ;;  %v3794_v20 = vmul.f32 %v3762_v5, %v3698_v38 }
 0x202   : > { %3729 = vst.msk [vmem:[%s6546_s17 + $0xd0] sm:$0xff] %vm303_vm0, %v3697_v61  ;;  %v3793_v23 = vmul.f32 %v3761_v8, %v3697_v61  ;;  %v5299_v24 = vadd.f32 %v3613_v36, %v2060_v62 }
 0x203   : > { %v3849_v25 = vadd.f32 %v3848_v39, %v3847_v41  ;;  %v3700_v27 = vadd.f32 %v5298_v51, %v6541_v4  ;;  %v3852_v26 = vsel %vm303_vm0, %v3794_v20, 0.0 }
 0x204   : > { %v3850_v30 = vsel %vm303_vm0, %v3793_v23, 0.0  ;;  %v3699_v31 = vadd.f32 %v5299_v24, %v6541_v4  ;;  %v5023_v33 = vpop.f32.mrb[30].mxu1  ;;  %v5231_v34 = vpop.f32.mrb[30].mxu0 }
 0x205   : > { %v3851_v0 = vadd.f32 %v3850_v30, %v3849_v25  ;;  %3732 = vst.msk [vmem:[%s6546_s17 + $0xe8] sm:$0xff] %vm303_vm0, %v3700_v27  ;;  %v5300_v55 = vadd.f32 %v5231_v34, %v5023_v33  ;;  %v2070_v19 = vpop.f32.mrb[31].mxu1  ;;  %v3623_v47 = vpop.f32.mrb[31].mxu0  ;;  %v3796_v32 = vmul.f32 %v3764_v29, %v3700_v27 }
 0x206   : > { %3731 = vst.msk [vmem:[%s6546_s17 + $0xe0] sm:$0xff] %vm303_vm0, %v3699_v31  ;;  %v3795_v7 = vmul.f32 %v3763_v63, %v3699_v31  ;;  %v5301_v17 = vadd.f32 %v3623_v47, %v2070_v19 }
 0x207   : > { %v3853_v22 = vadd.f32 %v3852_v26, %v3851_v0  ;;  %v3702_v1 = vadd.f32 %v5300_v55, %v6541_v4  ;;  %v3856_v2 = vsel %vm303_vm0, %v3796_v32, 0.0 }
 0x208   : > { %v3854_v35 = vsel %vm303_vm0, %v3795_v7, 0.0  ;;  %v3701_v40 = vadd.f32 %v5301_v17, %v6541_v4 }
 0x209   : > { %v3855_v42 = vadd.f32 %v3854_v35, %v3853_v22  ;;  %3734 = vst.msk [vmem:[%s6546_s17 + $0xf8] sm:$0xff] %vm303_vm0, %v3702_v1  ;;  %v3798_v44 = vmul.f32 %v3766_v13, %v3702_v1 }
 0x20a   : > { %3733 = vst.msk [vmem:[%s6546_s17 + $0xf0] sm:$0xff] %vm303_vm0, %v3701_v40  ;;  %v3797_v45 = vmul.f32 %v3765_v28, %v3701_v40 }
 0x20b   : > { %v3857_v46 = vadd.f32 %v3856_v2, %v3855_v42  ;;  %v3860_v50 = vsel %vm303_vm0, %v3798_v44, 0.0 }
 0x20c   : > { %v3858_v48 = vsel %vm303_vm0, %v3797_v45, 0.0 }
 0x20d   : > { %v3859_v49 = vadd.f32 %v3858_v48, %v3857_v46 }
 0x20f   : > { %v3861_v52 = vadd.f32 %v3860_v50, %v3859_v49 }
 0x211   : > { %v3862_v53 = vrot.slane %v3861_v52, 4 }
 0x213   : > { %v3863_v54 = vadd.f32 %v3862_v53, %v3861_v52 }
 0x215   : > { %v3864_v4 = vrot.slane %v3863_v54, 2 }
 0x217   : > { %v3865_v56 = vadd.f32 %v3864_v4, %v3863_v54 }
 0x219   : > { %v3866_v57 = vrot.slane %v3865_v56, 1 }
 0x21b   : > { %v3867_v58 = vadd.f32 %v3866_v57, %v3865_v56 }
 0x21d   : > { %3869 = vst.msk [vmem:[%s233_s20] sm:$0x1] %vm3868_vm1, %v3867_v58 }
 0x21e PF: > { %s16_s18 = sadd.s32 1, %s5541_s18  }
 0x21f   : > { %p13_p4 = scmp.ge.s32.totalorder %s16_s18, 4  }
 0x221   :  { %15 = sbr.rel (!%p13_p4) target bundleno = 1 (0x1), region = 88 }

</bundles_post_ra>
